<compile_context>
chip_gen: v7x
topology: tpu7x:2x2x1
jax: 0.10.0
libtpu: 0.0.40
codegen_flags: <defaults>
</compile_context>

<pallas_src>
import functools

import jax
import jax.numpy as jnp
import numpy as np
from jax.experimental import pallas as pl
from jax.experimental.pallas import tpu as pltpu

EPS = 1e-5
LANE = 128


def _vmem_limit_bytes():
    cap = 64 * 1024 * 1024
    try:
        info = pltpu.get_tpu_info()
        cap = int(getattr(info, "vmem_capacity_bytes", cap)) or cap
    except Exception:
        pass
    # ~3/4 of physical VMEM: 96 MiB on 128-MiB parts (v5e/v6e), 48 MiB on v7x.
    return int(min(max((cap * 3) // 4, 32 * 1024 * 1024), 100 * 1024 * 1024))


VMEM_LIMIT = _vmem_limit_bytes()
ROW_TILE = 1024 if VMEM_LIMIT >= 80 * 1024 * 1024 else 512   # 1x1 matmul tiles
STREAM_TILE = 1024                                            # affine / combine
CONV2_TARGET_ROWS = 512                                       # th * W per strip


def _cparams(sem):
    return pltpu.CompilerParams(dimension_semantics=sem,
                                vmem_limit_bytes=VMEM_LIMIT)


def _round_up(x, m):
    return (x + m - 1) // m * m


def _pad2d(a, rows, cols):
    r, c = a.shape
    if r == rows and c == cols:
        return a
    return jnp.pad(a, ((0, rows - r), (0, cols - c)))


def _pad_cols(a, cols):
    c = a.shape[1]
    return a if c == cols else jnp.pad(a, ((0, 0), (0, cols - c)))


def _pack_vec(v, cols):
    return _pad2d(v.reshape(1, -1).astype(jnp.float32), 1, cols)


def _largest_divisor_leq(n, cap):
    cap = max(1, min(n, cap))
    for d in range(cap, 0, -1):
        if n % d == 0:
            return d
    return 1


# ---------------------------------------------------------------------------
# In-kernel helpers
# ---------------------------------------------------------------------------
def _partial_stats(y):
    """Per-channel partial sum / sum-of-squares folded into 8 meaningful rows."""
    r, c = y.shape
    if r % 8 == 0:
        yr = y.reshape(r // 8, 8, c)
        return jnp.sum(yr, axis=0), jnp.sum(yr * yr, axis=0)
    s = jnp.sum(y, axis=0, keepdims=True)
    q = jnp.sum(y * y, axis=0, keepdims=True)
    z = jnp.zeros((7, c), y.dtype)
    return jnp.concatenate([s, z], axis=0), jnp.concatenate([q, z], axis=0)


def _emit_stats(y, sum_ref, ssq_ref, rows, tile_r):
    """Store partial BN stats; masked re-store only on a ragged last tile."""
    s, q = _partial_stats(y)
    sum_ref[...] = s
    ssq_ref[...] = q
    if rows % tile_r != 0:  # static: only emitted when the grid is ragged
        @pl.when(pl.program_id(0) == pl.num_programs(0) - 1)
        def _():
            ridx = (jax.lax.broadcasted_iota(jnp.int32, (tile_r, 1), 0)
                    + pl.program_id(0) * tile_r)
            ym = jnp.where(ridx < rows, y, 0.0)
            s2, q2 = _partial_stats(ym)
            sum_ref[...] = s2
            ssq_ref[...] = q2


# ---------------------------------------------------------------------------
# Pallas kernels
# ---------------------------------------------------------------------------
def _mm_stats_kernel(x_ref, w_ref, y_ref, sum_ref, ssq_ref, *, rows, tile_r):
    """Row-tile matmul (bf16 MXU, f32 accum) + per-tile BN partial stats."""
    x = x_ref[...]
    if x.dtype != jnp.bfloat16:
        x = x.astype(jnp.bfloat16)
    y = jnp.dot(x, w_ref[...], preferred_element_type=jnp.float32)
    y_ref[...] = y.astype(y_ref.dtype)
    _emit_stats(y, sum_ref, ssq_ref, rows, tile_r)


def _act_mm_stats_kernel(x_ref, s_ref, t_ref, w_ref, y_ref, sum_ref, ssq_ref,
                         *, rows, tile_r):
    """Previous-stage BN(scale/shift)+ReLU fused into this matmul's input."""
    xa = jnp.maximum(x_ref[...].astype(jnp.float32) * s_ref[...] + t_ref[...],
                     0.0)
    y = jnp.dot(xa.astype(jnp.bfloat16), w_ref[...],
                preferred_element_type=jnp.float32)
    y_ref[...] = y.astype(y_ref.dtype)
    _emit_stats(y, sum_ref, ssq_ref, rows, tile_r)


def _affine_relu_kernel(x_ref, s_ref, t_ref, o_ref):
    o_ref[...] = jnp.maximum(
        x_ref[...].astype(jnp.float32) * s_ref[...] + t_ref[...], 0.0
    ).astype(o_ref.dtype)


def _combine_kernel(y_ref, s_ref, t_ref, sc_ref, ss_ref, ts_ref, o_ref):
    main = y_ref[...].astype(jnp.float32) * s_ref[...] + t_ref[...]
    short = sc_ref[...].astype(jnp.float32) * ss_ref[...] + ts_ref[...]
    o_ref[...] = jnp.maximum(main + short, 0.0).astype(o_ref.dtype)


def _conv2_s1_kernel(p_ref, w_ref, y_ref, sum_ref, ssq_ref, buf, sem,
                     *, th, W, Co):
    """Fused 3x3 stride-1 conv: DMA a (th+2)-row halo'd strip of the padded
    NHWC input from HBM, then 9 tap-shifted accumulating MXU matmuls."""
    n = pl.program_id(0)
    t = pl.program_id(1)
    cp = pltpu.make_async_copy(p_ref.at[n, pl.ds(t * th, th + 2)], buf,
                               sem.at[0])
    cp.start()
    cp.wait()
    acc = None
    for kh in range(3):
        for kw in range(3):
            lhs = buf[kh:kh + th, kw:kw + W, :].reshape(th * W, -1)
            part = jnp.dot(lhs, w_ref[kh, kw],
                           preferred_element_type=jnp.float32)
            acc = part if acc is None else acc + part
    y_ref[...] = acc.reshape(1, th, W, Co).astype(y_ref.dtype)
    s, q = _partial_stats(acc)
    sum_ref[...] = s.reshape(1, 1, 8, Co)
    ssq_ref[...] = q.reshape(1, 1, 8, Co)


# ---------------------------------------------------------------------------
# pallas_call wrappers
# ---------------------------------------------------------------------------
def _row_tiled_matmul_stats(x_mat, w_mat, row_tile, in_affine=None,
                            out_dtype=jnp.bfloat16):
    """x_mat: [R, K] bf16, w_mat: [K, C] bf16.  Returns conv output y [R, C]
    (out_dtype) plus batch mean/var [1, C] (f32)."""
    R, K = x_mat.shape
    C = w_mat.shape[1]
    tile = int(min(row_tile, R))
    nt = int(pl.cdiv(R, tile))

    if in_affine is None:
        kernel = functools.partial(_mm_stats_kernel, rows=R, tile_r=tile)
        operands = (x_mat, w_mat)
        in_specs = [pl.BlockSpec((tile, K), lambda i: (i, 0)),
                    pl.BlockSpec((K, C), lambda i: (0, 0))]     # weights resident
    else:
        s_in, t_in = in_affine
        kernel = functools.partial(_act_mm_stats_kernel, rows=R, tile_r=tile)
        operands = (x_mat, s_in, t_in, w_mat)
        in_specs = [pl.BlockSpec((tile, K), lambda i: (i, 0)),
                    pl.BlockSpec((1, K), lambda i: (0, 0)),
                    pl.BlockSpec((1, K), lambda i: (0, 0)),
                    pl.BlockSpec((K, C), lambda i: (0, 0))]     # weights resident

    y, psum, pssq = pl.pallas_call(
        kernel,
        grid=(nt,),
        in_specs=in_specs,
        out_specs=[pl.BlockSpec((tile, C), lambda i: (i, 0)),
                   pl.BlockSpec((8, C), lambda i: (i, 0)),
                   pl.BlockSpec((8, C), lambda i: (i, 0))],
        out_shape=[jax.ShapeDtypeStruct((R, C), out_dtype),
                   jax.ShapeDtypeStruct((nt * 8, C), jnp.float32),
                   jax.ShapeDtypeStruct((nt * 8, C), jnp.float32)],
        compiler_params=_cparams(("parallel",)),
    )(*operands)

    # Tiny per-channel reduce of per-tile partials (f32).  Note: single-pass
    # E[y^2]-E[y]^2; fine for post-conv activations (|mean| << spread).
    mean = jnp.sum(psum, axis=0, keepdims=True) / R
    msq = jnp.sum(pssq, axis=0, keepdims=True) / R
    var = jnp.maximum(msq - mean * mean, 0.0)
    return y, mean, var


def _conv3x3_s1_fused(p_pad, w2):
    """3x3 stride-1 conv over a spatially pre-padded NHWC bf16 input.

    p_pad: [N, H+2, W+2, Ci] (bn1+relu already applied; zero border).
    w2   : [3, 3, Ci, Co] bf16.
    Returns y [N, H, W, Co] bf16 plus batch mean/var [1, Co].
    """
    N, Hp, Wp, Ci = p_pad.shape
    H, W = Hp - 2, Wp - 2
    Co = w2.shape[-1]
    th = _largest_divisor_leq(H, max(1, CONV2_TARGET_ROWS // max(W, 1)))
    nT = H // th
    kernel = functools.partial(_conv2_s1_kernel, th=th, W=W, Co=Co)

    y, psum, pssq = pl.pallas_call(
        kernel,
        grid=(N, nT),
        in_specs=[pl.BlockSpec(memory_space=pl.ANY),                  # HBM, manual DMA
                  pl.BlockSpec((3, 3, Ci, Co), lambda n, t: (0, 0, 0, 0))],
        out_specs=[pl.BlockSpec((1, th, W, Co), lambda n, t: (n, t, 0, 0)),
                   pl.BlockSpec((1, 1, 8, Co), lambda n, t: (n, t, 0, 0)),
                   pl.BlockSpec((1, 1, 8, Co), lambda n, t: (n, t, 0, 0))],
        out_shape=[jax.ShapeDtypeStruct((N, H, W, Co), jnp.bfloat16),
                   jax.ShapeDtypeStruct((N, nT, 8, Co), jnp.float32),
                   jax.ShapeDtypeStruct((N, nT, 8, Co), jnp.float32)],
        scratch_shapes=[pltpu.VMEM((th + 2, W + 2, Ci), jnp.bfloat16),
                        pltpu.SemaphoreType.DMA((1,))],
        compiler_params=_cparams(("parallel", "parallel")),
    )(p_pad, w2)

    rows = N * H * W
    mean = (jnp.sum(psum, axis=(0, 1, 2)) / rows).reshape(1, Co)
    msq = (jnp.sum(pssq, axis=(0, 1, 2)) / rows).reshape(1, Co)
    var = jnp.maximum(msq - mean * mean, 0.0)
    return y, mean, var


def _row_tiled_affine_relu(y, scale, shift, out_dtype):
    R, C = y.shape
    tile = int(min(STREAM_TILE, R))
    nt = int(pl.cdiv(R, tile))
    return pl.pallas_call(
        _affine_relu_kernel,
        grid=(nt,),
        in_specs=[pl.BlockSpec((tile, C), lambda i: (i, 0)),
                  pl.BlockSpec((1, C), lambda i: (0, 0)),
                  pl.BlockSpec((1, C), lambda i: (0, 0))],
        out_specs=pl.BlockSpec((tile, C), lambda i: (i, 0)),
        out_shape=jax.ShapeDtypeStruct((R, C), out_dtype),
        compiler_params=_cparams(("parallel",)),
    )(y, scale, shift)


def _row_tiled_combine(y3, s3, t3, sc, ss, ts, out_dtype=jnp.float32):
    R, C = y3.shape
    tile = int(min(STREAM_TILE, R))
    nt = int(pl.cdiv(R, tile))
    return pl.pallas_call(
        _combine_kernel,
        grid=(nt,),
        in_specs=[pl.BlockSpec((tile, C), lambda i: (i, 0)),
                  pl.BlockSpec((1, C), lambda i: (0, 0)),
                  pl.BlockSpec((1, C), lambda i: (0, 0)),
                  pl.BlockSpec((tile, C), lambda i: (i, 0)),
                  pl.BlockSpec((1, C), lambda i: (0, 0)),
                  pl.BlockSpec((1, C), lambda i: (0, 0))],
        out_specs=pl.BlockSpec((tile, C), lambda i: (i, 0)),
        out_shape=jax.ShapeDtypeStruct((R, C), out_dtype),
        compiler_params=_cparams(("parallel",)),
    )(y3, s3, t3, sc, ss, ts)


# ---------------------------------------------------------------------------
# Parameter init (shapes follow Bottleneck.__init__; BN gamma=1, beta=0)
# ---------------------------------------------------------------------------
def init_bottleneck_params(key, in_planes, planes, stride):
    expansion = 4
    k1, k2, k3, k4 = jax.random.split(key, 4)
    p = dict(
        w1=jax.random.normal(k1, (planes, in_planes, 1, 1), jnp.float32) * 0.1,
        g1=jnp.ones((planes,), jnp.float32), b1=jnp.zeros((planes,), jnp.float32),
        w2=jax.random.normal(k2, (planes, planes, 3, 3), jnp.float32) * 0.1,
        g2=jnp.ones((planes,), jnp.float32), b2=jnp.zeros((planes,), jnp.float32),
        w3=jax.random.normal(k3, (expansion * planes, planes, 1, 1), jnp.float32) * 0.1,
        g3=jnp.ones((expansion * planes,), jnp.float32),
        b3=jnp.zeros((expansion * planes,), jnp.float32),
    )
    if stride != 1 or in_planes != expansion * planes:
        p["ws"] = jax.random.normal(k4, (expansion * planes, in_planes, 1, 1),
                                    jnp.float32) * 0.1
        p["gs"] = jnp.ones((expansion * planes,), jnp.float32)
        p["bs"] = jnp.zeros((expansion * planes,), jnp.float32)
    return p


# ---------------------------------------------------------------------------
# Forward pass
# ---------------------------------------------------------------------------
def _bn_affine(gamma, beta, mean, var, cols):
    s = _pack_vec(gamma, cols) * jax.lax.rsqrt(var + EPS)
    t = _pack_vec(beta, cols) - mean * s
    return s, t


def bottleneck_forward_nhwc(x_nhwc, params, stride):
    N, H, W, Cin = x_nhwc.shape
    planes = params["w1"].shape[0]
    cout = params["w3"].shape[0]
    cin_p = _round_up(Cin, LANE)
    pln_p = _round_up(planes, LANE)
    co_p = _round_up(cout, LANE)

    x_bf = x_nhwc.astype(jnp.bfloat16)
    rows1 = N * H * W

    # ---- conv1 (1x1) + bn1 batch stats ----
    x_mat = _pad_cols(x_bf.reshape(rows1, Cin), cin_p)
    w1m = _pad2d(params["w1"].reshape(planes, Cin).T, cin_p,
                 pln_p).astype(jnp.bfloat16)
    y1, m1, v1 = _row_tiled_matmul_stats(x_mat, w1m, ROW_TILE)
    s1, t1 = _bn_affine(params["g1"], params["b1"], m1, v1, pln_p)

    # bn1-apply + relu (bf16, feeds the 3x3).
    out1 = _row_tiled_affine_relu(y1, s1, t1, jnp.bfloat16)

    # ---- conv2 (3x3, stride, pad=1) + bn2 batch stats ----
    Ho = (H - 1) // stride + 1
    Wo = (W - 1) // stride + 1
    rows2 = N * Ho * Wo
    out1_nhwc = out1.reshape(N, H, W, pln_p)
    w2t = jnp.transpose(params["w2"], (2, 3, 1, 0))             # (3,3,I,O)
    w2t = jnp.pad(w2t, ((0, 0), (0, 0), (0, pln_p - planes),
                        (0, pln_p - planes)))

    if stride == 1 and W % 8 == 0:
        # Fused tap-accumulating 3x3: no im2col materialization.
        p_pad = jnp.pad(out1_nhwc, ((0, 0), (1, 1), (1, 1), (0, 0)))
        y2_4d, m2, v2 = _conv3x3_s1_fused(p_pad, w2t.astype(jnp.bfloat16))
        y2 = y2_4d.reshape(rows2, pln_p)
    else:
        # Fallback: XLA im2col feeding the row-tiled matmul (stride != 1).
        padded = jnp.pad(out1_nhwc, ((0, 0), (1, 1), (1, 1), (0, 0)))
        taps = [padded[:, kh:kh + stride * (Ho - 1) + 1:stride,
                          kw:kw + stride * (Wo - 1) + 1:stride, :]
                for kh in range(3) for kw in range(3)]
        patches = jnp.concatenate(taps, axis=-1).reshape(rows2, 9 * pln_p)
        w2m = w2t.reshape(9 * pln_p, pln_p).astype(jnp.bfloat16)
        y2, m2, v2 = _row_tiled_matmul_stats(patches, w2m, min(ROW_TILE, 512))
    s2, t2 = _bn_affine(params["g2"], params["b2"], m2, v2, pln_p)

    # ---- conv3 (1x1) + bn3 stats; bn2-apply+relu fused into its input ----
    w3m = _pad2d(params["w3"].reshape(cout, planes).T, pln_p,
                 co_p).astype(jnp.bfloat16)
    y3, m3, v3 = _row_tiled_matmul_stats(y2, w3m, ROW_TILE, in_affine=(s2, t2))
    s3, t3 = _bn_affine(params["g3"], params["b3"], m3, v3, co_p)

    # ---- shortcut ----
    if "ws" in params:
        xs = _pad_cols(x_bf[:, ::stride, ::stride, :].reshape(rows2, Cin), cin_p)
        wsm = _pad2d(params["ws"].reshape(cout, Cin).T, cin_p,
                     co_p).astype(jnp.bfloat16)
        sc, ms, vs = _row_tiled_matmul_stats(xs, wsm, ROW_TILE)
        ss, ts = _bn_affine(params["gs"], params["bs"], ms, vs, co_p)
    else:
        sc = _pad_cols(x_bf.reshape(rows2, Cin), co_p)
        ss = jnp.ones((1, co_p), jnp.float32)
        ts = jnp.zeros((1, co_p), jnp.float32)

    # ---- fused bn3-apply + shortcut-bn-apply + add + relu ----
    out3 = _row_tiled_combine(y3, s3, t3, sc, ss, ts)
    return out3[:, :cout].reshape(N, Ho, Wo, cout)


def bottleneck_forward(x_nchw, params, stride):
    # NCHW at the PyTorch module boundary.  When chaining Bottleneck blocks,
    # call bottleneck_forward_nhwc directly to stay channels-last.
    x_nhwc = jnp.transpose(x_nchw, (0, 2, 3, 1))
    out = bottleneck_forward_nhwc(x_nhwc, params, stride)
    return jnp.transpose(out, (0, 3, 1, 2))


# ---------------------------------------------------------------------------
# Pure-JAX reference (bf16 matmul operands, f32 elsewhere; BatchNorm in
# training mode with biased variance, eps=1e-5) — matches kernel numerics.
# ---------------------------------------------------------------------------
def _ref_bottleneck(x, params, stride):
    def conv(a, w, s=1, p=0):
        return jax.lax.conv_general_dilated(
            a.astype(jnp.bfloat16), w.astype(jnp.bfloat16), (s, s),
            ((p, p), (p, p)), dimension_numbers=("NCHW", "OIHW", "NCHW"),
            preferred_element_type=jnp.float32)

    def bn(y, g, b):
        mean = jnp.mean(y, axis=(0, 2, 3), keepdims=True)
        var = jnp.mean((y - mean) ** 2, axis=(0, 2, 3), keepdims=True)
        return ((y - mean) * jax.lax.rsqrt(var + EPS) * g.reshape(1, -1, 1, 1)
                + b.reshape(1, -1, 1, 1))

    out = jax.nn.relu(bn(conv(x, params["w1"]), params["g1"], params["b1"]))
    out = jax.nn.relu(bn(conv(out, params["w2"], stride, 1),
                         params["g2"], params["b2"]))
    out = bn(conv(out, params["w3"]), params["g3"], params["b3"])
    if "ws" in params:
        sc = bn(conv(x, params["ws"], stride), params["gs"], params["bs"])
    else:
        sc = x
    return jax.nn.relu(out + sc)


if __name__ == "__main__":
    fwd = jax.jit(bottleneck_forward, static_argnums=(2,))
    key = jax.random.PRNGKey(0)
    k1, k2, k3, k4 = jax.random.split(key, 4)

    # Case 1: projection shortcut (stride=2) — exercises the im2col fallback.
    N, in_planes, planes, H, W, stride = 2, 16, 8, 16, 16, 2
    x = jax.random.normal(k1, (N, in_planes, H, W), jnp.float32)
    params = init_bottleneck_params(k2, in_planes, planes, stride)
    out = jax.block_until_ready(fwd(x, params, stride))
    ref = _ref_bottleneck(x, params, stride)
    np.testing.assert_allclose(np.asarray(out), np.asarray(ref),
                               rtol=3e-2, atol=3e-2)

    # Case 2: identity shortcut (stride=1) — exercises the fused 3x3 kernel.
    planes2 = 8
    in_planes2 = 4 * planes2
    x2 = jax.random.normal(k3, (N, in_planes2, H, W), jnp.float32)
    params2 = init_bottleneck_params(k4, in_planes2, planes2, 1)
    out2 = jax.block_until_ready(fwd(x2, params2, 1))
    ref2 = _ref_bottleneck(x2, params2, 1)
    np.testing.assert_allclose(np.asarray(out2), np.asarray(ref2),
                               rtol=3e-2, atol=3e-2)

    print("KERNEL_OK")
</pallas_src>

<mosaic_0001>
module attributes {stable_mosaic.version = 11 : i64} {
  func.func @_mm_stats_kernel(%arg0: i32, %arg1: memref<128x128xbf16, #tpu.memory_space<vmem>>, %arg2: memref<128x128xbf16, #tpu.memory_space<vmem>>, %arg3: memref<128x128xbf16, #tpu.memory_space<vmem>>, %arg4: memref<8x128xf32, #tpu.memory_space<vmem>>, %arg5: memref<8x128xf32, #tpu.memory_space<vmem>>) attributes {dimension_semantics = [#tpu.dimension_semantics<parallel>], iteration_bounds = array<i64: 1>, scalar_prefetch = 0 : i64, scratch_operands = 0 : i64, tpu.core_type = #tpu.core_type<tc>, window_params = [{transform_indices = @transform_0, window_bounds = array<i64: 128, 128>}, {pipeline_mode = #tpu.pipeline_mode<synchronous>, transform_indices = @transform_1, window_bounds = array<i64: 128, 128>}, {transform_indices = @transform_2, window_bounds = array<i64: 128, 128>}, {transform_indices = @transform_3, window_bounds = array<i64: 8, 128>}, {transform_indices = @transform_4, window_bounds = array<i64: 8, 128>}]} {
    %c0 = arith.constant 0 : index
    %c0_0 = arith.constant 0 : index
    %0 = vector.load %arg1[%c0, %c0_0] : memref<128x128xbf16, #tpu.memory_space<vmem>>, vector<128x128xbf16>
    %c0_1 = arith.constant 0 : index
    %c0_2 = arith.constant 0 : index
    %1 = vector.load %arg2[%c0_1, %c0_2] : memref<128x128xbf16, #tpu.memory_space<vmem>>, vector<128x128xbf16>
    %cst = arith.constant dense<0.000000e+00> : vector<128x128xf32>
    %2 = tpu.matmul %0, %1, %cst {dimension_numbers = #tpu.dot_dimension_numbers<[1], [0], [0], [1], [0, 0, 1, 1], [], []>} : vector<128x128xbf16>, vector<128x128xbf16>, vector<128x128xf32> -> vector<128x128xf32>
    %3 = arith.truncf %2 : vector<128x128xf32> to vector<128x128xbf16>
    %c0_3 = arith.constant 0 : index
    %c0_4 = arith.constant 0 : index
    %4 = vector.load %arg3[%c0_3, %c0_4] : memref<128x128xbf16, #tpu.memory_space<vmem>>, vector<128x128xbf16>
    tpu.vector_store %arg3[%c0_3, %c0_4], %3 {strides = array<i32>} : memref<128x128xbf16, #tpu.memory_space<vmem>>, vector<128x128xbf16>,
    %5 = vector.shape_cast %2 : vector<128x128xf32> to vector<16x8x128xf32>
    %cst_5 = arith.constant dense<0.000000e+00> : vector<8x128xf32>
    %6 = vector.multi_reduction <add>, %5, %cst_5 [0] : vector<16x8x128xf32> to vector<8x128xf32>
    %7 = arith.mulf %5, %5 : vector<16x8x128xf32>
    %cst_6 = arith.constant dense<0.000000e+00> : vector<8x128xf32>
    %8 = vector.multi_reduction <add>, %7, %cst_6 [0] : vector<16x8x128xf32> to vector<8x128xf32>
    %c0_7 = arith.constant 0 : index
    %c0_8 = arith.constant 0 : index
    %9 = vector.load %arg4[%c0_7, %c0_8] : memref<8x128xf32, #tpu.memory_space<vmem>>, vector<8x128xf32>
    tpu.vector_store %arg4[%c0_7, %c0_8], %6 {strides = array<i32>} : memref<8x128xf32, #tpu.memory_space<vmem>>, vector<8x128xf32>,
    %c0_9 = arith.constant 0 : index
    %c0_10 = arith.constant 0 : index
    %10 = vector.load %arg5[%c0_9, %c0_10] : memref<8x128xf32, #tpu.memory_space<vmem>>, vector<8x128xf32>
    tpu.vector_store %arg5[%c0_9, %c0_10], %8 {strides = array<i32>} : memref<8x128xf32, #tpu.memory_space<vmem>>, vector<8x128xf32>,
    return
  }
  func.func @transform_0(%arg0: i32) -> (i32, i32) {
    %c0_i32 = arith.constant 0 : i32
    %c0_i32_0 = arith.constant 0 : i32
    return %arg0, %c0_i32 : i32, i32
  }
  func.func @transform_1(%arg0: i32) -> (i32, i32) {
    %c0_i32 = arith.constant 0 : i32
    %c0_i32_0 = arith.constant 0 : i32
    %c0_i32_1 = arith.constant 0 : i32
    return %c0_i32, %c0_i32_0 : i32, i32
  }
  func.func @transform_2(%arg0: i32) -> (i32, i32) {
    %c0_i32 = arith.constant 0 : i32
    %c0_i32_0 = arith.constant 0 : i32
    return %arg0, %c0_i32 : i32, i32
  }
  func.func @transform_3(%arg0: i32) -> (i32, i32) {
    %c0_i32 = arith.constant 0 : i32
    %c0_i32_0 = arith.constant 0 : i32
    return %arg0, %c0_i32 : i32, i32
  }
  func.func @transform_4(%arg0: i32) -> (i32, i32) {
    %c0_i32 = arith.constant 0 : i32
    %c0_i32_0 = arith.constant 0 : i32
    return %arg0, %c0_i32 : i32, i32
  }
}

module attributes {stable_mosaic.version = 11 : i64} {
  func.func @_mm_stats_kernel(%arg0: i32, %arg1: memref<512x128xbf16, #tpu.memory_space<vmem>>, %arg2: memref<128x128xbf16, #tpu.memory_space<vmem>>, %arg3: memref<512x128xbf16, #tpu.memory_space<vmem>>, %arg4: memref<8x128xf32, #tpu.memory_space<vmem>>, %arg5: memref<8x128xf32, #tpu.memory_space<vmem>>) attributes {dimension_semantics = [#tpu.dimension_semantics<parallel>], iteration_bounds = array<i64: 1>, scalar_prefetch = 0 : i64, scratch_operands = 0 : i64, tpu.core_type = #tpu.core_type<tc>, window_params = [{transform_indices = @transform_0, window_bounds = array<i64: 512, 128>}, {pipeline_mode = #tpu.pipeline_mode<synchronous>, transform_indices = @transform_1, window_bounds = array<i64: 128, 128>}, {transform_indices = @transform_2, window_bounds = array<i64: 512, 128>}, {transform_indices = @transform_3, window_bounds = array<i64: 8, 128>}, {transform_indices = @transform_4, window_bounds = array<i64: 8, 128>}]} {
    %c0 = arith.constant 0 : index
    %c0_0 = arith.constant 0 : index
    %0 = vector.load %arg1[%c0, %c0_0] : memref<512x128xbf16, #tpu.memory_space<vmem>>, vector<512x128xbf16>
    %c0_1 = arith.constant 0 : index
    %c0_2 = arith.constant 0 : index
    %1 = vector.load %arg2[%c0_1, %c0_2] : memref<128x128xbf16, #tpu.memory_space<vmem>>, vector<128x128xbf16>
    %cst = arith.constant dense<0.000000e+00> : vector<512x128xf32>
    %2 = tpu.matmul %0, %1, %cst {dimension_numbers = #tpu.dot_dimension_numbers<[1], [0], [0], [1], [0, 0, 1, 1], [], []>} : vector<512x128xbf16>, vector<128x128xbf16>, vector<512x128xf32> -> vector<512x128xf32>
    %3 = arith.truncf %2 : vector<512x128xf32> to vector<512x128xbf16>
    %c0_3 = arith.constant 0 : index
    %c0_4 = arith.constant 0 : index
    %4 = vector.load %arg3[%c0_3, %c0_4] : memref<512x128xbf16, #tpu.memory_space<vmem>>, vector<512x128xbf16>
    tpu.vector_store %arg3[%c0_3, %c0_4], %3 {strides = array<i32>} : memref<512x128xbf16, #tpu.memory_space<vmem>>, vector<512x128xbf16>,
    %5 = vector.shape_cast %2 : vector<512x128xf32> to vector<64x8x128xf32>
    %cst_5 = arith.constant dense<0.000000e+00> : vector<8x128xf32>
    %6 = vector.multi_reduction <add>, %5, %cst_5 [0] : vector<64x8x128xf32> to vector<8x128xf32>
    %7 = arith.mulf %5, %5 : vector<64x8x128xf32>
    %cst_6 = arith.constant dense<0.000000e+00> : vector<8x128xf32>
    %8 = vector.multi_reduction <add>, %7, %cst_6 [0] : vector<64x8x128xf32> to vector<8x128xf32>
    %c0_7 = arith.constant 0 : index
    %c0_8 = arith.constant 0 : index
    %9 = vector.load %arg4[%c0_7, %c0_8] : memref<8x128xf32, #tpu.memory_space<vmem>>, vector<8x128xf32>
    tpu.vector_store %arg4[%c0_7, %c0_8], %6 {strides = array<i32>} : memref<8x128xf32, #tpu.memory_space<vmem>>, vector<8x128xf32>,
    %c0_9 = arith.constant 0 : index
    %c0_10 = arith.constant 0 : index
    %10 = vector.load %arg5[%c0_9, %c0_10] : memref<8x128xf32, #tpu.memory_space<vmem>>, vector<8x128xf32>
    tpu.vector_store %arg5[%c0_9, %c0_10], %8 {strides = array<i32>} : memref<8x128xf32, #tpu.memory_space<vmem>>, vector<8x128xf32>,
    return
  }
  func.func @transform_0(%arg0: i32) -> (i32, i32) {
    %c0_i32 = arith.constant 0 : i32
    %c0_i32_0 = arith.constant 0 : i32
    return %arg0, %c0_i32 : i32, i32
  }
  func.func @transform_1(%arg0: i32) -> (i32, i32) {
    %c0_i32 = arith.constant 0 : i32
    %c0_i32_0 = arith.constant 0 : i32
    %c0_i32_1 = arith.constant 0 : i32
    return %c0_i32, %c0_i32_0 : i32, i32
  }
  func.func @transform_2(%arg0: i32) -> (i32, i32) {
    %c0_i32 = arith.constant 0 : i32
    %c0_i32_0 = arith.constant 0 : i32
    return %arg0, %c0_i32 : i32, i32
  }
  func.func @transform_3(%arg0: i32) -> (i32, i32) {
    %c0_i32 = arith.constant 0 : i32
    %c0_i32_0 = arith.constant 0 : i32
    return %arg0, %c0_i32 : i32, i32
  }
  func.func @transform_4(%arg0: i32) -> (i32, i32) {
    %c0_i32 = arith.constant 0 : i32
    %c0_i32_0 = arith.constant 0 : i32
    return %arg0, %c0_i32 : i32, i32
  }
}

module attributes {stable_mosaic.version = 11 : i64} {
  func.func @_affine_relu_kernel(%arg0: i32, %arg1: memref<512x128xbf16, #tpu.memory_space<vmem>>, %arg2: memref<1x128xf32, #tpu.memory_space<vmem>>, %arg3: memref<1x128xf32, #tpu.memory_space<vmem>>, %arg4: memref<512x128xbf16, #tpu.memory_space<vmem>>) attributes {dimension_semantics = [#tpu.dimension_semantics<parallel>], iteration_bounds = array<i64: 1>, scalar_prefetch = 0 : i64, scratch_operands = 0 : i64, tpu.core_type = #tpu.core_type<tc>, window_params = [{transform_indices = @transform_0, window_bounds = array<i64: 512, 128>}, {pipeline_mode = #tpu.pipeline_mode<synchronous>, transform_indices = @transform_1, window_bounds = array<i64: 1, 128>}, {pipeline_mode = #tpu.pipeline_mode<synchronous>, transform_indices = @transform_2, window_bounds = array<i64: 1, 128>}, {transform_indices = @transform_3, window_bounds = array<i64: 512, 128>}]} {
    %c0 = arith.constant 0 : index
    %c0_0 = arith.constant 0 : index
    %0 = vector.load %arg1[%c0, %c0_0] : memref<512x128xbf16, #tpu.memory_space<vmem>>, vector<512x128xbf16>
    %1 = arith.extf %0 : vector<512x128xbf16> to vector<512x128xf32>
    %c0_1 = arith.constant 0 : index
    %c0_2 = arith.constant 0 : index
    %2 = vector.load %arg2[%c0_1, %c0_2] : memref<1x128xf32, #tpu.memory_space<vmem>>, vector<1x128xf32>
    %3 = vector.broadcast %2 : vector<1x128xf32> to vector<512x128xf32>
    %4 = arith.mulf %1, %3 : vector<512x128xf32>
    %c0_3 = arith.constant 0 : index
    %c0_4 = arith.constant 0 : index
    %5 = vector.load %arg3[%c0_3, %c0_4] : memref<1x128xf32, #tpu.memory_space<vmem>>, vector<1x128xf32>
    %6 = vector.broadcast %5 : vector<1x128xf32> to vector<512x128xf32>
    %7 = arith.addf %4, %6 : vector<512x128xf32>
    %cst = arith.constant 0.000000e+00 : f32
    %8 = vector.broadcast %cst : f32 to vector<512x128xf32>
    %9 = arith.maximumf %7, %8 : vector<512x128xf32>
    %10 = arith.truncf %9 : vector<512x128xf32> to vector<512x128xbf16>
    %c0_5 = arith.constant 0 : index
    %c0_6 = arith.constant 0 : index
    %11 = vector.load %arg4[%c0_5, %c0_6] : memref<512x128xbf16, #tpu.memory_space<vmem>>, vector<512x128xbf16>
    tpu.vector_store %arg4[%c0_5, %c0_6], %10 {strides = array<i32>} : memref<512x128xbf16, #tpu.memory_space<vmem>>, vector<512x128xbf16>,
    return
  }
  func.func @transform_0(%arg0: i32) -> (i32, i32) {
    %c0_i32 = arith.constant 0 : i32
    %c0_i32_0 = arith.constant 0 : i32
    return %arg0, %c0_i32 : i32, i32
  }
  func.func @transform_1(%arg0: i32) -> (i32, i32) {
    %c0_i32 = arith.constant 0 : i32
    %c0_i32_0 = arith.constant 0 : i32
    %c0_i32_1 = arith.constant 0 : i32
    return %c0_i32, %c0_i32_0 : i32, i32
  }
  func.func @transform_2(%arg0: i32) -> (i32, i32) {
    %c0_i32 = arith.constant 0 : i32
    %c0_i32_0 = arith.constant 0 : i32
    %c0_i32_1 = arith.constant 0 : i32
    return %c0_i32, %c0_i32_0 : i32, i32
  }
  func.func @transform_3(%arg0: i32) -> (i32, i32) {
    %c0_i32 = arith.constant 0 : i32
    %c0_i32_0 = arith.constant 0 : i32
    return %arg0, %c0_i32 : i32, i32
  }
}

module attributes {stable_mosaic.version = 11 : i64} {
  func.func @_mm_stats_kernel(%arg0: i32, %arg1: memref<128x1152xbf16, #tpu.memory_space<vmem>>, %arg2: memref<1152x128xbf16, #tpu.memory_space<vmem>>, %arg3: memref<128x128xbf16, #tpu.memory_space<vmem>>, %arg4: memref<8x128xf32, #tpu.memory_space<vmem>>, %arg5: memref<8x128xf32, #tpu.memory_space<vmem>>) attributes {dimension_semantics = [#tpu.dimension_semantics<parallel>], iteration_bounds = array<i64: 1>, scalar_prefetch = 0 : i64, scratch_operands = 0 : i64, tpu.core_type = #tpu.core_type<tc>, window_params = [{transform_indices = @transform_0, window_bounds = array<i64: 128, 1152>}, {pipeline_mode = #tpu.pipeline_mode<synchronous>, transform_indices = @transform_1, window_bounds = array<i64: 1152, 128>}, {transform_indices = @transform_2, window_bounds = array<i64: 128, 128>}, {transform_indices = @transform_3, window_bounds = array<i64: 8, 128>}, {transform_indices = @transform_4, window_bounds = array<i64: 8, 128>}]} {
    %c0 = arith.constant 0 : index
    %c0_0 = arith.constant 0 : index
    %0 = vector.load %arg1[%c0, %c0_0] : memref<128x1152xbf16, #tpu.memory_space<vmem>>, vector<128x1152xbf16>
    %c0_1 = arith.constant 0 : index
    %c0_2 = arith.constant 0 : index
    %1 = vector.load %arg2[%c0_1, %c0_2] : memref<1152x128xbf16, #tpu.memory_space<vmem>>, vector<1152x128xbf16>
    %cst = arith.constant dense<0.000000e+00> : vector<128x128xf32>
    %2 = tpu.matmul %0, %1, %cst {dimension_numbers = #tpu.dot_dimension_numbers<[1], [0], [0], [1], [0, 0, 1, 1], [], []>} : vector<128x1152xbf16>, vector<1152x128xbf16>, vector<128x128xf32> -> vector<128x128xf32>
    %3 = arith.truncf %2 : vector<128x128xf32> to vector<128x128xbf16>
    %c0_3 = arith.constant 0 : index
    %c0_4 = arith.constant 0 : index
    %4 = vector.load %arg3[%c0_3, %c0_4] : memref<128x128xbf16, #tpu.memory_space<vmem>>, vector<128x128xbf16>
    tpu.vector_store %arg3[%c0_3, %c0_4], %3 {strides = array<i32>} : memref<128x128xbf16, #tpu.memory_space<vmem>>, vector<128x128xbf16>,
    %5 = vector.shape_cast %2 : vector<128x128xf32> to vector<16x8x128xf32>
    %cst_5 = arith.constant dense<0.000000e+00> : vector<8x128xf32>
    %6 = vector.multi_reduction <add>, %5, %cst_5 [0] : vector<16x8x128xf32> to vector<8x128xf32>
    %7 = arith.mulf %5, %5 : vector<16x8x128xf32>
    %cst_6 = arith.constant dense<0.000000e+00> : vector<8x128xf32>
    %8 = vector.multi_reduction <add>, %7, %cst_6 [0] : vector<16x8x128xf32> to vector<8x128xf32>
    %c0_7 = arith.constant 0 : index
    %c0_8 = arith.constant 0 : index
    %9 = vector.load %arg4[%c0_7, %c0_8] : memref<8x128xf32, #tpu.memory_space<vmem>>, vector<8x128xf32>
    tpu.vector_store %arg4[%c0_7, %c0_8], %6 {strides = array<i32>} : memref<8x128xf32, #tpu.memory_space<vmem>>, vector<8x128xf32>,
    %c0_9 = arith.constant 0 : index
    %c0_10 = arith.constant 0 : index
    %10 = vector.load %arg5[%c0_9, %c0_10] : memref<8x128xf32, #tpu.memory_space<vmem>>, vector<8x128xf32>
    tpu.vector_store %arg5[%c0_9, %c0_10], %8 {strides = array<i32>} : memref<8x128xf32, #tpu.memory_space<vmem>>, vector<8x128xf32>,
    return
  }
  func.func @transform_0(%arg0: i32) -> (i32, i32) {
    %c0_i32 = arith.constant 0 : i32
    %c0_i32_0 = arith.constant 0 : i32
    return %arg0, %c0_i32 : i32, i32
  }
  func.func @transform_1(%arg0: i32) -> (i32, i32) {
    %c0_i32 = arith.constant 0 : i32
    %c0_i32_0 = arith.constant 0 : i32
    %c0_i32_1 = arith.constant 0 : i32
    return %c0_i32, %c0_i32_0 : i32, i32
  }
  func.func @transform_2(%arg0: i32) -> (i32, i32) {
    %c0_i32 = arith.constant 0 : i32
    %c0_i32_0 = arith.constant 0 : i32
    return %arg0, %c0_i32 : i32, i32
  }
  func.func @transform_3(%arg0: i32) -> (i32, i32) {
    %c0_i32 = arith.constant 0 : i32
    %c0_i32_0 = arith.constant 0 : i32
    return %arg0, %c0_i32 : i32, i32
  }
  func.func @transform_4(%arg0: i32) -> (i32, i32) {
    %c0_i32 = arith.constant 0 : i32
    %c0_i32_0 = arith.constant 0 : i32
    return %arg0, %c0_i32 : i32, i32
  }
}

module attributes {stable_mosaic.version = 11 : i64} {
  func.func @_combine_kernel(%arg0: i32, %arg1: memref<128x128xbf16, #tpu.memory_space<vmem>>, %arg2: memref<1x128xf32, #tpu.memory_space<vmem>>, %arg3: memref<1x128xf32, #tpu.memory_space<vmem>>, %arg4: memref<128x128xbf16, #tpu.memory_space<vmem>>, %arg5: memref<1x128xf32, #tpu.memory_space<vmem>>, %arg6: memref<1x128xf32, #tpu.memory_space<vmem>>, %arg7: memref<128x128xf32, #tpu.memory_space<vmem>>) attributes {dimension_semantics = [#tpu.dimension_semantics<parallel>], iteration_bounds = array<i64: 1>, scalar_prefetch = 0 : i64, scratch_operands = 0 : i64, tpu.core_type = #tpu.core_type<tc>, window_params = [{transform_indices = @transform_0, window_bounds = array<i64: 128, 128>}, {pipeline_mode = #tpu.pipeline_mode<synchronous>, transform_indices = @transform_1, window_bounds = array<i64: 1, 128>}, {pipeline_mode = #tpu.pipeline_mode<synchronous>, transform_indices = @transform_2, window_bounds = array<i64: 1, 128>}, {transform_indices = @transform_3, window_bounds = array<i64: 128, 128>}, {pipeline_mode = #tpu.pipeline_mode<synchronous>, transform_indices = @transform_4, window_bounds = array<i64: 1, 128>}, {pipeline_mode = #tpu.pipeline_mode<synchronous>, transform_indices = @transform_5, window_bounds = array<i64: 1, 128>}, {transform_indices = @transform_6, window_bounds = array<i64: 128, 128>}]} {
    %c0 = arith.constant 0 : index
    %c0_0 = arith.constant 0 : index
    %0 = vector.load %arg1[%c0, %c0_0] : memref<128x128xbf16, #tpu.memory_space<vmem>>, vector<128x128xbf16>
    %1 = arith.extf %0 : vector<128x128xbf16> to vector<128x128xf32>
    %c0_1 = arith.constant 0 : index
    %c0_2 = arith.constant 0 : index
    %2 = vector.load %arg2[%c0_1, %c0_2] : memref<1x128xf32, #tpu.memory_space<vmem>>, vector<1x128xf32>
    %3 = vector.broadcast %2 : vector<1x128xf32> to vector<128x128xf32>
    %4 = arith.mulf %1, %3 : vector<128x128xf32>
    %c0_3 = arith.constant 0 : index
    %c0_4 = arith.constant 0 : index
    %5 = vector.load %arg3[%c0_3, %c0_4] : memref<1x128xf32, #tpu.memory_space<vmem>>, vector<1x128xf32>
    %6 = vector.broadcast %5 : vector<1x128xf32> to vector<128x128xf32>
    %7 = arith.addf %4, %6 : vector<128x128xf32>
    %c0_5 = arith.constant 0 : index
    %c0_6 = arith.constant 0 : index
    %8 = vector.load %arg4[%c0_5, %c0_6] : memref<128x128xbf16, #tpu.memory_space<vmem>>, vector<128x128xbf16>
    %9 = arith.extf %8 : vector<128x128xbf16> to vector<128x128xf32>
    %c0_7 = arith.constant 0 : index
    %c0_8 = arith.constant 0 : index
    %10 = vector.load %arg5[%c0_7, %c0_8] : memref<1x128xf32, #tpu.memory_space<vmem>>, vector<1x128xf32>
    %11 = vector.broadcast %10 : vector<1x128xf32> to vector<128x128xf32>
    %12 = arith.mulf %9, %11 : vector<128x128xf32>
    %c0_9 = arith.constant 0 : index
    %c0_10 = arith.constant 0 : index
    %13 = vector.load %arg6[%c0_9, %c0_10] : memref<1x128xf32, #tpu.memory_space<vmem>>, vector<1x128xf32>
    %14 = vector.broadcast %13 : vector<1x128xf32> to vector<128x128xf32>
    %15 = arith.addf %12, %14 : vector<128x128xf32>
    %16 = arith.addf %7, %15 : vector<128x128xf32>
    %cst = arith.constant 0.000000e+00 : f32
    %17 = vector.broadcast %cst : f32 to vector<128x128xf32>
    %18 = arith.maximumf %16, %17 : vector<128x128xf32>
    %c0_11 = arith.constant 0 : index
    %c0_12 = arith.constant 0 : index
    %19 = vector.load %arg7[%c0_11, %c0_12] : memref<128x128xf32, #tpu.memory_space<vmem>>, vector<128x128xf32>
    tpu.vector_store %arg7[%c0_11, %c0_12], %18 {strides = array<i32>} : memref<128x128xf32, #tpu.memory_space<vmem>>, vector<128x128xf32>,
    return
  }
  func.func @transform_0(%arg0: i32) -> (i32, i32) {
    %c0_i32 = arith.constant 0 : i32
    %c0_i32_0 = arith.constant 0 : i32
    return %arg0, %c0_i32 : i32, i32
  }
  func.func @transform_1(%arg0: i32) -> (i32, i32) {
    %c0_i32 = arith.constant 0 : i32
    %c0_i32_0 = arith.constant 0 : i32
    %c0_i32_1 = arith.constant 0 : i32
    return %c0_i32, %c0_i32_0 : i32, i32
  }
  func.func @transform_2(%arg0: i32) -> (i32, i32) {
    %c0_i32 = arith.constant 0 : i32
    %c0_i32_0 = arith.constant 0 : i32
    %c0_i32_1 = arith.constant 0 : i32
    return %c0_i32, %c0_i32_0 : i32, i32
  }
  func.func @transform_3(%arg0: i32) -> (i32, i32) {
    %c0_i32 = arith.constant 0 : i32
    %c0_i32_0 = arith.constant 0 : i32
    return %arg0, %c0_i32 : i32, i32
  }
  func.func @transform_4(%arg0: i32) -> (i32, i32) {
    %c0_i32 = arith.constant 0 : i32
    %c0_i32_0 = arith.constant 0 : i32
    %c0_i32_1 = arith.constant 0 : i32
    return %c0_i32, %c0_i32_0 : i32, i32
  }
  func.func @transform_5(%arg0: i32) -> (i32, i32) {
    %c0_i32 = arith.constant 0 : i32
    %c0_i32_0 = arith.constant 0 : i32
    %c0_i32_1 = arith.constant 0 : i32
    return %c0_i32, %c0_i32_0 : i32, i32
  }
  func.func @transform_6(%arg0: i32) -> (i32, i32) {
    %c0_i32 = arith.constant 0 : i32
    %c0_i32_0 = arith.constant 0 : i32
    return %arg0, %c0_i32 : i32, i32
  }
}

module attributes {stable_mosaic.version = 11 : i64} {
  func.func @_act_mm_stats_kernel(%arg0: i32, %arg1: memref<128x128xbf16, #tpu.memory_space<vmem>>, %arg2: memref<1x128xf32, #tpu.memory_space<vmem>>, %arg3: memref<1x128xf32, #tpu.memory_space<vmem>>, %arg4: memref<128x128xbf16, #tpu.memory_space<vmem>>, %arg5: memref<128x128xbf16, #tpu.memory_space<vmem>>, %arg6: memref<8x128xf32, #tpu.memory_space<vmem>>, %arg7: memref<8x128xf32, #tpu.memory_space<vmem>>) attributes {dimension_semantics = [#tpu.dimension_semantics<parallel>], iteration_bounds = array<i64: 1>, scalar_prefetch = 0 : i64, scratch_operands = 0 : i64, tpu.core_type = #tpu.core_type<tc>, window_params = [{transform_indices = @transform_0, window_bounds = array<i64: 128, 128>}, {pipeline_mode = #tpu.pipeline_mode<synchronous>, transform_indices = @transform_1, window_bounds = array<i64: 1, 128>}, {pipeline_mode = #tpu.pipeline_mode<synchronous>, transform_indices = @transform_2, window_bounds = array<i64: 1, 128>}, {pipeline_mode = #tpu.pipeline_mode<synchronous>, transform_indices = @transform_3, window_bounds = array<i64: 128, 128>}, {transform_indices = @transform_4, window_bounds = array<i64: 128, 128>}, {transform_indices = @transform_5, window_bounds = array<i64: 8, 128>}, {transform_indices = @transform_6, window_bounds = array<i64: 8, 128>}]} {
    %c0 = arith.constant 0 : index
    %c0_0 = arith.constant 0 : index
    %0 = vector.load %arg1[%c0, %c0_0] : memref<128x128xbf16, #tpu.memory_space<vmem>>, vector<128x128xbf16>
    %1 = arith.extf %0 : vector<128x128xbf16> to vector<128x128xf32>
    %c0_1 = arith.constant 0 : index
    %c0_2 = arith.constant 0 : index
    %2 = vector.load %arg2[%c0_1, %c0_2] : memref<1x128xf32, #tpu.memory_space<vmem>>, vector<1x128xf32>
    %3 = vector.broadcast %2 : vector<1x128xf32> to vector<128x128xf32>
    %4 = arith.mulf %1, %3 : vector<128x128xf32>
    %c0_3 = arith.constant 0 : index
    %c0_4 = arith.constant 0 : index
    %5 = vector.load %arg3[%c0_3, %c0_4] : memref<1x128xf32, #tpu.memory_space<vmem>>, vector<1x128xf32>
    %6 = vector.broadcast %5 : vector<1x128xf32> to vector<128x128xf32>
    %7 = arith.addf %4, %6 : vector<128x128xf32>
    %cst = arith.constant 0.000000e+00 : f32
    %8 = vector.broadcast %cst : f32 to vector<128x128xf32>
    %9 = arith.maximumf %7, %8 : vector<128x128xf32>
    %10 = arith.truncf %9 : vector<128x128xf32> to vector<128x128xbf16>
    %c0_5 = arith.constant 0 : index
    %c0_6 = arith.constant 0 : index
    %11 = vector.load %arg4[%c0_5, %c0_6] : memref<128x128xbf16, #tpu.memory_space<vmem>>, vector<128x128xbf16>
    %cst_7 = arith.constant dense<0.000000e+00> : vector<128x128xf32>
    %12 = tpu.matmul %10, %11, %cst_7 {dimension_numbers = #tpu.dot_dimension_numbers<[1], [0], [0], [1], [0, 0, 1, 1], [], []>} : vector<128x128xbf16>, vector<128x128xbf16>, vector<128x128xf32> -> vector<128x128xf32>
    %13 = arith.truncf %12 : vector<128x128xf32> to vector<128x128xbf16>
    %c0_8 = arith.constant 0 : index
    %c0_9 = arith.constant 0 : index
    %14 = vector.load %arg5[%c0_8, %c0_9] : memref<128x128xbf16, #tpu.memory_space<vmem>>, vector<128x128xbf16>
    tpu.vector_store %arg5[%c0_8, %c0_9], %13 {strides = array<i32>} : memref<128x128xbf16, #tpu.memory_space<vmem>>, vector<128x128xbf16>,
    %15 = vector.shape_cast %12 : vector<128x128xf32> to vector<16x8x128xf32>
    %cst_10 = arith.constant dense<0.000000e+00> : vector<8x128xf32>
    %16 = vector.multi_reduction <add>, %15, %cst_10 [0] : vector<16x8x128xf32> to vector<8x128xf32>
    %17 = arith.mulf %15, %15 : vector<16x8x128xf32>
    %cst_11 = arith.constant dense<0.000000e+00> : vector<8x128xf32>
    %18 = vector.multi_reduction <add>, %17, %cst_11 [0] : vector<16x8x128xf32> to vector<8x128xf32>
    %c0_12 = arith.constant 0 : index
    %c0_13 = arith.constant 0 : index
    %19 = vector.load %arg6[%c0_12, %c0_13] : memref<8x128xf32, #tpu.memory_space<vmem>>, vector<8x128xf32>
    tpu.vector_store %arg6[%c0_12, %c0_13], %16 {strides = array<i32>} : memref<8x128xf32, #tpu.memory_space<vmem>>, vector<8x128xf32>,
    %c0_14 = arith.constant 0 : index
    %c0_15 = arith.constant 0 : index
    %20 = vector.load %arg7[%c0_14, %c0_15] : memref<8x128xf32, #tpu.memory_space<vmem>>, vector<8x128xf32>
    tpu.vector_store %arg7[%c0_14, %c0_15], %18 {strides = array<i32>} : memref<8x128xf32, #tpu.memory_space<vmem>>, vector<8x128xf32>,
    return
  }
  func.func @transform_0(%arg0: i32) -> (i32, i32) {
    %c0_i32 = arith.constant 0 : i32
    %c0_i32_0 = arith.constant 0 : i32
    return %arg0, %c0_i32 : i32, i32
  }
  func.func @transform_1(%arg0: i32) -> (i32, i32) {
    %c0_i32 = arith.constant 0 : i32
    %c0_i32_0 = arith.constant 0 : i32
    %c0_i32_1 = arith.constant 0 : i32
    return %c0_i32, %c0_i32_0 : i32, i32
  }
  func.func @transform_2(%arg0: i32) -> (i32, i32) {
    %c0_i32 = arith.constant 0 : i32
    %c0_i32_0 = arith.constant 0 : i32
    %c0_i32_1 = arith.constant 0 : i32
    return %c0_i32, %c0_i32_0 : i32, i32
  }
  func.func @transform_3(%arg0: i32) -> (i32, i32) {
    %c0_i32 = arith.constant 0 : i32
    %c0_i32_0 = arith.constant 0 : i32
    %c0_i32_1 = arith.constant 0 : i32
    return %c0_i32, %c0_i32_0 : i32, i32
  }
  func.func @transform_4(%arg0: i32) -> (i32, i32) {
    %c0_i32 = arith.constant 0 : i32
    %c0_i32_0 = arith.constant 0 : i32
    return %arg0, %c0_i32 : i32, i32
  }
  func.func @transform_5(%arg0: i32) -> (i32, i32) {
    %c0_i32 = arith.constant 0 : i32
    %c0_i32_0 = arith.constant 0 : i32
    return %arg0, %c0_i32 : i32, i32
  }
  func.func @transform_6(%arg0: i32) -> (i32, i32) {
    %c0_i32 = arith.constant 0 : i32
    %c0_i32_0 = arith.constant 0 : i32
    return %arg0, %c0_i32 : i32, i32
  }
}

</mosaic_0001>

<bundles_post_ra>
// kernel: bottleneck_forward.10
= control target key start
LH: loop header
LB: loop body
LE: loop exit
PB: predicated region body
PF: predicated region fallthrough
CT: control target
= control target key end

     0   :  { %s658_s1 = inlined_call_operand.vmem [shape: bf16[128,128], index: 1, kind: input, shape index: {}]   ;;  %s659_s0 = inlined_call_operand.vmem [shape: bf16[128,128], index: 0, kind: input, shape index: {}]   ;;  %s660_s2 = inlined_call_operand.vmem [shape: bf16[128,128], index: 2, kind: output, shape index: {0}]   ;;  %s661_s3 = inlined_call_operand.vmem [shape: f32[8,128], index: 3, kind: output, shape index: {1}]   ;;  %s662_s4 = inlined_call_operand.vmem [shape: f32[8,128], index: 4, kind: output, shape index: {2}]  }
   0x1   :  { %v539_v0 = vld [vmem:[%s658_s1] sm:$0xff]   ;;  %v540_v1 = vld [vmem:[%s658_s1 + $0x8] sm:$0xff]   ;;  %v541_v2 = vld [vmem:[%s658_s1 + $0x10] sm:$0xff]  }
   0x2   :  { %491 = vmatprep.subr.bf16.mxu0 %v539_v0  ;;  %523 = vmatprep.subr.bf16.mxu1 %v539_v0  ;;  %v542_v3 = vld [vmem:[%s658_s1 + $0x18] sm:$0xff]   ;;  %v547_v4 = vld [vmem:[%s659_s0] sm:$0xff]   ;;  %v544_v7 = vld [vmem:[%s658_s1 + $0x28] sm:$0xff]  }
   0x3   :  { %492 = vmatpush3.bf16.msra.mxu0 %v539_v0  ;;  %531 = vmatpush3.bf16.msra.mxu1 %v539_v0  ;;  %v543_v5 = vld [vmem:[%s658_s1 + $0x20] sm:$0xff]   ;;  %v545_v8 = vld [vmem:[%s658_s1 + $0x30] sm:$0xff]   ;;  %v546_v9 = vld [vmem:[%s658_s1 + $0x38] sm:$0xff]  }
   0x4   :  { %493 = vmatprep.subr.bf16.mxu0 %v540_v1  ;;  %524 = vmatprep.subr.bf16.mxu1 %v540_v1  ;;  %v551_v6 = vld [vmem:[%s659_s0 + $0x20] sm:$0xff]   ;;  %v548_v10 = vld [vmem:[%s659_s0 + $0x8] sm:$0xff]   ;;  %v549_v12 = vld [vmem:[%s659_s0 + $0x10] sm:$0xff]  }
   0x5   :  { %507 = vmatprep.mubr.bf16.mxu0 %v547_v4  ;;  %515 = vmatprep.mubr.bf16.mxu1 %v551_v6  ;;  %v552_v11 = vld [vmem:[%s659_s0 + $0x28] sm:$0xff]   ;;  %v553_v13 = vld [vmem:[%s659_s0 + $0x30] sm:$0xff]   ;;  %v550_v14 = vld [vmem:[%s659_s0 + $0x18] sm:$0xff]  }
   0x6   :  { %v554_v15 = vld [vmem:[%s659_s0 + $0x38] sm:$0xff]  }
   0x7   :  { %494 = vmatpush3.bf16.msra.mxu0 %v540_v1  ;;  %532 = vmatpush3.bf16.msra.mxu1 %v540_v1 }
   0x8   :  { %495 = vmatprep.subr.bf16.mxu0 %v541_v2  ;;  %525 = vmatprep.subr.bf16.mxu1 %v541_v2 }
   0xb   :  { %496 = vmatpush3.bf16.msra.mxu0 %v541_v2  ;;  %533 = vmatpush3.bf16.msra.mxu1 %v541_v2 }
   0xc   :  { %497 = vmatprep.subr.bf16.mxu0 %v542_v3  ;;  %526 = vmatprep.subr.bf16.mxu1 %v542_v3 }
   0xf   :  { %498 = vmatpush3.bf16.msra.mxu0 %v542_v3  ;;  %534 = vmatpush3.bf16.msra.mxu1 %v542_v3 }
  0x10   :  { %499 = vmatprep.subr.bf16.mxu0 %v543_v5  ;;  %527 = vmatprep.subr.bf16.mxu1 %v543_v5 }
  0x13   :  { %500 = vmatpush3.bf16.msra.mxu0 %v543_v5  ;;  %535 = vmatpush3.bf16.msra.mxu1 %v543_v5 }
  0x14   :  { %501 = vmatprep.subr.bf16.mxu0 %v544_v7  ;;  %528 = vmatprep.subr.bf16.mxu1 %v544_v7 }
  0x17   :  { %502 = vmatpush3.bf16.msra.mxu0 %v544_v7  ;;  %536 = vmatpush3.bf16.msra.mxu1 %v544_v7 }
  0x18   :  { %503 = vmatprep.subr.bf16.mxu0 %v545_v8  ;;  %529 = vmatprep.subr.bf16.mxu1 %v545_v8 }
  0x1b   :  { %504 = vmatpush3.bf16.msra.mxu0 %v545_v8  ;;  %537 = vmatpush3.bf16.msra.mxu1 %v545_v8 }
  0x1c   :  { %505 = vmatprep.subr.bf16.mxu0 %v546_v9  ;;  %530 = vmatprep.subr.bf16.mxu1 %v546_v9 }
  0x1f   :  { %506 = vmatpush3.bf16.msra.mxu0 %v546_v9  ;;  %538 = vmatpush3.bf16.msra.mxu1 %v546_v9 }
  0x22   :  { %508 = vmatmul.mubr.bf16.vlgmr.msra.gmra.mrb[0].mxu0 %v548_v10  ;;  %516 = vmatmul.mubr.bf16.vlgmr.msra.gmra.mrb[0].mxu1 %v552_v11 }
  0x23   :  { %511 = vmatprep.mubr.bf16.mxu0 %v549_v12  ;;  %519 = vmatprep.mubr.bf16.mxu1 %v553_v13 }
  0x2a   :  { %512 = vmatmul.mubr.bf16.gmra.mrb[4].mxu0 %v550_v14  ;;  %520 = vmatmul.mubr.bf16.gmra.mrb[4].mxu1 %v554_v15 }
  0xf5   :  { %v509_v16 = vpop.f32.mrb[0].mxu0  ;;  %v517_v17 = vpop.f32.mrb[0].mxu1 }
  0xf6   :  { %v177_v18 = vpop.f32.mrb[1].mxu0  ;;  %v209_v19 = vpop.f32.mrb[1].mxu1  ;;  %v337_v31 = vmul.f32 %v509_v16, %v509_v16  ;;  %v345_v3 = vmul.f32 %v517_v17, %v517_v17 }
  0xf7   :  { %v510_v20 = vpop.f32.mrb[2].mxu0  ;;  %v518_v21 = vpop.f32.mrb[2].mxu1  ;;  %v335_v22 = vmul.f32 %v177_v18, %v177_v18  ;;  %v343_v61 = vmul.f32 %v209_v19, %v209_v19 }
  0xf8   :  { %v436_v23 = vpack.c.bf16 %v510_v20, %v509_v16  ;;  %v180_v24 = vpop.f32.mrb[3].mxu0  ;;  %v456_v25 = vpack.c.bf16 %v518_v21, %v517_v17  ;;  %v212_v26 = vpop.f32.mrb[3].mxu1  ;;  %v338_v34 = vmul.f32 %v510_v20, %v510_v20  ;;  %v346_v6 = vmul.f32 %v518_v21, %v518_v21 }
  0xf9   :  { %v431_v27 = vpack.c.bf16 %v180_v24, %v177_v18  ;;  %v320_v28 = vadd.f32 %v180_v24, %v177_v18  ;;  %v336_v29 = vmul.f32 %v180_v24, %v180_v24  ;;  %v451_v30 = vpack.c.bf16 %v212_v26, %v209_v19 }
  0xfa   :  { %468 = vst [vmem:[%s660_s2 + $0x8] sm:$0xff] %v436_v23   ;;  %472 = vst [vmem:[%s660_s2 + $0x28] sm:$0xff] %v456_v25   ;;  %v344_v2 = vmul.f32 %v212_v26, %v212_v26 }
  0xfb   :  { %432 = vst [vmem:[%s660_s2] sm:$0xff] %v431_v27   ;;  %v321_v32 = vadd.f32 %v509_v16, %v320_v28  ;;  %v351_v33 = vadd.f32 %v336_v29, %v335_v22  ;;  %471 = vst [vmem:[%s660_s2 + $0x20] sm:$0xff] %v451_v30  }
  0xfd   :  { %v352_v35 = vadd.f32 %v351_v33, %v337_v31  ;;  %v513_v36 = vpop.f32.mrb[4].mxu0  ;;  %v322_v37 = vadd.f32 %v510_v20, %v321_v32  ;;  %v521_v38 = vpop.f32.mrb[4].mxu1 }
  0xfe   :  { %v193_v39 = vpop.f32.mrb[5].mxu0  ;;  %v225_v40 = vpop.f32.mrb[5].mxu1  ;;  %v341_v55 = vmul.f32 %v513_v36, %v513_v36  ;;  %v349_v15 = vmul.f32 %v521_v38, %v521_v38 }
  0xff   :  { %v323_v41 = vadd.f32 %v322_v37, %v193_v39  ;;  %v339_v42 = vmul.f32 %v193_v39, %v193_v39  ;;  %v353_v43 = vadd.f32 %v352_v35, %v338_v34  ;;  %v514_v44 = vpop.f32.mrb[6].mxu0  ;;  %v522_v45 = vpop.f32.mrb[6].mxu1  ;;  %v347_v9 = vmul.f32 %v225_v40, %v225_v40 }
 0x100   :  { %v446_v46 = vpack.c.bf16 %v514_v44, %v513_v36  ;;  %v196_v47 = vpop.f32.mrb[7].mxu0  ;;  %v466_v48 = vpack.c.bf16 %v522_v45, %v521_v38  ;;  %v228_v49 = vpop.f32.mrb[7].mxu1  ;;  %v342_v58 = vmul.f32 %v514_v44, %v514_v44 }
 0x101   :  { %v354_v50 = vadd.f32 %v353_v43, %v339_v42  ;;  %v441_v51 = vpack.c.bf16 %v196_v47, %v193_v39  ;;  %v324_v52 = vadd.f32 %v323_v41, %v196_v47  ;;  %v340_v53 = vmul.f32 %v196_v47, %v196_v47 }
 0x102   :  { %470 = vst [vmem:[%s660_s2 + $0x18] sm:$0xff] %v446_v46   ;;  %474 = vst [vmem:[%s660_s2 + $0x38] sm:$0xff] %v466_v48   ;;  %v461_v54 = vpack.c.bf16 %v228_v49, %v225_v40  ;;  %v348_v14 = vmul.f32 %v228_v49, %v228_v49 }
 0x103   :  { %469 = vst [vmem:[%s660_s2 + $0x10] sm:$0xff] %v441_v51   ;;  %v325_v56 = vadd.f32 %v513_v36, %v324_v52  ;;  %v355_v57 = vadd.f32 %v354_v50, %v340_v53 }
 0x104   :  { %473 = vst [vmem:[%s660_s2 + $0x30] sm:$0xff] %v461_v54  }
 0x105   :  { %v356_v59 = vadd.f32 %v355_v57, %v341_v55  ;;  %v326_v60 = vadd.f32 %v514_v44, %v325_v56 }
 0x107   :  { %v327_v62 = vadd.f32 %v326_v60, %v209_v19  ;;  %v357_v63 = vadd.f32 %v356_v59, %v342_v58  ;;  %v350_v19 = vmul.f32 %v522_v45, %v522_v45 }
 0x109   :  { %v358_v0 = vadd.f32 %v357_v63, %v343_v61  ;;  %v328_v1 = vadd.f32 %v327_v62, %v212_v26 }
 0x10b   :  { %v329_v4 = vadd.f32 %v517_v17, %v328_v1  ;;  %v359_v5 = vadd.f32 %v358_v0, %v344_v2 }
 0x10d   :  { %v360_v7 = vadd.f32 %v359_v5, %v345_v3  ;;  %v330_v8 = vadd.f32 %v518_v21, %v329_v4 }
 0x10f   :  { %v331_v10 = vadd.f32 %v330_v8, %v225_v40  ;;  %v361_v11 = vadd.f32 %v360_v7, %v346_v6 }
 0x111   :  { %v362_v12 = vadd.f32 %v361_v11, %v347_v9  ;;  %v332_v13 = vadd.f32 %v331_v10, %v228_v49 }
 0x113   :  { %v333_v16 = vadd.f32 %v521_v38, %v332_v13  ;;  %v363_v18 = vadd.f32 %v362_v12, %v348_v14 }
 0x115   :  { %v334_v20 = vadd.f32 %v522_v45, %v333_v16  ;;  %v364_v22 = vadd.f32 %v363_v18, %v349_v15 }
 0x117   :  { %v365_v23 = vadd.f32 %v364_v22, %v350_v19  ;;  %366 = vst [vmem:[%s661_s3] sm:$0xff] %v334_v20 }
 0x119   :  { %367 = vst [vmem:[%s662_s4] sm:$0xff] %v365_v23 }

// kernel: bottleneck_forward.6
= control target key start
LH: loop header
LB: loop body
LE: loop exit
PB: predicated region body
PF: predicated region fallthrough
CT: control target
= control target key end

     0   :  { %s2122_s1 = inlined_call_operand.vmem [shape: bf16[128,128], index: 1, kind: input, shape index: {}]   ;;  %s2123_s0 = inlined_call_operand.vmem [shape: bf16[512,128], index: 0, kind: input, shape index: {}]   ;;  %s2124_s2 = inlined_call_operand.vmem [shape: bf16[512,128], index: 2, kind: output, shape index: {0}]   ;;  %s2125_s3 = inlined_call_operand.vmem [shape: f32[8,128], index: 3, kind: output, shape index: {1}]   ;;  %s2126_s4 = inlined_call_operand.vmem [shape: f32[8,128], index: 4, kind: output, shape index: {2}]  }
   0x1   :  { %v1643_v0 = vld [vmem:[%s2122_s1] sm:$0xff]   ;;  %v1644_v1 = vld [vmem:[%s2122_s1 + $0x8] sm:$0xff]   ;;  %v1645_v2 = vld [vmem:[%s2122_s1 + $0x10] sm:$0xff]  }
   0x2   :  { %1547 = vmatprep.subr.bf16.mxu0 %v1643_v0  ;;  %1627 = vmatprep.subr.bf16.mxu1 %v1643_v0  ;;  %v1646_v3 = vld [vmem:[%s2122_s1 + $0x18] sm:$0xff]   ;;  %v1651_v4 = vld [vmem:[%s2123_s0] sm:$0xff]   ;;  %v1648_v6 = vld [vmem:[%s2122_s1 + $0x28] sm:$0xff]  }
   0x3   :  { %1548 = vmatpush3.bf16.msra.mxu0 %v1643_v0  ;;  %1635 = vmatpush3.bf16.msra.mxu1 %v1643_v0  ;;  %v1647_v5 = vld [vmem:[%s2122_s1 + $0x20] sm:$0xff]   ;;  %v1649_v7 = vld [vmem:[%s2122_s1 + $0x30] sm:$0xff]   ;;  %v1650_v8 = vld [vmem:[%s2122_s1 + $0x38] sm:$0xff]  }
   0x4   :  { %1549 = vmatprep.subr.bf16.mxu0 %v1644_v1  ;;  %1628 = vmatprep.subr.bf16.mxu1 %v1644_v1  ;;  %v1667_v9 = vld [vmem:[%s2123_s0 + $0x80] sm:$0xff]   ;;  %v1652_v10 = vld [vmem:[%s2123_s0 + $0x8] sm:$0xff]   ;;  %v1653_v11 = vld [vmem:[%s2123_s0 + $0x10] sm:$0xff]  }
   0x5   :  { %1563 = vmatprep.mubr.bf16.mxu0 %v1651_v4  ;;  %1595 = vmatprep.mubr.bf16.mxu1 %v1667_v9  ;;  %v1668_v12 = vld [vmem:[%s2123_s0 + $0x88] sm:$0xff]   ;;  %v1669_v13 = vld [vmem:[%s2123_s0 + $0x90] sm:$0xff]   ;;  %v1654_v14 = vld [vmem:[%s2123_s0 + $0x18] sm:$0xff]  }
   0x6   :  { %v1655_v15 = vld [vmem:[%s2123_s0 + $0x20] sm:$0xff]   ;;  %v1670_v16 = vld [vmem:[%s2123_s0 + $0x98] sm:$0xff]   ;;  %v1656_v18 = vld [vmem:[%s2123_s0 + $0x28] sm:$0xff]  }
   0x7   :  { %1550 = vmatpush3.bf16.msra.mxu0 %v1644_v1  ;;  %1636 = vmatpush3.bf16.msra.mxu1 %v1644_v1  ;;  %v1671_v17 = vld [vmem:[%s2123_s0 + $0xa0] sm:$0xff]   ;;  %v1672_v19 = vld [vmem:[%s2123_s0 + $0xa8] sm:$0xff]   ;;  %v1657_v20 = vld [vmem:[%s2123_s0 + $0x30] sm:$0xff]  }
   0x8   :  { %1551 = vmatprep.subr.bf16.mxu0 %v1645_v2  ;;  %1629 = vmatprep.subr.bf16.mxu1 %v1645_v2  ;;  %v1673_v21 = vld [vmem:[%s2123_s0 + $0xb0] sm:$0xff]   ;;  %v1658_v22 = vld [vmem:[%s2123_s0 + $0x38] sm:$0xff]   ;;  %v1659_v24 = vld [vmem:[%s2123_s0 + $0x40] sm:$0xff]  }
   0x9   :  { %v1674_v23 = vld [vmem:[%s2123_s0 + $0xb8] sm:$0xff]   ;;  %v1675_v25 = vld [vmem:[%s2123_s0 + $0xc0] sm:$0xff]   ;;  %v1660_v26 = vld [vmem:[%s2123_s0 + $0x48] sm:$0xff]  }
   0xa   :  { %v1676_v27 = vld [vmem:[%s2123_s0 + $0xc8] sm:$0xff]   ;;  %v1661_v28 = vld [vmem:[%s2123_s0 + $0x50] sm:$0xff]   ;;  %v1662_v30 = vld [vmem:[%s2123_s0 + $0x58] sm:$0xff]  }
   0xb   :  { %1552 = vmatpush3.bf16.msra.mxu0 %v1645_v2  ;;  %1637 = vmatpush3.bf16.msra.mxu1 %v1645_v2  ;;  %v1677_v29 = vld [vmem:[%s2123_s0 + $0xd0] sm:$0xff]   ;;  %v1678_v31 = vld [vmem:[%s2123_s0 + $0xd8] sm:$0xff]   ;;  %v1663_v32 = vld [vmem:[%s2123_s0 + $0x60] sm:$0xff]  }
   0xc   :  { %1553 = vmatprep.subr.bf16.mxu0 %v1646_v3  ;;  %1630 = vmatprep.subr.bf16.mxu1 %v1646_v3  ;;  %v1679_v33 = vld [vmem:[%s2123_s0 + $0xe0] sm:$0xff]   ;;  %v1664_v34 = vld [vmem:[%s2123_s0 + $0x68] sm:$0xff]   ;;  %v1665_v36 = vld [vmem:[%s2123_s0 + $0x70] sm:$0xff]  }
   0xd   :  { %v1680_v35 = vld [vmem:[%s2123_s0 + $0xe8] sm:$0xff]   ;;  %v1681_v37 = vld [vmem:[%s2123_s0 + $0xf0] sm:$0xff]   ;;  %v1666_v38 = vld [vmem:[%s2123_s0 + $0x78] sm:$0xff]  }
   0xe   :  { %v1682_v39 = vld [vmem:[%s2123_s0 + $0xf8] sm:$0xff]  }
   0xf   :  { %1554 = vmatpush3.bf16.msra.mxu0 %v1646_v3  ;;  %1638 = vmatpush3.bf16.msra.mxu1 %v1646_v3 }
  0x10   :  { %1555 = vmatprep.subr.bf16.mxu0 %v1647_v5  ;;  %1631 = vmatprep.subr.bf16.mxu1 %v1647_v5 }
  0x13   :  { %1556 = vmatpush3.bf16.msra.mxu0 %v1647_v5  ;;  %1639 = vmatpush3.bf16.msra.mxu1 %v1647_v5 }
  0x14   :  { %1557 = vmatprep.subr.bf16.mxu0 %v1648_v6  ;;  %1632 = vmatprep.subr.bf16.mxu1 %v1648_v6 }
  0x17   :  { %1558 = vmatpush3.bf16.msra.mxu0 %v1648_v6  ;;  %1640 = vmatpush3.bf16.msra.mxu1 %v1648_v6 }
  0x18   :  { %1559 = vmatprep.subr.bf16.mxu0 %v1649_v7  ;;  %1633 = vmatprep.subr.bf16.mxu1 %v1649_v7 }
  0x1b   :  { %1560 = vmatpush3.bf16.msra.mxu0 %v1649_v7  ;;  %1641 = vmatpush3.bf16.msra.mxu1 %v1649_v7 }
  0x1c   :  { %1561 = vmatprep.subr.bf16.mxu0 %v1650_v8  ;;  %1634 = vmatprep.subr.bf16.mxu1 %v1650_v8 }
  0x1f   :  { %1562 = vmatpush3.bf16.msra.mxu0 %v1650_v8  ;;  %1642 = vmatpush3.bf16.msra.mxu1 %v1650_v8 }
  0x22   :  { %1564 = vmatmul.mubr.bf16.vlgmr.msra.gmra.mrb[0].mxu0 %v1652_v10  ;;  %1596 = vmatmul.mubr.bf16.vlgmr.msra.gmra.mrb[0].mxu1 %v1668_v12 }
  0x23   :  { %1567 = vmatprep.mubr.bf16.mxu0 %v1653_v11  ;;  %1599 = vmatprep.mubr.bf16.mxu1 %v1669_v13 }
  0x2a   :  { %1568 = vmatmul.mubr.bf16.gmra.mrb[4].mxu0 %v1654_v14  ;;  %1600 = vmatmul.mubr.bf16.gmra.mrb[4].mxu1 %v1670_v16 }
  0x2b   :  { %1571 = vmatprep.mubr.bf16.mxu0 %v1655_v15  ;;  %1603 = vmatprep.mubr.bf16.mxu1 %v1671_v17 }
  0x32   :  { %1572 = vmatmul.mubr.bf16.gmra.mrb[8].mxu0 %v1656_v18  ;;  %1604 = vmatmul.mubr.bf16.gmra.mrb[8].mxu1 %v1672_v19 }
  0x33   :  { %1575 = vmatprep.mubr.bf16.mxu0 %v1657_v20  ;;  %1607 = vmatprep.mubr.bf16.mxu1 %v1673_v21 }
  0x3a   :  { %1576 = vmatmul.mubr.bf16.gmra.mrb[12].mxu0 %v1658_v22  ;;  %1608 = vmatmul.mubr.bf16.gmra.mrb[12].mxu1 %v1674_v23 }
  0x3b   :  { %1579 = vmatprep.mubr.bf16.mxu0 %v1659_v24  ;;  %1611 = vmatprep.mubr.bf16.mxu1 %v1675_v25 }
  0x42   :  { %1580 = vmatmul.mubr.bf16.gmra.mrb[16].mxu0 %v1660_v26  ;;  %1612 = vmatmul.mubr.bf16.gmra.mrb[16].mxu1 %v1676_v27 }
  0x43   :  { %1583 = vmatprep.mubr.bf16.mxu0 %v1661_v28  ;;  %1615 = vmatprep.mubr.bf16.mxu1 %v1677_v29 }
  0x4a   :  { %1584 = vmatmul.mubr.bf16.gmra.mrb[20].mxu0 %v1662_v30  ;;  %1616 = vmatmul.mubr.bf16.gmra.mrb[20].mxu1 %v1678_v31 }
  0x4b   :  { %1587 = vmatprep.mubr.bf16.mxu0 %v1663_v32  ;;  %1619 = vmatprep.mubr.bf16.mxu1 %v1679_v33 }
  0x52   :  { %1588 = vmatmul.mubr.bf16.gmra.mrb[24].mxu0 %v1664_v34  ;;  %1620 = vmatmul.mubr.bf16.gmra.mrb[24].mxu1 %v1680_v35 }
  0x53   :  { %1591 = vmatprep.mubr.bf16.mxu0 %v1665_v36  ;;  %1623 = vmatprep.mubr.bf16.mxu1 %v1681_v37 }
  0x5a   :  { %1592 = vmatmul.mubr.bf16.gmra.mrb[28].mxu0 %v1666_v38  ;;  %1624 = vmatmul.mubr.bf16.gmra.mrb[28].mxu1 %v1682_v39 }
  0xf5   :  { %v1565_v40 = vpop.f32.mrb[0].mxu0  ;;  %v1828_v41 = vpop.f32.mrb[0].mxu1 }
  0xf6   :  { %v369_v42 = vpop.f32.mrb[1].mxu0  ;;  %v1830_v43 = vpop.f32.mrb[1].mxu1  ;;  %v1009_v55 = vmul.f32 %v1565_v40, %v1565_v40 }
  0xf7   :  { %v1566_v44 = vpop.f32.mrb[2].mxu0  ;;  %v1832_v45 = vpop.f32.mrb[2].mxu1  ;;  %v1007_v46 = vmul.f32 %v369_v42, %v369_v42 }
  0xf8   :  { %v1324_v47 = vpack.c.bf16 %v1566_v44, %v1565_v40  ;;  %v372_v48 = vpop.f32.mrb[3].mxu0  ;;  %v1404_v49 = vpack.c.bf16 %v1832_v45, %v1828_v41  ;;  %v1836_v50 = vpop.f32.mrb[3].mxu1  ;;  %v1010_v58 = vmul.f32 %v1566_v44, %v1566_v44 }
  0xf9   :  { %v1319_v51 = vpack.c.bf16 %v372_v48, %v369_v42  ;;  %v944_v52 = vadd.f32 %v372_v48, %v369_v42  ;;  %v1008_v53 = vmul.f32 %v372_v48, %v372_v48  ;;  %v1399_v54 = vpack.c.bf16 %v1836_v50, %v1830_v43 }
  0xfa   :  { %1476 = vst [vmem:[%s2124_s2 + $0x8] sm:$0xff] %v1324_v47   ;;  %1492 = vst [vmem:[%s2124_s2 + $0x88] sm:$0xff] %v1404_v49  }
  0xfb   :  { %1320 = vst [vmem:[%s2124_s2] sm:$0xff] %v1319_v51   ;;  %v945_v56 = vadd.f32 %v1565_v40, %v944_v52  ;;  %v1071_v57 = vadd.f32 %v1008_v53, %v1007_v46  ;;  %1491 = vst [vmem:[%s2124_s2 + $0x80] sm:$0xff] %v1399_v54  }
  0xfd   :  { %v1072_v59 = vadd.f32 %v1071_v57, %v1009_v55  ;;  %v1569_v60 = vpop.f32.mrb[4].mxu0  ;;  %v946_v61 = vadd.f32 %v1566_v44, %v945_v56  ;;  %v1852_v62 = vpop.f32.mrb[4].mxu1 }
  0xfe   :  { %v385_v63 = vpop.f32.mrb[5].mxu0  ;;  %v1854_v0 = vpop.f32.mrb[5].mxu1  ;;  %v1013_v15 = vmul.f32 %v1569_v60, %v1569_v60 }
  0xff   :  { %v947_v1 = vadd.f32 %v946_v61, %v385_v63  ;;  %v1011_v2 = vmul.f32 %v385_v63, %v385_v63  ;;  %v1073_v3 = vadd.f32 %v1072_v59, %v1010_v58  ;;  %v1570_v4 = vpop.f32.mrb[6].mxu0  ;;  %v1856_v5 = vpop.f32.mrb[6].mxu1 }
 0x100   :  { %v1334_v6 = vpack.c.bf16 %v1570_v4, %v1569_v60  ;;  %v388_v7 = vpop.f32.mrb[7].mxu0  ;;  %v1414_v8 = vpack.c.bf16 %v1856_v5, %v1852_v62  ;;  %v1860_v9 = vpop.f32.mrb[7].mxu1  ;;  %v1014_v18 = vmul.f32 %v1570_v4, %v1570_v4 }
 0x101   :  { %v1074_v10 = vadd.f32 %v1073_v3, %v1011_v2  ;;  %v1329_v11 = vpack.c.bf16 %v388_v7, %v385_v63  ;;  %v948_v12 = vadd.f32 %v947_v1, %v388_v7  ;;  %v1012_v13 = vmul.f32 %v388_v7, %v388_v7 }
 0x102   :  { %1478 = vst [vmem:[%s2124_s2 + $0x18] sm:$0xff] %v1334_v6   ;;  %1494 = vst [vmem:[%s2124_s2 + $0x98] sm:$0xff] %v1414_v8   ;;  %v1409_v14 = vpack.c.bf16 %v1860_v9, %v1854_v0 }
 0x103   :  { %1477 = vst [vmem:[%s2124_s2 + $0x10] sm:$0xff] %v1329_v11   ;;  %v949_v16 = vadd.f32 %v1569_v60, %v948_v12  ;;  %v1075_v17 = vadd.f32 %v1074_v10, %v1012_v13 }
 0x104   :  { %1493 = vst [vmem:[%s2124_s2 + $0x90] sm:$0xff] %v1409_v14  }
 0x105   :  { %v1076_v19 = vadd.f32 %v1075_v17, %v1013_v15  ;;  %v1573_v20 = vpop.f32.mrb[8].mxu0  ;;  %v950_v21 = vadd.f32 %v1570_v4, %v949_v16  ;;  %v1876_v22 = vpop.f32.mrb[8].mxu1 }
 0x106   :  { %v401_v23 = vpop.f32.mrb[9].mxu0  ;;  %v1878_v24 = vpop.f32.mrb[9].mxu1  ;;  %v1017_v39 = vmul.f32 %v1573_v20, %v1573_v20 }
 0x107   :  { %v951_v25 = vadd.f32 %v950_v21, %v401_v23  ;;  %v1015_v26 = vmul.f32 %v401_v23, %v401_v23  ;;  %v1077_v27 = vadd.f32 %v1076_v19, %v1014_v18  ;;  %v1574_v28 = vpop.f32.mrb[10].mxu0  ;;  %v1880_v29 = vpop.f32.mrb[10].mxu1 }
 0x108   :  { %v1344_v30 = vpack.c.bf16 %v1574_v28, %v1573_v20  ;;  %v404_v31 = vpop.f32.mrb[11].mxu0  ;;  %v1424_v32 = vpack.c.bf16 %v1880_v29, %v1876_v22  ;;  %v1884_v33 = vpop.f32.mrb[11].mxu1  ;;  %v1018_v44 = vmul.f32 %v1574_v28, %v1574_v28 }
 0x109   :  { %v1078_v34 = vadd.f32 %v1077_v27, %v1015_v26  ;;  %v1339_v35 = vpack.c.bf16 %v404_v31, %v401_v23  ;;  %v952_v36 = vadd.f32 %v951_v25, %v404_v31  ;;  %v1016_v37 = vmul.f32 %v404_v31, %v404_v31 }
 0x10a   :  { %1480 = vst [vmem:[%s2124_s2 + $0x28] sm:$0xff] %v1344_v30   ;;  %1496 = vst [vmem:[%s2124_s2 + $0xa8] sm:$0xff] %v1424_v32   ;;  %v1419_v38 = vpack.c.bf16 %v1884_v33, %v1878_v24 }
 0x10b   :  { %1479 = vst [vmem:[%s2124_s2 + $0x20] sm:$0xff] %v1339_v35   ;;  %v953_v40 = vadd.f32 %v1573_v20, %v952_v36  ;;  %v1079_v42 = vadd.f32 %v1078_v34, %v1016_v37 }
 0x10c   :  { %1495 = vst [vmem:[%s2124_s2 + $0xa0] sm:$0xff] %v1419_v38  }
 0x10d   :  { %v1080_v46 = vadd.f32 %v1079_v42, %v1017_v39  ;;  %v1577_v47 = vpop.f32.mrb[12].mxu0  ;;  %v954_v48 = vadd.f32 %v1574_v28, %v953_v40  ;;  %v1900_v49 = vpop.f32.mrb[12].mxu1 }
 0x10e   :  { %v417_v51 = vpop.f32.mrb[13].mxu0  ;;  %v1902_v52 = vpop.f32.mrb[13].mxu1  ;;  %v1021_v6 = vmul.f32 %v1577_v47, %v1577_v47 }
 0x10f   :  { %v955_v53 = vadd.f32 %v954_v48, %v417_v51  ;;  %v1019_v54 = vmul.f32 %v417_v51, %v417_v51  ;;  %v1081_v55 = vadd.f32 %v1080_v46, %v1018_v44  ;;  %v1578_v56 = vpop.f32.mrb[14].mxu0  ;;  %v1904_v57 = vpop.f32.mrb[14].mxu1 }
 0x110   :  { %v1354_v58 = vpack.c.bf16 %v1578_v56, %v1577_v47  ;;  %v420_v59 = vpop.f32.mrb[15].mxu0  ;;  %v1434_v60 = vpack.c.bf16 %v1904_v57, %v1900_v49  ;;  %v1908_v61 = vpop.f32.mrb[15].mxu1  ;;  %v1022_v10 = vmul.f32 %v1578_v56, %v1578_v56 }
 0x111   :  { %v1082_v63 = vadd.f32 %v1081_v55, %v1019_v54  ;;  %v1349_v1 = vpack.c.bf16 %v420_v59, %v417_v51  ;;  %v956_v2 = vadd.f32 %v955_v53, %v420_v59  ;;  %v1020_v3 = vmul.f32 %v420_v59, %v420_v59 }
 0x112   :  { %1482 = vst [vmem:[%s2124_s2 + $0x38] sm:$0xff] %v1354_v58   ;;  %1498 = vst [vmem:[%s2124_s2 + $0xb8] sm:$0xff] %v1434_v60   ;;  %v1429_v4 = vpack.c.bf16 %v1908_v61, %v1902_v52 }
 0x113   :  { %1481 = vst [vmem:[%s2124_s2 + $0x30] sm:$0xff] %v1349_v1   ;;  %v957_v7 = vadd.f32 %v1577_v47, %v956_v2  ;;  %v1083_v8 = vadd.f32 %v1082_v63, %v1020_v3 }
 0x114   :  { %1497 = vst [vmem:[%s2124_s2 + $0xb0] sm:$0xff] %v1429_v4  }
 0x115   :  { %v1084_v11 = vadd.f32 %v1083_v8, %v1021_v6  ;;  %v1581_v12 = vpop.f32.mrb[16].mxu0  ;;  %v958_v13 = vadd.f32 %v1578_v56, %v957_v7  ;;  %v1924_v14 = vpop.f32.mrb[16].mxu1 }
 0x116   :  { %v433_v15 = vpop.f32.mrb[17].mxu0  ;;  %v1926_v16 = vpop.f32.mrb[17].mxu1  ;;  %v1025_v35 = vmul.f32 %v1581_v12, %v1581_v12 }
 0x117   :  { %v959_v17 = vadd.f32 %v958_v13, %v433_v15  ;;  %v1023_v18 = vmul.f32 %v433_v15, %v433_v15  ;;  %v1085_v19 = vadd.f32 %v1084_v11, %v1022_v10  ;;  %v1582_v20 = vpop.f32.mrb[18].mxu0  ;;  %v1928_v21 = vpop.f32.mrb[18].mxu1 }
 0x118   :  { %v1364_v23 = vpack.c.bf16 %v1582_v20, %v1581_v12  ;;  %v436_v25 = vpop.f32.mrb[19].mxu0  ;;  %v1444_v26 = vpack.c.bf16 %v1928_v21, %v1924_v14  ;;  %v1932_v27 = vpop.f32.mrb[19].mxu1  ;;  %v1026_v38 = vmul.f32 %v1582_v20, %v1582_v20 }
 0x119   :  { %v1086_v28 = vadd.f32 %v1085_v19, %v1023_v18  ;;  %v1359_v30 = vpack.c.bf16 %v436_v25, %v433_v15  ;;  %v960_v31 = vadd.f32 %v959_v17, %v436_v25  ;;  %v1024_v32 = vmul.f32 %v436_v25, %v436_v25 }
 0x11a   :  { %1484 = vst [vmem:[%s2124_s2 + $0x48] sm:$0xff] %v1364_v23   ;;  %1500 = vst [vmem:[%s2124_s2 + $0xc8] sm:$0xff] %v1444_v26   ;;  %v1439_v34 = vpack.c.bf16 %v1932_v27, %v1926_v16 }
 0x11b   :  { %1483 = vst [vmem:[%s2124_s2 + $0x40] sm:$0xff] %v1359_v30   ;;  %v961_v36 = vadd.f32 %v1581_v12, %v960_v31  ;;  %v1087_v37 = vadd.f32 %v1086_v28, %v1024_v32 }
 0x11c   :  { %1499 = vst [vmem:[%s2124_s2 + $0xc0] sm:$0xff] %v1439_v34  }
 0x11d   :  { %v1088_v39 = vadd.f32 %v1087_v37, %v1025_v35  ;;  %v1585_v40 = vpop.f32.mrb[20].mxu0  ;;  %v962_v42 = vadd.f32 %v1582_v20, %v961_v36  ;;  %v1948_v44 = vpop.f32.mrb[20].mxu1 }
 0x11e   :  { %v449_v46 = vpop.f32.mrb[21].mxu0  ;;  %v1950_v47 = vpop.f32.mrb[21].mxu1  ;;  %v1029_v6 = vmul.f32 %v1585_v40, %v1585_v40 }
 0x11f   :  { %v963_v48 = vadd.f32 %v962_v42, %v449_v46  ;;  %v1027_v51 = vmul.f32 %v449_v46, %v449_v46  ;;  %v1089_v53 = vadd.f32 %v1088_v39, %v1026_v38  ;;  %v1586_v54 = vpop.f32.mrb[22].mxu0  ;;  %v1952_v55 = vpop.f32.mrb[22].mxu1 }
 0x120   :  { %v1374_v56 = vpack.c.bf16 %v1586_v54, %v1585_v40  ;;  %v452_v58 = vpop.f32.mrb[23].mxu0  ;;  %v1454_v59 = vpack.c.bf16 %v1952_v55, %v1948_v44  ;;  %v1956_v60 = vpop.f32.mrb[23].mxu1  ;;  %v1030_v10 = vmul.f32 %v1586_v54, %v1586_v54 }
 0x121   :  { %v1090_v63 = vadd.f32 %v1089_v53, %v1027_v51  ;;  %v1369_v1 = vpack.c.bf16 %v452_v58, %v449_v46  ;;  %v964_v2 = vadd.f32 %v963_v48, %v452_v58  ;;  %v1028_v3 = vmul.f32 %v452_v58, %v452_v58 }
 0x122   :  { %1486 = vst [vmem:[%s2124_s2 + $0x58] sm:$0xff] %v1374_v56   ;;  %1502 = vst [vmem:[%s2124_s2 + $0xd8] sm:$0xff] %v1454_v59   ;;  %v1449_v4 = vpack.c.bf16 %v1956_v60, %v1950_v47 }
 0x123   :  { %1485 = vst [vmem:[%s2124_s2 + $0x50] sm:$0xff] %v1369_v1   ;;  %v965_v7 = vadd.f32 %v1585_v40, %v964_v2  ;;  %v1091_v8 = vadd.f32 %v1090_v63, %v1028_v3 }
 0x124   :  { %1501 = vst [vmem:[%s2124_s2 + $0xd0] sm:$0xff] %v1449_v4  }
 0x125   :  { %v1092_v11 = vadd.f32 %v1091_v8, %v1029_v6  ;;  %v1589_v12 = vpop.f32.mrb[24].mxu0  ;;  %v966_v13 = vadd.f32 %v1586_v54, %v965_v7  ;;  %v1972_v15 = vpop.f32.mrb[24].mxu1 }
 0x126   :  { %v465_v17 = vpop.f32.mrb[25].mxu0  ;;  %v1974_v18 = vpop.f32.mrb[25].mxu1  ;;  %v1033_v39 = vmul.f32 %v1589_v12, %v1589_v12 }
 0x127   :  { %v967_v19 = vadd.f32 %v966_v13, %v465_v17  ;;  %v1031_v20 = vmul.f32 %v465_v17, %v465_v17  ;;  %v1093_v23 = vadd.f32 %v1092_v11, %v1030_v10  ;;  %v1590_v25 = vpop.f32.mrb[26].mxu0  ;;  %v1976_v26 = vpop.f32.mrb[26].mxu1 }
 0x128   :  { %v1384_v28 = vpack.c.bf16 %v1590_v25, %v1589_v12  ;;  %v468_v30 = vpop.f32.mrb[27].mxu0  ;;  %v1464_v31 = vpack.c.bf16 %v1976_v26, %v1972_v15  ;;  %v1980_v32 = vpop.f32.mrb[27].mxu1  ;;  %v1034_v46 = vmul.f32 %v1590_v25, %v1590_v25 }
 0x129   :  { %v1094_v34 = vadd.f32 %v1093_v23, %v1031_v20  ;;  %v1379_v35 = vpack.c.bf16 %v468_v30, %v465_v17  ;;  %v968_v36 = vadd.f32 %v967_v19, %v468_v30  ;;  %v1032_v37 = vmul.f32 %v468_v30, %v468_v30 }
 0x12a   :  { %1488 = vst [vmem:[%s2124_s2 + $0x68] sm:$0xff] %v1384_v28   ;;  %1504 = vst [vmem:[%s2124_s2 + $0xe8] sm:$0xff] %v1464_v31   ;;  %v1459_v38 = vpack.c.bf16 %v1980_v32, %v1974_v18  ;;  %v1039_v31 = vmul.f32 %v1830_v43, %v1830_v43 }
 0x12b   :  { %1487 = vst [vmem:[%s2124_s2 + $0x60] sm:$0xff] %v1379_v35   ;;  %v969_v40 = vadd.f32 %v1589_v12, %v968_v36  ;;  %v1095_v42 = vadd.f32 %v1094_v34, %v1032_v37 }
 0x12c   :  { %1503 = vst [vmem:[%s2124_s2 + $0xe0] sm:$0xff] %v1459_v38   ;;  %v1040_v38 = vmul.f32 %v1836_v50, %v1836_v50 }
 0x12d   :  { %v1096_v48 = vadd.f32 %v1095_v42, %v1033_v39  ;;  %v1593_v51 = vpop.f32.mrb[28].mxu0  ;;  %v970_v53 = vadd.f32 %v1590_v25, %v969_v40  ;;  %v1996_v54 = vpop.f32.mrb[28].mxu1  ;;  %v1041_v39 = vmul.f32 %v1828_v41, %v1828_v41 }
 0x12e   :  { %v481_v56 = vpop.f32.mrb[29].mxu0  ;;  %v1998_v58 = vpop.f32.mrb[29].mxu1  ;;  %v1037_v19 = vmul.f32 %v1593_v51, %v1593_v51 }
 0x12f   :  { %v971_v59 = vadd.f32 %v970_v53, %v481_v56  ;;  %v1035_v63 = vmul.f32 %v481_v56, %v481_v56  ;;  %v1097_v1 = vadd.f32 %v1096_v48, %v1034_v46  ;;  %v1594_v2 = vpop.f32.mrb[30].mxu0  ;;  %v2000_v3 = vpop.f32.mrb[30].mxu1  ;;  %v1042_v46 = vmul.f32 %v1832_v45, %v1832_v45 }
 0x130   :  { %v1394_v4 = vpack.c.bf16 %v1594_v2, %v1593_v51  ;;  %v484_v6 = vpop.f32.mrb[31].mxu0  ;;  %v1474_v7 = vpack.c.bf16 %v2000_v3, %v1996_v54  ;;  %v2004_v8 = vpop.f32.mrb[31].mxu1  ;;  %v1038_v25 = vmul.f32 %v1594_v2, %v1594_v2 }
 0x131   :  { %v1098_v10 = vadd.f32 %v1097_v1, %v1035_v63  ;;  %v1389_v11 = vpack.c.bf16 %v484_v6, %v481_v56  ;;  %v972_v12 = vadd.f32 %v971_v59, %v484_v6  ;;  %v1036_v13 = vmul.f32 %v484_v6, %v484_v6 }
 0x132   :  { %1490 = vst [vmem:[%s2124_s2 + $0x78] sm:$0xff] %v1394_v4   ;;  %1506 = vst [vmem:[%s2124_s2 + $0xf8] sm:$0xff] %v1474_v7   ;;  %v1469_v17 = vpack.c.bf16 %v2004_v8, %v1998_v58  ;;  %v1044_v63 = vmul.f32 %v1860_v9, %v1860_v9 }
 0x133   :  { %1489 = vst [vmem:[%s2124_s2 + $0x70] sm:$0xff] %v1389_v11   ;;  %v973_v20 = vadd.f32 %v1593_v51, %v972_v12  ;;  %v1099_v23 = vadd.f32 %v1098_v10, %v1036_v13  ;;  %v1048_v12 = vmul.f32 %v1884_v33, %v1884_v33 }
 0x134   :  { %1505 = vst [vmem:[%s2124_s2 + $0xf0] sm:$0xff] %v1469_v17  }
 0x135   :  { %v1100_v28 = vadd.f32 %v1099_v23, %v1037_v19  ;;  %v974_v30 = vadd.f32 %v1594_v2, %v973_v20 }
 0x137   :  { %v975_v34 = vadd.f32 %v974_v30, %v1830_v43  ;;  %v1101_v35 = vadd.f32 %v1100_v28, %v1038_v25  ;;  %v1043_v43 = vmul.f32 %v1854_v0, %v1854_v0  ;;  %v1052_v30 = vmul.f32 %v1908_v61, %v1908_v61 }
 0x139   :  { %v1102_v36 = vadd.f32 %v1101_v35, %v1039_v31  ;;  %v976_v37 = vadd.f32 %v975_v34, %v1836_v50 }
 0x13b   :  { %v977_v40 = vadd.f32 %v1828_v41, %v976_v37  ;;  %v1103_v42 = vadd.f32 %v1102_v36, %v1040_v38  ;;  %v1045_v41 = vmul.f32 %v1852_v62, %v1852_v62 }
 0x13d   :  { %v1104_v48 = vadd.f32 %v1103_v42, %v1041_v39  ;;  %v978_v51 = vadd.f32 %v1832_v45, %v977_v40  ;;  %v1046_v45 = vmul.f32 %v1856_v5, %v1856_v5  ;;  %v1056_v40 = vmul.f32 %v1932_v27, %v1932_v27 }
 0x13f   :  { %v979_v53 = vadd.f32 %v978_v51, %v1854_v0  ;;  %v1105_v56 = vadd.f32 %v1104_v48, %v1042_v46  ;;  %v1047_v0 = vmul.f32 %v1878_v24, %v1878_v24 }
 0x141   :  { %v1106_v59 = vadd.f32 %v1105_v56, %v1043_v43  ;;  %v980_v50 = vadd.f32 %v979_v53, %v1860_v9 }
 0x143   :  { %v981_v1 = vadd.f32 %v1852_v62, %v980_v50  ;;  %v1107_v2 = vadd.f32 %v1106_v59, %v1044_v63  ;;  %v1049_v62 = vmul.f32 %v1876_v22, %v1876_v22  ;;  %v1060_v59 = vmul.f32 %v1956_v60, %v1956_v60 }
 0x145   :  { %v1108_v4 = vadd.f32 %v1107_v2, %v1045_v41  ;;  %v982_v6 = vadd.f32 %v1856_v5, %v981_v1  ;;  %v1050_v5 = vmul.f32 %v1880_v29, %v1880_v29 }
 0x147   :  { %v983_v7 = vadd.f32 %v982_v6, %v1878_v24  ;;  %v1109_v10 = vadd.f32 %v1108_v4, %v1046_v45  ;;  %v1051_v24 = vmul.f32 %v1902_v52, %v1902_v52  ;;  %v1064_v6 = vmul.f32 %v1980_v32, %v1980_v32 }
 0x149   :  { %v1110_v11 = vadd.f32 %v1109_v10, %v1047_v0  ;;  %v984_v9 = vadd.f32 %v983_v7, %v1884_v33 }
 0x14b   :  { %v985_v13 = vadd.f32 %v1876_v22, %v984_v9  ;;  %v1111_v17 = vadd.f32 %v1110_v11, %v1048_v12  ;;  %v1053_v22 = vmul.f32 %v1900_v49, %v1900_v49 }
 0x14d   :  { %v1112_v19 = vadd.f32 %v1111_v17, %v1049_v62  ;;  %v986_v20 = vadd.f32 %v1880_v29, %v985_v13  ;;  %v1054_v29 = vmul.f32 %v1904_v57, %v1904_v57  ;;  %v1068_v13 = vmul.f32 %v2004_v8, %v2004_v8 }
 0x14f   :  { %v987_v23 = vadd.f32 %v986_v20, %v1902_v52  ;;  %v1113_v25 = vadd.f32 %v1112_v19, %v1050_v5  ;;  %v1055_v52 = vmul.f32 %v1926_v16, %v1926_v16 }
 0x151   :  { %v1114_v28 = vadd.f32 %v1113_v25, %v1051_v24  ;;  %v988_v33 = vadd.f32 %v987_v23, %v1908_v61 }
 0x153   :  { %v989_v31 = vadd.f32 %v1900_v49, %v988_v33  ;;  %v1115_v34 = vadd.f32 %v1114_v28, %v1052_v30  ;;  %v1057_v49 = vmul.f32 %v1924_v14, %v1924_v14 }
 0x155   :  { %v1116_v35 = vadd.f32 %v1115_v34, %v1053_v22  ;;  %v990_v36 = vadd.f32 %v1904_v57, %v989_v31  ;;  %v1058_v57 = vmul.f32 %v1928_v21, %v1928_v21 }
 0x157   :  { %v991_v37 = vadd.f32 %v990_v36, %v1926_v16  ;;  %v1117_v38 = vadd.f32 %v1116_v35, %v1054_v29  ;;  %v1059_v16 = vmul.f32 %v1950_v47, %v1950_v47 }
 0x159   :  { %v1118_v39 = vadd.f32 %v1117_v38, %v1055_v52  ;;  %v992_v61 = vadd.f32 %v991_v37, %v1932_v27 }
 0x15b   :  { %v993_v42 = vadd.f32 %v1924_v14, %v992_v61  ;;  %v1119_v46 = vadd.f32 %v1118_v39, %v1056_v40  ;;  %v1061_v14 = vmul.f32 %v1948_v44, %v1948_v44 }
 0x15d   :  { %v1120_v48 = vadd.f32 %v1119_v46, %v1057_v49  ;;  %v994_v51 = vadd.f32 %v1928_v21, %v993_v42  ;;  %v1062_v21 = vmul.f32 %v1952_v55, %v1952_v55 }
 0x15f   :  { %v995_v43 = vadd.f32 %v994_v51, %v1950_v47  ;;  %v1121_v53 = vadd.f32 %v1120_v48, %v1058_v57  ;;  %v1063_v47 = vmul.f32 %v1974_v18, %v1974_v18 }
 0x161   :  { %v1122_v56 = vadd.f32 %v1121_v53, %v1059_v16  ;;  %v996_v27 = vadd.f32 %v995_v43, %v1956_v60 }
 0x163   :  { %v997_v50 = vadd.f32 %v1948_v44, %v996_v27  ;;  %v1123_v63 = vadd.f32 %v1122_v56, %v1060_v59  ;;  %v1065_v44 = vmul.f32 %v1972_v15, %v1972_v15 }
 0x165   :  { %v1124_v41 = vadd.f32 %v1123_v63, %v1061_v14  ;;  %v998_v1 = vadd.f32 %v1952_v55, %v997_v50  ;;  %v1066_v55 = vmul.f32 %v1976_v26, %v1976_v26 }
 0x167   :  { %v999_v2 = vadd.f32 %v998_v1, %v1974_v18  ;;  %v1125_v45 = vadd.f32 %v1124_v41, %v1062_v21  ;;  %v1067_v18 = vmul.f32 %v1998_v58, %v1998_v58 }
 0x169   :  { %v1126_v4 = vadd.f32 %v1125_v45, %v1063_v47  ;;  %v1000_v60 = vadd.f32 %v999_v2, %v1980_v32 }
 0x16b   :  { %v1001_v0 = vadd.f32 %v1972_v15, %v1000_v60  ;;  %v1127_v7 = vadd.f32 %v1126_v4, %v1064_v6  ;;  %v1069_v15 = vmul.f32 %v1996_v54, %v1996_v54 }
 0x16d   :  { %v1128_v10 = vadd.f32 %v1127_v7, %v1065_v44  ;;  %v1002_v11 = vadd.f32 %v1976_v26, %v1001_v0  ;;  %v1070_v26 = vmul.f32 %v2000_v3, %v2000_v3 }
 0x16f   :  { %v1003_v9 = vadd.f32 %v1002_v11, %v1998_v58  ;;  %v1129_v12 = vadd.f32 %v1128_v10, %v1066_v55 }
 0x171   :  { %v1130_v62 = vadd.f32 %v1129_v12, %v1067_v18  ;;  %v1004_v32 = vadd.f32 %v1003_v9, %v2004_v8 }
 0x173   :  { %v1005_v17 = vadd.f32 %v1996_v54, %v1004_v32  ;;  %v1131_v5 = vadd.f32 %v1130_v62, %v1068_v13 }
 0x175   :  { %v1006_v19 = vadd.f32 %v2000_v3, %v1005_v17  ;;  %v1132_v20 = vadd.f32 %v1131_v5, %v1069_v15 }
 0x177   :  { %v1133_v58 = vadd.f32 %v1132_v20, %v1070_v26  ;;  %1134 = vst [vmem:[%s2125_s3] sm:$0xff] %v1006_v19 }
 0x179   :  { %1135 = vst [vmem:[%s2126_s4] sm:$0xff] %v1133_v58 }

// kernel: bottleneck_forward.7
= control target key start
LH: loop header
LB: loop body
LE: loop exit
PB: predicated region body
PF: predicated region fallthrough
CT: control target
= control target key end

     0   :  { %s1502_s0 = inlined_call_operand.vmem [shape: bf16[512,128], index: 0, kind: input, shape index: {}]   ;;  %s1503_s1 = inlined_call_operand.vmem [shape: f32[1,128], index: 1, kind: input, shape index: {}]   ;;  %s1504_s2 = inlined_call_operand.vmem [shape: f32[1,128], index: 2, kind: input, shape index: {}]   ;;  %s1505_s3 = inlined_call_operand.vmem [shape: bf16[512,128], index: 3, kind: output, shape index: {}]  }
   0x1   :  { %v803_v0 = vld [vmem:[%s1502_s0] sm:$0xff]   ;;  %v1090_v4 = vld [vmem:[%s1502_s0 + $0x8] sm:$0xff]   ;;  %v1091_v5 = vld [vmem:[%s1502_s0 + $0x10] sm:$0xff]  }
   0x2   :  { %v1178_v1 = vld [vmem:[%s1503_s1] ss:$0 sm:$0xff]  ;;  %v804_v2 = vunpack.c.l.bf16 %v803_v0  ;;  %v805_v3 = vunpack.c.h.bf16 %v803_v0  ;;  %v1092_v6 = vld [vmem:[%s1502_s0 + $0x18] sm:$0xff]   ;;  %v808_v8 = vunpack.c.l.bf16 %v1090_v4  ;;  %v809_v9 = vunpack.c.h.bf16 %v1090_v4  ;;  %v1094_v33 = vld [vmem:[%s1502_s0 + $0x28] sm:$0xff]  }
   0x3   :  { %v1192_v7 = vld [vmem:[%s1504_s2] ss:$0 sm:$0xff]  ;;  %v812_v10 = vunpack.c.l.bf16 %v1091_v5  ;;  %v813_v11 = vunpack.c.h.bf16 %v1091_v5  ;;  %v816_v14 = vunpack.c.l.bf16 %v1092_v6  ;;  %v817_v15 = vunpack.c.h.bf16 %v1092_v6  ;;  %v1095_v38 = vld [vmem:[%s1502_s0 + $0x30] sm:$0xff]   ;;  %v1096_v43 = vld [vmem:[%s1502_s0 + $0x38] sm:$0xff]  }
   0x4   :  { %v149_v12 = vmul.f32 %v804_v2, %v1178_v1  ;;  %v150_v13 = vmul.f32 %v805_v3, %v1178_v1  ;;  %v151_v16 = vmul.f32 %v808_v8, %v1178_v1  ;;  %v152_v17 = vmul.f32 %v809_v9, %v1178_v1  ;;  %v1093_v28 = vld [vmem:[%s1502_s0 + $0x20] sm:$0xff]  }
   0x5   :  { %v153_v18 = vmul.f32 %v812_v10, %v1178_v1  ;;  %v154_v19 = vmul.f32 %v813_v11, %v1178_v1  ;;  %v155_v22 = vmul.f32 %v816_v14, %v1178_v1  ;;  %v156_v23 = vmul.f32 %v817_v15, %v1178_v1  ;;  %v1097_v0 = vld [vmem:[%s1502_s0 + $0x40] sm:$0xff]   ;;  %v1098_v11 = vld [vmem:[%s1502_s0 + $0x48] sm:$0xff]  }
   0x6   :  { %v220_v20 = vadd.f32 %v1192_v7, %v149_v12  ;;  %v221_v21 = vadd.f32 %v1192_v7, %v150_v13  ;;  %v222_v24 = vadd.f32 %v1192_v7, %v151_v16  ;;  %v223_v25 = vadd.f32 %v1192_v7, %v152_v17  ;;  %v1099_v16 = vld [vmem:[%s1502_s0 + $0x50] sm:$0xff]  }
   0x7   :  { %v224_v26 = vadd.f32 %v1192_v7, %v153_v18  ;;  %v225_v27 = vadd.f32 %v1192_v7, %v154_v19  ;;  %v226_v31 = vadd.f32 %v1192_v7, %v155_v22  ;;  %v227_v32 = vadd.f32 %v1192_v7, %v156_v23 }
   0x8   :  { %v284_v29 = vmax.f32 %v220_v20, 0.0  ;;  %v285_v30 = vmax.f32 %v221_v21, 0.0  ;;  %v286_v34 = vmax.f32 %v222_v24, 0.0  ;;  %v287_v35 = vmax.f32 %v223_v25, 0.0  ;;  %v1100_v25 = vld [vmem:[%s1502_s0 + $0x58] sm:$0xff]  }
   0x9   :  { %v288_v36 = vmax.f32 %v224_v26, 0.0  ;;  %v289_v37 = vmax.f32 %v225_v27, 0.0  ;;  %v290_v40 = vmax.f32 %v226_v31, 0.0  ;;  %v291_v41 = vmax.f32 %v227_v32, 0.0 }
   0xa   :  { %v933_v39 = vpack.c.bf16 %v285_v30, %v284_v29  ;;  %v820_v42 = vunpack.c.l.bf16 %v1093_v28  ;;  %v938_v44 = vpack.c.bf16 %v287_v35, %v286_v34  ;;  %v821_v46 = vunpack.c.h.bf16 %v1093_v28 }
   0xb   :  { %v943_v45 = vpack.c.bf16 %v289_v37, %v288_v36  ;;  %v824_v47 = vunpack.c.l.bf16 %v1094_v33  ;;  %v948_v48 = vpack.c.bf16 %v291_v41, %v290_v40  ;;  %v825_v50 = vunpack.c.h.bf16 %v1094_v33 }
   0xc   :  { %934 = vst [vmem:[%s1505_s3] sm:$0xff] %v933_v39   ;;  %v157_v49 = vmul.f32 %v820_v42, %v1178_v1  ;;  %v828_v51 = vunpack.c.l.bf16 %v1095_v38  ;;  %1121 = vst [vmem:[%s1505_s3 + $0x8] sm:$0xff] %v938_v44   ;;  %v158_v52 = vmul.f32 %v821_v46, %v1178_v1  ;;  %v829_v54 = vunpack.c.h.bf16 %v1095_v38  ;;  %v1101_v38 = vld [vmem:[%s1502_s0 + $0x60] sm:$0xff]  }
   0xd   :  { %1122 = vst [vmem:[%s1505_s3 + $0x10] sm:$0xff] %v943_v45   ;;  %v159_v53 = vmul.f32 %v824_v47, %v1178_v1  ;;  %v832_v55 = vunpack.c.l.bf16 %v1096_v43  ;;  %1123 = vst [vmem:[%s1505_s3 + $0x18] sm:$0xff] %v948_v48   ;;  %v160_v57 = vmul.f32 %v825_v50, %v1178_v1  ;;  %v833_v59 = vunpack.c.h.bf16 %v1096_v43 }
   0xe   :  { %v228_v56 = vadd.f32 %v1192_v7, %v157_v49  ;;  %v161_v58 = vmul.f32 %v828_v51, %v1178_v1  ;;  %v229_v60 = vadd.f32 %v1192_v7, %v158_v52  ;;  %v162_v62 = vmul.f32 %v829_v54, %v1178_v1  ;;  %v1102_v51 = vld [vmem:[%s1502_s0 + $0x68] sm:$0xff]  }
   0xf   :  { %v230_v61 = vadd.f32 %v1192_v7, %v159_v53  ;;  %v163_v63 = vmul.f32 %v832_v55, %v1178_v1  ;;  %v231_v3 = vadd.f32 %v1192_v7, %v160_v57  ;;  %v164_v5 = vmul.f32 %v833_v59, %v1178_v1 }
  0x10   :  { %v292_v2 = vmax.f32 %v228_v56, 0.0  ;;  %v232_v4 = vadd.f32 %v1192_v7, %v161_v58  ;;  %v293_v6 = vmax.f32 %v229_v60, 0.0  ;;  %v233_v9 = vadd.f32 %v1192_v7, %v162_v62  ;;  %v1103_v60 = vld [vmem:[%s1502_s0 + $0x70] sm:$0xff]  }
  0x11   :  { %v294_v8 = vmax.f32 %v230_v61, 0.0  ;;  %v234_v10 = vadd.f32 %v1192_v7, %v163_v63  ;;  %v295_v12 = vmax.f32 %v231_v3, 0.0  ;;  %v235_v14 = vadd.f32 %v1192_v7, %v164_v5 }
  0x12   :  { %v296_v13 = vmax.f32 %v232_v4, 0.0  ;;  %v836_v15 = vunpack.c.l.bf16 %v1097_v0  ;;  %v953_v17 = vpack.c.bf16 %v293_v6, %v292_v2  ;;  %v297_v18 = vmax.f32 %v233_v9, 0.0  ;;  %v1104_v2 = vld [vmem:[%s1502_s0 + $0x78] sm:$0xff]  }
  0x13   :  { %v298_v19 = vmax.f32 %v234_v10, 0.0  ;;  %v837_v20 = vunpack.c.h.bf16 %v1097_v0  ;;  %v958_v21 = vpack.c.bf16 %v295_v12, %v294_v8  ;;  %v299_v22 = vmax.f32 %v235_v14, 0.0  ;;  %v1105_v12 = vld [vmem:[%s1502_s0 + $0x80] sm:$0xff]  }
  0x14   :  { %v165_v23 = vmul.f32 %v836_v15, %v1178_v1  ;;  %v840_v24 = vunpack.c.l.bf16 %v1098_v11  ;;  %1124 = vst [vmem:[%s1505_s3 + $0x20] sm:$0xff] %v953_v17   ;;  %v963_v26 = vpack.c.bf16 %v297_v18, %v296_v13  ;;  %v841_v28 = vunpack.c.h.bf16 %v1098_v11 }
  0x15   :  { %v166_v27 = vmul.f32 %v837_v20, %v1178_v1  ;;  %v844_v29 = vunpack.c.l.bf16 %v1099_v16  ;;  %1125 = vst [vmem:[%s1505_s3 + $0x28] sm:$0xff] %v958_v21   ;;  %v968_v30 = vpack.c.bf16 %v299_v22, %v298_v19  ;;  %v845_v33 = vunpack.c.h.bf16 %v1099_v16 }
  0x16   :  { %v236_v31 = vadd.f32 %v1192_v7, %v165_v23  ;;  %v167_v32 = vmul.f32 %v840_v24, %v1178_v1  ;;  %1126 = vst [vmem:[%s1505_s3 + $0x30] sm:$0xff] %v963_v26   ;;  %v168_v35 = vmul.f32 %v841_v28, %v1178_v1  ;;  %v848_v37 = vunpack.c.l.bf16 %v1100_v25 }
  0x17   :  { %v237_v34 = vadd.f32 %v1192_v7, %v166_v27  ;;  %v169_v36 = vmul.f32 %v844_v29, %v1178_v1  ;;  %1127 = vst [vmem:[%s1505_s3 + $0x38] sm:$0xff] %v968_v30   ;;  %v170_v41 = vmul.f32 %v845_v33, %v1178_v1  ;;  %v849_v42 = vunpack.c.h.bf16 %v1100_v25  ;;  %v1106_v29 = vld [vmem:[%s1502_s0 + $0x88] sm:$0xff]  }
  0x18   :  { %v300_v39 = vmax.f32 %v236_v31, 0.0  ;;  %v238_v40 = vadd.f32 %v1192_v7, %v167_v32  ;;  %v239_v44 = vadd.f32 %v1192_v7, %v168_v35  ;;  %v171_v46 = vmul.f32 %v848_v37, %v1178_v1 }
  0x19   :  { %v301_v43 = vmax.f32 %v237_v34, 0.0  ;;  %v240_v45 = vadd.f32 %v1192_v7, %v169_v36  ;;  %v241_v48 = vadd.f32 %v1192_v7, %v170_v41  ;;  %v172_v49 = vmul.f32 %v849_v42, %v1178_v1  ;;  %v1107_v34 = vld [vmem:[%s1502_s0 + $0x90] sm:$0xff]  }
  0x1a   :  { %v302_v47 = vmax.f32 %v238_v40, 0.0  ;;  %v852_v50 = vunpack.c.l.bf16 %v1101_v38  ;;  %v303_v53 = vmax.f32 %v239_v44, 0.0  ;;  %v242_v55 = vadd.f32 %v1192_v7, %v171_v46 }
  0x1b   :  { %v973_v52 = vpack.c.bf16 %v301_v43, %v300_v39  ;;  %v304_v54 = vmax.f32 %v240_v45, 0.0  ;;  %v305_v56 = vmax.f32 %v241_v48, 0.0  ;;  %v243_v57 = vadd.f32 %v1192_v7, %v172_v49  ;;  %v1108_v43 = vld [vmem:[%s1502_s0 + $0x98] sm:$0xff]  }
  0x1c   :  { %v853_v58 = vunpack.c.h.bf16 %v1101_v38  ;;  %v173_v59 = vmul.f32 %v852_v50, %v1178_v1  ;;  %v978_v61 = vpack.c.bf16 %v303_v53, %v302_v47  ;;  %v306_v62 = vmax.f32 %v242_v55, 0.0 }
  0x1d   :  { %1128 = vst [vmem:[%s1505_s3 + $0x40] sm:$0xff] %v973_v52   ;;  %v856_v63 = vunpack.c.l.bf16 %v1102_v51  ;;  %v857_v0 = vunpack.c.h.bf16 %v1102_v51  ;;  %v983_v3 = vpack.c.bf16 %v305_v56, %v304_v54  ;;  %v307_v4 = vmax.f32 %v243_v57, 0.0  ;;  %v1109_v56 = vld [vmem:[%s1502_s0 + $0xa0] sm:$0xff]  }
  0x1e   :  { %v174_v5 = vmul.f32 %v853_v58, %v1178_v1  ;;  %v244_v6 = vadd.f32 %v1192_v7, %v173_v59  ;;  %1129 = vst [vmem:[%s1505_s3 + $0x48] sm:$0xff] %v978_v61   ;;  %v860_v10 = vunpack.c.l.bf16 %v1103_v60  ;;  %v861_v11 = vunpack.c.h.bf16 %v1103_v60 }
  0x1f   :  { %v175_v8 = vmul.f32 %v856_v63, %v1178_v1  ;;  %v176_v9 = vmul.f32 %v857_v0, %v1178_v1  ;;  %1130 = vst [vmem:[%s1505_s3 + $0x50] sm:$0xff] %v983_v3   ;;  %v988_v13 = vpack.c.bf16 %v307_v4, %v306_v62  ;;  %v864_v16 = vunpack.c.l.bf16 %v1104_v2 }
  0x20   :  { %v245_v14 = vadd.f32 %v1192_v7, %v174_v5  ;;  %v308_v15 = vmax.f32 %v244_v6, 0.0  ;;  %v177_v19 = vmul.f32 %v860_v10, %v1178_v1  ;;  %v178_v20 = vmul.f32 %v861_v11, %v1178_v1 }
  0x21   :  { %v246_v17 = vadd.f32 %v1192_v7, %v175_v8  ;;  %v247_v18 = vadd.f32 %v1192_v7, %v176_v9  ;;  %1131 = vst [vmem:[%s1505_s3 + $0x58] sm:$0xff] %v988_v13   ;;  %v865_v22 = vunpack.c.h.bf16 %v1104_v2  ;;  %v179_v23 = vmul.f32 %v864_v16, %v1178_v1  ;;  %v1110_v2 = vld [vmem:[%s1502_s0 + $0xa8] sm:$0xff]   ;;  %v1111_v16 = vld [vmem:[%s1502_s0 + $0xb0] sm:$0xff]  }
  0x22   :  { %v309_v21 = vmax.f32 %v245_v14, 0.0  ;;  %v868_v24 = vunpack.c.l.bf16 %v1105_v12  ;;  %v248_v27 = vadd.f32 %v1192_v7, %v177_v19  ;;  %v249_v28 = vadd.f32 %v1192_v7, %v178_v20 }
  0x23   :  { %v310_v25 = vmax.f32 %v246_v17, 0.0  ;;  %v311_v26 = vmax.f32 %v247_v18, 0.0  ;;  %v180_v31 = vmul.f32 %v865_v22, %v1178_v1  ;;  %v250_v32 = vadd.f32 %v1192_v7, %v179_v23 }
  0x24   :  { %v993_v30 = vpack.c.bf16 %v309_v21, %v308_v15  ;;  %v869_v33 = vunpack.c.h.bf16 %v1105_v12  ;;  %v312_v36 = vmax.f32 %v248_v27, 0.0  ;;  %v313_v37 = vmax.f32 %v249_v28, 0.0  ;;  %v1112_v21 = vld [vmem:[%s1502_s0 + $0xb8] sm:$0xff]  }
  0x25   :  { %v998_v35 = vpack.c.bf16 %v311_v26, %v310_v25  ;;  %v181_v38 = vmul.f32 %v868_v24, %v1178_v1  ;;  %v251_v39 = vadd.f32 %v1192_v7, %v180_v31  ;;  %v314_v40 = vmax.f32 %v250_v32, 0.0 }
  0x26   :  { %1132 = vst [vmem:[%s1505_s3 + $0x60] sm:$0xff] %v993_v30   ;;  %v182_v41 = vmul.f32 %v869_v33, %v1178_v1  ;;  %v872_v42 = vunpack.c.l.bf16 %v1106_v29  ;;  %v1003_v44 = vpack.c.bf16 %v313_v37, %v312_v36  ;;  %v873_v46 = vunpack.c.h.bf16 %v1106_v29 }
  0x27   :  { %1133 = vst [vmem:[%s1505_s3 + $0x68] sm:$0xff] %v998_v35   ;;  %v252_v45 = vadd.f32 %v1192_v7, %v181_v38  ;;  %v876_v47 = vunpack.c.l.bf16 %v1107_v34  ;;  %v315_v48 = vmax.f32 %v251_v39, 0.0  ;;  %v877_v51 = vunpack.c.h.bf16 %v1107_v34  ;;  %v1113_v34 = vld [vmem:[%s1502_s0 + $0xc0] sm:$0xff]  }
  0x28   :  { %v253_v49 = vadd.f32 %v1192_v7, %v182_v41  ;;  %v183_v50 = vmul.f32 %v872_v42, %v1178_v1  ;;  %1134 = vst [vmem:[%s1505_s3 + $0x70] sm:$0xff] %v1003_v44   ;;  %v184_v53 = vmul.f32 %v873_v46, %v1178_v1  ;;  %v880_v55 = vunpack.c.l.bf16 %v1108_v43 }
  0x29   :  { %v316_v52 = vmax.f32 %v252_v45, 0.0  ;;  %v185_v54 = vmul.f32 %v876_v47, %v1178_v1  ;;  %v1008_v57 = vpack.c.bf16 %v315_v48, %v314_v40  ;;  %v186_v60 = vmul.f32 %v877_v51, %v1178_v1  ;;  %v1114_v47 = vld [vmem:[%s1502_s0 + $0xc8] sm:$0xff]  }
  0x2a   :  { %v317_v58 = vmax.f32 %v253_v49, 0.0  ;;  %v254_v59 = vadd.f32 %v1192_v7, %v183_v50  ;;  %v255_v61 = vadd.f32 %v1192_v7, %v184_v53  ;;  %v881_v63 = vunpack.c.h.bf16 %v1108_v43 }
  0x2b   :  { %v256_v62 = vadd.f32 %v1192_v7, %v185_v54  ;;  %v187_v0 = vmul.f32 %v880_v55, %v1178_v1  ;;  %1135 = vst [vmem:[%s1505_s3 + $0x78] sm:$0xff] %v1008_v57   ;;  %v257_v5 = vadd.f32 %v1192_v7, %v186_v60  ;;  %v884_v6 = vunpack.c.l.bf16 %v1109_v56 }
  0x2c   :  { %v1013_v3 = vpack.c.bf16 %v317_v58, %v316_v52  ;;  %v318_v4 = vmax.f32 %v254_v59, 0.0  ;;  %v319_v8 = vmax.f32 %v255_v61, 0.0  ;;  %v188_v10 = vmul.f32 %v881_v63, %v1178_v1  ;;  %v1115_v52 = vld [vmem:[%s1502_s0 + $0xd0] sm:$0xff]   ;;  %v1116_v61 = vld [vmem:[%s1502_s0 + $0xd8] sm:$0xff]  }
  0x2d   :  { %v320_v9 = vmax.f32 %v256_v62, 0.0  ;;  %v258_v11 = vadd.f32 %v1192_v7, %v187_v0  ;;  %v321_v12 = vmax.f32 %v257_v5, 0.0  ;;  %v885_v13 = vunpack.c.h.bf16 %v1109_v56 }
  0x2e   :  { %1136 = vst [vmem:[%s1505_s3 + $0x80] sm:$0xff] %v1013_v3   ;;  %v189_v14 = vmul.f32 %v884_v6, %v1178_v1  ;;  %v888_v15 = vunpack.c.l.bf16 %v1110_v2  ;;  %v1018_v17 = vpack.c.bf16 %v319_v8, %v318_v4  ;;  %v259_v18 = vadd.f32 %v1192_v7, %v188_v10 }
  0x2f   :  { %v322_v19 = vmax.f32 %v258_v11, 0.0  ;;  %v889_v20 = vunpack.c.h.bf16 %v1110_v2  ;;  %v1023_v22 = vpack.c.bf16 %v321_v12, %v320_v9  ;;  %v190_v23 = vmul.f32 %v885_v13, %v1178_v1  ;;  %v1117_v12 = vld [vmem:[%s1502_s0 + $0xe0] sm:$0xff]  }
  0x30   :  { %v260_v24 = vadd.f32 %v1192_v7, %v189_v14  ;;  %v191_v25 = vmul.f32 %v888_v15, %v1178_v1  ;;  %1137 = vst [vmem:[%s1505_s3 + $0x88] sm:$0xff] %v1018_v17   ;;  %v323_v26 = vmax.f32 %v259_v18, 0.0  ;;  %v892_v28 = vunpack.c.l.bf16 %v1111_v16 }
  0x31   :  { %v192_v27 = vmul.f32 %v889_v20, %v1178_v1  ;;  %v893_v29 = vunpack.c.h.bf16 %v1111_v16  ;;  %1138 = vst [vmem:[%s1505_s3 + $0x90] sm:$0xff] %v1023_v22   ;;  %v261_v30 = vadd.f32 %v1192_v7, %v190_v23  ;;  %v896_v33 = vunpack.c.l.bf16 %v1112_v21 }
  0x32   :  { %v324_v31 = vmax.f32 %v260_v24, 0.0  ;;  %v262_v32 = vadd.f32 %v1192_v7, %v191_v25  ;;  %v1028_v35 = vpack.c.bf16 %v323_v26, %v322_v19  ;;  %v193_v37 = vmul.f32 %v892_v28, %v1178_v1 }
  0x33   :  { %v263_v36 = vadd.f32 %v1192_v7, %v192_v27  ;;  %v194_v38 = vmul.f32 %v893_v29, %v1178_v1  ;;  %v325_v39 = vmax.f32 %v261_v30, 0.0  ;;  %v897_v41 = vunpack.c.h.bf16 %v1112_v21  ;;  %v1118_v21 = vld [vmem:[%s1502_s0 + $0xe8] sm:$0xff]  }
  0x34   :  { %v326_v40 = vmax.f32 %v262_v32, 0.0  ;;  %v195_v42 = vmul.f32 %v896_v33, %v1178_v1  ;;  %1139 = vst [vmem:[%s1505_s3 + $0x98] sm:$0xff] %v1028_v35   ;;  %v264_v44 = vadd.f32 %v1192_v7, %v193_v37  ;;  %v900_v46 = vunpack.c.l.bf16 %v1113_v34 }
  0x35   :  { %v327_v43 = vmax.f32 %v263_v36, 0.0  ;;  %v265_v45 = vadd.f32 %v1192_v7, %v194_v38  ;;  %v1033_v48 = vpack.c.bf16 %v325_v39, %v324_v31  ;;  %v196_v49 = vmul.f32 %v897_v41, %v1178_v1  ;;  %v1120_v39 = vld [vmem:[%s1502_s0 + $0xf8] sm:$0xff]  }
  0x36   :  { %v266_v50 = vadd.f32 %v1192_v7, %v195_v42  ;;  %v901_v51 = vunpack.c.h.bf16 %v1113_v34  ;;  %v328_v54 = vmax.f32 %v264_v44, 0.0  ;;  %v197_v56 = vmul.f32 %v900_v46, %v1178_v1  ;;  %v1119_v34 = vld [vmem:[%s1502_s0 + $0xf0] sm:$0xff]  }
  0x37   :  { %v1038_v53 = vpack.c.bf16 %v327_v43, %v326_v40  ;;  %v329_v55 = vmax.f32 %v265_v45, 0.0  ;;  %1140 = vst [vmem:[%s1505_s3 + $0xa0] sm:$0xff] %v1033_v48   ;;  %v267_v57 = vadd.f32 %v1192_v7, %v196_v49  ;;  %v904_v60 = vunpack.c.l.bf16 %v1114_v47 }
  0x38   :  { %v330_v58 = vmax.f32 %v266_v50, 0.0  ;;  %v198_v59 = vmul.f32 %v901_v51, %v1178_v1  ;;  %v268_v63 = vadd.f32 %v1192_v7, %v197_v56  ;;  %v905_v0 = vunpack.c.h.bf16 %v1114_v47 }
  0x39   :  { %1141 = vst [vmem:[%s1505_s3 + $0xa8] sm:$0xff] %v1038_v53   ;;  %v1043_v62 = vpack.c.bf16 %v329_v55, %v328_v54  ;;  %v908_v2 = vunpack.c.l.bf16 %v1115_v52  ;;  %v331_v3 = vmax.f32 %v267_v57, 0.0  ;;  %v199_v5 = vmul.f32 %v904_v60, %v1178_v1 }
  0x3a   :  { %v269_v4 = vadd.f32 %v1192_v7, %v198_v59  ;;  %v909_v6 = vunpack.c.h.bf16 %v1115_v52  ;;  %v332_v8 = vmax.f32 %v268_v63, 0.0  ;;  %v200_v9 = vmul.f32 %v905_v0, %v1178_v1 }
  0x3b   :  { %1142 = vst [vmem:[%s1505_s3 + $0xb0] sm:$0xff] %v1043_v62   ;;  %v201_v10 = vmul.f32 %v908_v2, %v1178_v1  ;;  %v912_v11 = vunpack.c.l.bf16 %v1116_v61  ;;  %v1048_v13 = vpack.c.bf16 %v331_v3, %v330_v58  ;;  %v270_v15 = vadd.f32 %v1192_v7, %v199_v5 }
  0x3c   :  { %v333_v14 = vmax.f32 %v269_v4, 0.0  ;;  %v202_v16 = vmul.f32 %v909_v6, %v1178_v1  ;;  %v271_v17 = vadd.f32 %v1192_v7, %v200_v9  ;;  %v913_v19 = vunpack.c.h.bf16 %v1116_v61 }
  0x3d   :  { %v272_v18 = vadd.f32 %v1192_v7, %v201_v10  ;;  %v203_v20 = vmul.f32 %v912_v11, %v1178_v1  ;;  %1143 = vst [vmem:[%s1505_s3 + $0xb8] sm:$0xff] %v1048_v13   ;;  %v334_v23 = vmax.f32 %v270_v15, 0.0  ;;  %v916_v25 = vunpack.c.l.bf16 %v1117_v12 }
  0x3e   :  { %v1053_v22 = vpack.c.bf16 %v333_v14, %v332_v8  ;;  %v273_v24 = vadd.f32 %v1192_v7, %v202_v16  ;;  %v335_v26 = vmax.f32 %v271_v17, 0.0  ;;  %v204_v28 = vmul.f32 %v913_v19, %v1178_v1 }
  0x3f   :  { %v336_v27 = vmax.f32 %v272_v18, 0.0  ;;  %v274_v29 = vadd.f32 %v1192_v7, %v203_v20  ;;  %v917_v31 = vunpack.c.h.bf16 %v1117_v12  ;;  %v205_v32 = vmul.f32 %v916_v25, %v1178_v1 }
  0x40   :  { %1144 = vst [vmem:[%s1505_s3 + $0xc0] sm:$0xff] %v1053_v22   ;;  %v337_v30 = vmax.f32 %v273_v24, 0.0  ;;  %v920_v33 = vunpack.c.l.bf16 %v1118_v21  ;;  %v1058_v35 = vpack.c.bf16 %v335_v26, %v334_v23  ;;  %v275_v36 = vadd.f32 %v1192_v7, %v204_v28 }
  0x41   :  { %v338_v37 = vmax.f32 %v274_v29, 0.0  ;;  %v921_v38 = vunpack.c.h.bf16 %v1118_v21  ;;  %v206_v41 = vmul.f32 %v917_v31, %v1178_v1  ;;  %v276_v42 = vadd.f32 %v1192_v7, %v205_v32 }
  0x42   :  { %v1063_v40 = vpack.c.bf16 %v337_v30, %v336_v27  ;;  %v207_v43 = vmul.f32 %v920_v33, %v1178_v1  ;;  %1145 = vst [vmem:[%s1505_s3 + $0xc8] sm:$0xff] %v1058_v35   ;;  %v339_v44 = vmax.f32 %v275_v36, 0.0  ;;  %v924_v46 = vunpack.c.l.bf16 %v1119_v34 }
  0x43   :  { %v208_v45 = vmul.f32 %v921_v38, %v1178_v1  ;;  %v925_v47 = vunpack.c.h.bf16 %v1119_v34  ;;  %v277_v48 = vadd.f32 %v1192_v7, %v206_v41  ;;  %v340_v49 = vmax.f32 %v276_v42, 0.0 }
  0x44   :  { %1146 = vst [vmem:[%s1505_s3 + $0xd0] sm:$0xff] %v1063_v40   ;;  %v278_v50 = vadd.f32 %v1192_v7, %v207_v43  ;;  %v928_v51 = vunpack.c.l.bf16 %v1120_v39  ;;  %v1068_v52 = vpack.c.bf16 %v339_v44, %v338_v37  ;;  %v209_v54 = vmul.f32 %v924_v46, %v1178_v1 }
  0x45   :  { %v279_v53 = vadd.f32 %v1192_v7, %v208_v45  ;;  %v210_v55 = vmul.f32 %v925_v47, %v1178_v1  ;;  %v341_v56 = vmax.f32 %v277_v48, 0.0  ;;  %v929_v58 = vunpack.c.h.bf16 %v1120_v39 }
  0x46   :  { %v342_v57 = vmax.f32 %v278_v50, 0.0  ;;  %v211_v59 = vmul.f32 %v928_v51, %v1178_v1  ;;  %1147 = vst [vmem:[%s1505_s3 + $0xd8] sm:$0xff] %v1068_v52   ;;  %v280_v61 = vadd.f32 %v1192_v7, %v209_v54 }
  0x47   :  { %v343_v60 = vmax.f32 %v279_v53, 0.0  ;;  %v281_v62 = vadd.f32 %v1192_v7, %v210_v55  ;;  %v1073_v63 = vpack.c.bf16 %v341_v56, %v340_v49  ;;  %v212_v0 = vmul.f32 %v929_v58, %v1178_v1 }
  0x48   :  { %v282_v2 = vadd.f32 %v1192_v7, %v211_v59  ;;  %v344_v4 = vmax.f32 %v280_v61, 0.0 }
  0x49   :  { %v1078_v3 = vpack.c.bf16 %v343_v60, %v342_v57  ;;  %v345_v5 = vmax.f32 %v281_v62, 0.0  ;;  %1148 = vst [vmem:[%s1505_s3 + $0xe0] sm:$0xff] %v1073_v63   ;;  %v283_v6 = vadd.f32 %v1192_v7, %v212_v0 }
  0x4a   :  { %v346_v8 = vmax.f32 %v282_v2, 0.0 }
  0x4b   :  { %1149 = vst [vmem:[%s1505_s3 + $0xe8] sm:$0xff] %v1078_v3   ;;  %v1083_v9 = vpack.c.bf16 %v345_v5, %v344_v4  ;;  %v347_v10 = vmax.f32 %v283_v6, 0.0 }
  0x4d   :  { %1150 = vst [vmem:[%s1505_s3 + $0xf0] sm:$0xff] %v1083_v9   ;;  %v1088_v1 = vpack.c.bf16 %v347_v10, %v346_v8 }
  0x4f   :  { %1151 = vst [vmem:[%s1505_s3 + $0xf8] sm:$0xff] %v1088_v1  }

// kernel: bottleneck_forward.11
= control target key start
LH: loop header
LB: loop body
LE: loop exit
PB: predicated region body
PF: predicated region fallthrough
CT: control target
= control target key end

     0   :  { %s535_s0 = inlined_call_operand.vmem [shape: bf16[128,128], index: 0, kind: input, shape index: {}]   ;;  %s536_s1 = inlined_call_operand.vmem [shape: f32[1,128], index: 1, kind: input, shape index: {}]   ;;  %s537_s2 = inlined_call_operand.vmem [shape: f32[1,128], index: 2, kind: input, shape index: {}]   ;;  %s538_s3 = inlined_call_operand.vmem [shape: bf16[128,128], index: 3, kind: input, shape index: {}]   ;;  %s539_s4 = inlined_call_operand.vmem [shape: f32[1,128], index: 4, kind: input, shape index: {}]   ;;  %s540_s5 = inlined_call_operand.vmem [shape: f32[1,128], index: 5, kind: input, shape index: {}]   ;;  %s541_s6 = inlined_call_operand.hbm [shape: f32[128,128], index: 6, kind: output, shape index: {}]  }
   0x1   :  { %v249_v0 = vld [vmem:[%s535_s0] sm:$0xff]   ;;  %v312_v9 = vld [vmem:[%s535_s0 + $0x8] sm:$0xff]   ;;  %v313_v20 = vld [vmem:[%s535_s0 + $0x10] sm:$0xff]  }
   0x2   :  { %v397_v1 = vld [vmem:[%s536_s1] ss:$0 sm:$0xff]  ;;  %v250_v2 = vunpack.c.l.bf16 %v249_v0  ;;  %v251_v5 = vunpack.c.h.bf16 %v249_v0  ;;  %v319_v10 = vld [vmem:[%s538_s3 + $0x8] sm:$0xff]   ;;  %v254_v14 = vunpack.c.l.bf16 %v312_v9  ;;  %v255_v18 = vunpack.c.h.bf16 %v312_v9  ;;  %v320_v21 = vld [vmem:[%s538_s3 + $0x10] sm:$0xff]  }
   0x3   :  { %v281_v3 = vld [vmem:[%s538_s3] sm:$0xff]   ;;  %v286_v15 = vunpack.c.l.bf16 %v319_v10  ;;  %v287_v19 = vunpack.c.h.bf16 %v319_v10 }
   0x4   :  { %v405_v4 = vld [vmem:[%s539_s4] ss:$0 sm:$0xff]  ;;  %v282_v7 = vunpack.c.l.bf16 %v281_v3  ;;  %v283_v8 = vunpack.c.h.bf16 %v281_v3  ;;  %v63_v11 = vmul.f32 %v250_v2, %v397_v1  ;;  %v64_v13 = vmul.f32 %v251_v5, %v397_v1 }
   0x5   :  { %v410_v6 = vld [vmem:[%s537_s2] ss:$0 sm:$0xff]  ;;  %v65_v24 = vmul.f32 %v254_v14, %v397_v1  ;;  %v143_v25 = vmul.f32 %v286_v15, %v405_v4  ;;  %v66_v28 = vmul.f32 %v255_v18, %v397_v1  ;;  %v144_v29 = vmul.f32 %v287_v19, %v405_v4 }
   0x6   :  { %v422_v12 = vld [vmem:[%s540_s5] ss:$0 sm:$0xff]  ;;  %v141_v16 = vmul.f32 %v282_v7, %v405_v4  ;;  %v142_v17 = vmul.f32 %v283_v8, %v405_v4  ;;  %v86_v22 = vadd.f32 %v410_v6, %v63_v11  ;;  %v87_v23 = vadd.f32 %v410_v6, %v64_v13 }
   0x8   :  { %v164_v26 = vadd.f32 %v422_v12, %v141_v16  ;;  %v165_v27 = vadd.f32 %v422_v12, %v142_v17 }
   0x9   :  { %11 = vsyncpa [#allocation3], 0  ;;  %v88_v30 = vadd.f32 %v410_v6, %v65_v24  ;;  %v166_v31 = vadd.f32 %v422_v12, %v143_v25  ;;  %v258_v32 = vunpack.c.l.bf16 %v313_v20  ;;  %v290_v33 = vunpack.c.l.bf16 %v320_v21  ;;  %v314_v42 = vld [vmem:[%s535_s0 + $0x18] sm:$0xff]   ;;  %v315_v52 = vld [vmem:[%s535_s0 + $0x20] sm:$0xff]  }
   0xa   :  { %v180_v34 = vadd.f32 %v164_v26, %v86_v22  ;;  %v181_v35 = vadd.f32 %v165_v27, %v87_v23  ;;  %v89_v36 = vadd.f32 %v410_v6, %v66_v28  ;;  %v167_v37 = vadd.f32 %v422_v12, %v144_v29  ;;  %v321_v43 = vld [vmem:[%s538_s3 + $0x18] sm:$0xff]   ;;  %v322_v57 = vld [vmem:[%s538_s3 + $0x20] sm:$0xff]   ;;  %v316_v14 = vld [vmem:[%s535_s0 + $0x28] sm:$0xff]  }
   0xb   :  { %v182_v38 = vadd.f32 %v166_v31, %v88_v30  ;;  %v67_v39 = vmul.f32 %v258_v32, %v397_v1  ;;  %v145_v40 = vmul.f32 %v290_v33, %v405_v4  ;;  %v259_v41 = vunpack.c.h.bf16 %v313_v20  ;;  %v323_v19 = vld [vmem:[%s538_s3 + $0x28] sm:$0xff]   ;;  %v317_v32 = vld [vmem:[%s535_s0 + $0x30] sm:$0xff]  }
   0xc   :  { %v196_v44 = vmax.f32 %v180_v34, 0.0  ;;  %v197_v45 = vmax.f32 %v181_v35, 0.0  ;;  %v183_v46 = vadd.f32 %v167_v37, %v89_v36  ;;  %v291_v47 = vunpack.c.h.bf16 %v320_v21  ;;  %v324_v33 = vld [vmem:[%s538_s3 + $0x30] sm:$0xff]  }
   0xd   :  { %v198_v48 = vmax.f32 %v182_v38, 0.0  ;;  %v90_v49 = vadd.f32 %v410_v6, %v67_v39  ;;  %v168_v50 = vadd.f32 %v422_v12, %v145_v40  ;;  %v68_v51 = vmul.f32 %v259_v41, %v397_v1 }
   0xe   :  { %212 = vst [vmem:[#allocation2] sm:$0xff] %v196_v44  ;;  %213 = vst [vmem:[#allocation2 + $0x8] sm:$0xff] %v197_v45  ;;  %v199_v53 = vmax.f32 %v183_v46, 0.0  ;;  %v146_v54 = vmul.f32 %v291_v47, %v405_v4  ;;  %v262_v55 = vunpack.c.l.bf16 %v314_v42  ;;  %v294_v56 = vunpack.c.l.bf16 %v321_v43  ;;  %v318_v46 = vld [vmem:[%s535_s0 + $0x38] sm:$0xff]   ;;  %s353_s0 = smov [#allocation2]  }
   0xf   :  { %214 = vst [vmem:[#allocation2 + $0x10] sm:$0xff] %v198_v48  ;;  %v184_v58 = vadd.f32 %v168_v50, %v90_v49  ;;  %v91_v59 = vadd.f32 %v410_v6, %v68_v51  ;;  %v263_v60 = vunpack.c.h.bf16 %v314_v42  ;;  %v295_v61 = vunpack.c.h.bf16 %v321_v43 }
  0x10   :  { %215 = vst [vmem:[#allocation2 + $0x18] sm:$0xff] %v199_v53  ;;  %v169_v62 = vadd.f32 %v422_v12, %v146_v54  ;;  %v69_v63 = vmul.f32 %v262_v55, %v397_v1  ;;  %v147_v0 = vmul.f32 %v294_v56, %v405_v4  ;;  %v266_v2 = vunpack.c.l.bf16 %v315_v52  ;;  %v325_v55 = vld [vmem:[%s538_s3 + $0x38] sm:$0xff]   ;;  %s233_s3 = sshll.u32 %s353_s0, 4  ;;  %s234_s3 = int_to_ptr.vmem [resolvable:$true] %s233_s3 }
  0x11   :  { %v200_v3 = vmax.f32 %v184_v58, 0.0  ;;  %v70_v5 = vmul.f32 %v263_v60, %v397_v1  ;;  %v148_v7 = vmul.f32 %v295_v61, %v405_v4  ;;  %v298_v8 = vunpack.c.l.bf16 %v322_v57  ;;  %s329_s8 = scalar_lea.vmem %s234_s3, 2048  ;;  %p334_p1 = scmp.lt.s32.totalorder %s234_s3, %s234_s3 }
  0x12   :  { %v185_v9 = vadd.f32 %v169_v62, %v91_v59  ;;  %v92_v10 = vadd.f32 %v410_v6, %v69_v63  ;;  %v170_v11 = vadd.f32 %v422_v12, %v147_v0  ;;  %v71_v13 = vmul.f32 %v266_v2, %v397_v1  ;;  %p330_p0 = scmp.ne.s32.totalorder %s234_s3, %s329_s8  ;;  %p335_p2 = scmp.lt.s32.totalorder %s329_s8, %s329_s8 }
  0x13   :  { %216 = vst [vmem:[#allocation2 + $0x20] sm:$0xff] %v200_v3  ;;  %v93_v15 = vadd.f32 %v410_v6, %v70_v5  ;;  %v171_v16 = vadd.f32 %v422_v12, %v148_v7  ;;  %v149_v17 = vmul.f32 %v298_v8, %v405_v4  ;;  %v267_v18 = vunpack.c.h.bf16 %v315_v52 }
  0x14   :  { %v201_v20 = vmax.f32 %v185_v9, 0.0  ;;  %v186_v21 = vadd.f32 %v170_v11, %v92_v10  ;;  %v94_v22 = vadd.f32 %v410_v6, %v71_v13  ;;  %v299_v23 = vunpack.c.h.bf16 %v322_v57  ;;  %p336_p3 = por %p335_p2, %p334_p1 }
  0x15   :  { %v187_v24 = vadd.f32 %v171_v16, %v93_v15  ;;  %v172_v25 = vadd.f32 %v422_v12, %v149_v17  ;;  %v72_v26 = vmul.f32 %v267_v18, %v397_v1  ;;  %v270_v27 = vunpack.c.l.bf16 %v316_v14 }
  0x16   :  { %217 = vst [vmem:[#allocation2 + $0x28] sm:$0xff] %v201_v20  ;;  %v202_v28 = vmax.f32 %v186_v21, 0.0  ;;  %v150_v29 = vmul.f32 %v299_v23, %v405_v4  ;;  %v302_v30 = vunpack.c.l.bf16 %v323_v19  ;;  %v271_v31 = vunpack.c.h.bf16 %v316_v14  ;;  %p337_p4 = pnand %p336_p3, %p330_p0 }
  0x17   :  { %v203_v34 = vmax.f32 %v187_v24, 0.0  ;;  %v188_v35 = vadd.f32 %v172_v25, %v94_v22  ;;  %v95_v36 = vadd.f32 %v410_v6, %v72_v26  ;;  %v73_v37 = vmul.f32 %v270_v27, %v397_v1 }
  0x18   :  { %218 = vst [vmem:[#allocation2 + $0x30] sm:$0xff] %v202_v28  ;;  %v173_v38 = vadd.f32 %v422_v12, %v150_v29  ;;  %v151_v39 = vmul.f32 %v302_v30, %v405_v4  ;;  %v74_v40 = vmul.f32 %v271_v31, %v397_v1  ;;  %v303_v41 = vunpack.c.h.bf16 %v323_v19 }
  0x19   :  { %219 = vst [vmem:[#allocation2 + $0x38] sm:$0xff] %v203_v34  ;;  %v204_v42 = vmax.f32 %v188_v35, 0.0  ;;  %v96_v43 = vadd.f32 %v410_v6, %v73_v37  ;;  %v274_v44 = vunpack.c.l.bf16 %v317_v32  ;;  %v306_v45 = vunpack.c.l.bf16 %v324_v33 }
  0x1a   :  { %v189_v47 = vadd.f32 %v173_v38, %v95_v36  ;;  %v174_v48 = vadd.f32 %v422_v12, %v151_v39  ;;  %v97_v49 = vadd.f32 %v410_v6, %v74_v40  ;;  %v152_v50 = vmul.f32 %v303_v41, %v405_v4 }
  0x1b   :  { %220 = vst [vmem:[#allocation2 + $0x40] sm:$0xff] %v204_v42  ;;  %v75_v51 = vmul.f32 %v274_v44, %v397_v1  ;;  %v153_v52 = vmul.f32 %v306_v45, %v405_v4  ;;  %v275_v53 = vunpack.c.h.bf16 %v317_v32  ;;  %v307_v54 = vunpack.c.h.bf16 %v324_v33 }
  0x1c   :  { %v205_v56 = vmax.f32 %v189_v47, 0.0  ;;  %v190_v57 = vadd.f32 %v174_v48, %v96_v43  ;;  %v175_v58 = vadd.f32 %v422_v12, %v152_v50  ;;  %v278_v59 = vunpack.c.l.bf16 %v318_v46 }
  0x1d   :  { %v98_v60 = vadd.f32 %v410_v6, %v75_v51  ;;  %v176_v61 = vadd.f32 %v422_v12, %v153_v52  ;;  %v76_v62 = vmul.f32 %v275_v53, %v397_v1  ;;  %v154_v63 = vmul.f32 %v307_v54, %v405_v4 }
  0x1e   :  { %221 = vst [vmem:[#allocation2 + $0x48] sm:$0xff] %v205_v56  ;;  %v206_v0 = vmax.f32 %v190_v57, 0.0  ;;  %v191_v2 = vadd.f32 %v175_v58, %v97_v49  ;;  %v77_v3 = vmul.f32 %v278_v59, %v397_v1  ;;  %v310_v5 = vunpack.c.l.bf16 %v325_v55 }
  0x1f   :  { %v192_v7 = vadd.f32 %v176_v61, %v98_v60  ;;  %v99_v8 = vadd.f32 %v410_v6, %v76_v62  ;;  %v177_v9 = vadd.f32 %v422_v12, %v154_v63  ;;  %v279_v10 = vunpack.c.h.bf16 %v318_v46 }
  0x20   :  { %222 = vst [vmem:[#allocation2 + $0x50] sm:$0xff] %v206_v0  ;;  %v207_v11 = vmax.f32 %v191_v2, 0.0  ;;  %v100_v13 = vadd.f32 %v410_v6, %v77_v3  ;;  %v155_v14 = vmul.f32 %v310_v5, %v405_v4  ;;  %v311_v15 = vunpack.c.h.bf16 %v325_v55 }
  0x21   :  { %v208_v16 = vmax.f32 %v192_v7, 0.0  ;;  %v193_v17 = vadd.f32 %v177_v9, %v99_v8  ;;  %v78_v18 = vmul.f32 %v279_v10, %v397_v1 }
  0x22   :  { %223 = vst [vmem:[#allocation2 + $0x58] sm:$0xff] %v207_v11  ;;  %v178_v19 = vadd.f32 %v422_v12, %v155_v14  ;;  %v156_v20 = vmul.f32 %v311_v15, %v405_v4 }
  0x23   :  { %224 = vst [vmem:[#allocation2 + $0x60] sm:$0xff] %v208_v16  ;;  %v209_v21 = vmax.f32 %v193_v17, 0.0  ;;  %v101_v22 = vadd.f32 %v410_v6, %v78_v18 }
  0x24   :  { %v194_v23 = vadd.f32 %v178_v19, %v100_v13  ;;  %v179_v24 = vadd.f32 %v422_v12, %v156_v20 }
  0x25   :  { %225 = vst [vmem:[#allocation2 + $0x68] sm:$0xff] %v209_v21 }
  0x26   :  { %v210_v25 = vmax.f32 %v194_v23, 0.0  ;;  %v195_v26 = vadd.f32 %v179_v24, %v101_v22 }
  0x28   :  { %226 = vst [vmem:[#allocation2 + $0x70] sm:$0xff] %v210_v25  ;;  %v211_v1 = vmax.f32 %v195_v26, 0.0 }
  0x2a   :  { %227 = vst [vmem:[#allocation2 + $0x78] sm:$0xff] %v211_v1 }
  0x2b   :  { %340 = shalt.err (!%p337_p4)
}
  0x2c   :  { %s341_s10 = scalar_lea.hbm %s541_s6, 2048 }
  0x2d   :  { %p342_p5 = scmp.ne.s32.totalorder %s541_s6, %s341_s10  ;;  %p345_p6 = scmp.lt.u32.totalorder %s341_s10, %s541_s6 }
  0x2f   :  { %p347_p7 = pnand %p345_p6, %p342_p5 }
  0x31   :  { %350 = shalt.err (!%p347_p7)
}
  0x32   :  { %s354_s5 = smov 128   ;;  %s355_s14 = smov 8  }
  0x33   :  { %239 = dma.vmem_to_hbm [thread:$0]  %s234_s3, 2048, %s541_s6, [#allocation3], %s354_s5, %s354_s5, %s355_s14  }
  0x34   :  { %351 = dma.done.wait [#allocation3], 2048  }
  0x35   :  { %352 = vsyncadd [#allocation3], 4294965248 }
  0x36   :  { %243 = vsyncpa [#allocation3], 1 }

// kernel: bottleneck_forward.9
= control target key start
LH: loop header
LB: loop body
LE: loop exit
PB: predicated region body
PF: predicated region fallthrough
CT: control target
= control target key end

     0   :  { %s779_s3 = inlined_call_operand.vmem [shape: bf16[128,128], index: 3, kind: input, shape index: {}]   ;;  %s780_s0 = inlined_call_operand.vmem [shape: bf16[128,128], index: 0, kind: input, shape index: {}]   ;;  %s781_s1 = inlined_call_operand.vmem [shape: f32[1,128], index: 1, kind: input, shape index: {}]   ;;  %s782_s2 = inlined_call_operand.vmem [shape: f32[1,128], index: 2, kind: input, shape index: {}]   ;;  %s783_s4 = inlined_call_operand.vmem [shape: bf16[128,128], index: 4, kind: output, shape index: {0}]   ;;  %s784_s5 = inlined_call_operand.vmem [shape: f32[8,128], index: 5, kind: output, shape index: {1}]   ;;  %s785_s6 = inlined_call_operand.vmem [shape: f32[8,128], index: 6, kind: output, shape index: {2}]  }
   0x1   :  { %v616_v0 = vld [vmem:[%s779_s3] sm:$0xff]   ;;  %v617_v1 = vld [vmem:[%s779_s3 + $0x8] sm:$0xff]   ;;  %v618_v2 = vld [vmem:[%s779_s3 + $0x10] sm:$0xff]  }
   0x2   :  { %568 = vmatprep.subr.bf16.mxu0 %v616_v0  ;;  %600 = vmatprep.subr.bf16.mxu1 %v616_v0  ;;  %v619_v3 = vld [vmem:[%s779_s3 + $0x18] sm:$0xff]   ;;  %v467_v4 = vld [vmem:[%s780_s0] sm:$0xff]   ;;  %v538_v8 = vld [vmem:[%s780_s0 + $0x8] sm:$0xff]  }
   0x3   :  { %569 = vmatpush3.bf16.msra.mxu0 %v616_v0  ;;  %608 = vmatpush3.bf16.msra.mxu1 %v616_v0  ;;  %v677_v5 = vld [vmem:[%s781_s1] ss:$0 sm:$0xff]  ;;  %v468_v6 = vunpack.c.l.bf16 %v467_v4  ;;  %v469_v7 = vunpack.c.h.bf16 %v467_v4  ;;  %v539_v9 = vld [vmem:[%s780_s0 + $0x10] sm:$0xff]   ;;  %v472_v11 = vunpack.c.l.bf16 %v538_v8  ;;  %v473_v14 = vunpack.c.h.bf16 %v538_v8  ;;  %v540_v22 = vld [vmem:[%s780_s0 + $0x18] sm:$0xff]  }
   0x4   :  { %570 = vmatprep.subr.bf16.mxu0 %v617_v1  ;;  %601 = vmatprep.subr.bf16.mxu1 %v617_v1  ;;  %v688_v10 = vld [vmem:[%s782_s2] ss:$0 sm:$0xff]  ;;  %v476_v17 = vunpack.c.l.bf16 %v539_v9  ;;  %v477_v21 = vunpack.c.h.bf16 %v539_v9  ;;  %v542_v27 = vld [vmem:[%s780_s0 + $0x28] sm:$0xff]   ;;  %v543_v30 = vld [vmem:[%s780_s0 + $0x30] sm:$0xff]   ;;  %v480_v32 = vunpack.c.l.bf16 %v540_v22  ;;  %v481_v33 = vunpack.c.h.bf16 %v540_v22 }
   0x5   :  { %v60_v12 = vmul.f32 %v468_v6, %v677_v5  ;;  %v61_v13 = vmul.f32 %v469_v7, %v677_v5  ;;  %v541_v15 = vld [vmem:[%s780_s0 + $0x20] sm:$0xff]   ;;  %v62_v20 = vmul.f32 %v472_v11, %v677_v5  ;;  %v63_v26 = vmul.f32 %v473_v14, %v677_v5  ;;  %v621_v28 = vld [vmem:[%s779_s3 + $0x28] sm:$0xff]   ;;  %v544_v39 = vld [vmem:[%s780_s0 + $0x38] sm:$0xff]  }
   0x6   :  { %v620_v16 = vld [vmem:[%s779_s3 + $0x20] sm:$0xff]   ;;  %v484_v23 = vunpack.c.l.bf16 %v541_v15  ;;  %v64_v29 = vmul.f32 %v476_v17, %v677_v5  ;;  %v485_v34 = vunpack.c.h.bf16 %v541_v15  ;;  %v65_v36 = vmul.f32 %v477_v21, %v677_v5  ;;  %v622_v44 = vld [vmem:[%s779_s3 + $0x30] sm:$0xff]   ;;  %v623_v61 = vld [vmem:[%s779_s3 + $0x38] sm:$0xff]  }
   0x7   :  { %571 = vmatpush3.bf16.msra.mxu0 %v617_v1  ;;  %609 = vmatpush3.bf16.msra.mxu1 %v617_v1  ;;  %v83_v18 = vadd.f32 %v688_v10, %v60_v12  ;;  %v84_v19 = vadd.f32 %v688_v10, %v61_v13  ;;  %v85_v35 = vadd.f32 %v688_v10, %v62_v20  ;;  %v488_v38 = vunpack.c.l.bf16 %v542_v27 }
   0x8   :  { %572 = vmatprep.subr.bf16.mxu0 %v618_v2  ;;  %602 = vmatprep.subr.bf16.mxu1 %v618_v2  ;;  %v68_v37 = vmul.f32 %v484_v23, %v677_v5  ;;  %v86_v40 = vadd.f32 %v688_v10, %v63_v26  ;;  %v69_v41 = vmul.f32 %v485_v34, %v677_v5  ;;  %v489_v42 = vunpack.c.h.bf16 %v542_v27 }
   0x9   :  { %v99_v24 = vmax.f32 %v83_v18, 0.0  ;;  %v100_v25 = vmax.f32 %v84_v19, 0.0  ;;  %v492_v43 = vunpack.c.l.bf16 %v543_v30  ;;  %v87_v45 = vadd.f32 %v688_v10, %v64_v29 }
   0xa   :  { %v91_v46 = vadd.f32 %v688_v10, %v68_v37  ;;  %v70_v47 = vmul.f32 %v488_v38, %v677_v5  ;;  %v493_v48 = vunpack.c.h.bf16 %v543_v30  ;;  %v92_v49 = vadd.f32 %v688_v10, %v69_v41 }
   0xb   :  { %573 = vmatpush3.bf16.msra.mxu0 %v618_v2  ;;  %610 = vmatpush3.bf16.msra.mxu1 %v618_v2  ;;  %v115_v31 = vpack.c.bf16 %v100_v25, %v99_v24  ;;  %v71_v50 = vmul.f32 %v489_v42, %v677_v5  ;;  %v72_v51 = vmul.f32 %v492_v43, %v677_v5  ;;  %v496_v52 = vunpack.c.l.bf16 %v544_v39 }
   0xc   :  { %574 = vmatprep.subr.bf16.mxu0 %v619_v3  ;;  %603 = vmatprep.subr.bf16.mxu1 %v619_v3  ;;  %v107_v53 = vmax.f32 %v91_v46, 0.0  ;;  %v93_v54 = vadd.f32 %v688_v10, %v70_v47  ;;  %v73_v55 = vmul.f32 %v493_v48, %v677_v5  ;;  %v497_v56 = vunpack.c.h.bf16 %v544_v39 }
   0xd   :  { %584 = vmatprep.mubr.bf16.mxu0 %v115_v31  ;;  %v88_v57 = vadd.f32 %v688_v10, %v65_v36  ;;  %v108_v58 = vmax.f32 %v92_v49, 0.0  ;;  %v94_v59 = vadd.f32 %v688_v10, %v71_v50  ;;  %v95_v60 = vadd.f32 %v688_v10, %v72_v51 }
   0xe   :  { %v66_v62 = vmul.f32 %v480_v32, %v677_v5  ;;  %v96_v63 = vadd.f32 %v688_v10, %v73_v55  ;;  %v101_v0 = vmax.f32 %v85_v35, 0.0  ;;  %v102_v1 = vmax.f32 %v86_v40, 0.0 }
   0xf   :  { %575 = vmatpush3.bf16.msra.mxu0 %v619_v3  ;;  %611 = vmatpush3.bf16.msra.mxu1 %v619_v3  ;;  %v67_v2 = vmul.f32 %v481_v33, %v677_v5  ;;  %v119_v3 = vpack.c.bf16 %v108_v58, %v107_v53  ;;  %v109_v4 = vmax.f32 %v93_v54, 0.0  ;;  %v110_v6 = vmax.f32 %v94_v59, 0.0 }
  0x10   :  { %576 = vmatprep.subr.bf16.mxu0 %v620_v16  ;;  %604 = vmatprep.subr.bf16.mxu1 %v620_v16  ;;  %v74_v7 = vmul.f32 %v496_v52, %v677_v5  ;;  %v75_v8 = vmul.f32 %v497_v56, %v677_v5  ;;  %v103_v9 = vmax.f32 %v87_v45, 0.0  ;;  %v104_v11 = vmax.f32 %v88_v57, 0.0 }
  0x11   :  { %v111_v12 = vmax.f32 %v95_v60, 0.0  ;;  %v112_v13 = vmax.f32 %v96_v63, 0.0  ;;  %v89_v14 = vadd.f32 %v688_v10, %v66_v62  ;;  %v90_v15 = vadd.f32 %v688_v10, %v67_v2  ;;  %592 = vmatprep.mubr.bf16.mxu1 %v119_v3 }
  0x12   :  { %v120_v17 = vpack.c.bf16 %v110_v6, %v109_v4  ;;  %v97_v18 = vadd.f32 %v688_v10, %v74_v7  ;;  %v98_v19 = vadd.f32 %v688_v10, %v75_v8  ;;  %v117_v5 = vpack.c.bf16 %v104_v11, %v103_v9 }
  0x13   :  { %577 = vmatpush3.bf16.msra.mxu0 %v620_v16  ;;  %612 = vmatpush3.bf16.msra.mxu1 %v620_v16  ;;  %v116_v16 = vpack.c.bf16 %v102_v1, %v101_v0  ;;  %v121_v20 = vpack.c.bf16 %v112_v13, %v111_v12  ;;  %v105_v21 = vmax.f32 %v89_v14, 0.0  ;;  %v106_v22 = vmax.f32 %v90_v15, 0.0 }
  0x14   :  { %578 = vmatprep.subr.bf16.mxu0 %v621_v28  ;;  %605 = vmatprep.subr.bf16.mxu1 %v621_v28  ;;  %v113_v23 = vmax.f32 %v97_v18, 0.0  ;;  %v114_v24 = vmax.f32 %v98_v19, 0.0 }
  0x15   :  { %v118_v25 = vpack.c.bf16 %v106_v22, %v105_v21 }
  0x16   :  { %v122_v26 = vpack.c.bf16 %v114_v24, %v113_v23 }
  0x17   :  { %579 = vmatpush3.bf16.msra.mxu0 %v621_v28  ;;  %613 = vmatpush3.bf16.msra.mxu1 %v621_v28 }
  0x18   :  { %580 = vmatprep.subr.bf16.mxu0 %v622_v44  ;;  %606 = vmatprep.subr.bf16.mxu1 %v622_v44 }
  0x1b   :  { %581 = vmatpush3.bf16.msra.mxu0 %v622_v44  ;;  %614 = vmatpush3.bf16.msra.mxu1 %v622_v44 }
  0x1c   :  { %582 = vmatprep.subr.bf16.mxu0 %v623_v61  ;;  %607 = vmatprep.subr.bf16.mxu1 %v623_v61 }
  0x1f   :  { %583 = vmatpush3.bf16.msra.mxu0 %v623_v61  ;;  %615 = vmatpush3.bf16.msra.mxu1 %v623_v61 }
  0x22   :  { %585 = vmatmul.mubr.bf16.vlgmr.msra.gmra.mrb[0].mxu0 %v116_v16  ;;  %593 = vmatmul.mubr.bf16.vlgmr.msra.gmra.mrb[0].mxu1 %v120_v17 }
  0x23   :  { %588 = vmatprep.mubr.bf16.mxu0 %v117_v5  ;;  %596 = vmatprep.mubr.bf16.mxu1 %v121_v20 }
  0x2a   :  { %589 = vmatmul.mubr.bf16.gmra.mrb[4].mxu0 %v118_v25  ;;  %597 = vmatmul.mubr.bf16.gmra.mrb[4].mxu1 %v122_v26 }
  0xf5   :  { %v586_v27 = vpop.f32.mrb[0].mxu0  ;;  %v594_v28 = vpop.f32.mrb[0].mxu1 }
  0xf6   :  { %v221_v29 = vpop.f32.mrb[1].mxu0  ;;  %v253_v10 = vpop.f32.mrb[1].mxu1  ;;  %v381_v41 = vmul.f32 %v586_v27, %v586_v27  ;;  %v389_v15 = vmul.f32 %v594_v28, %v594_v28 }
  0xf7   :  { %v587_v30 = vpop.f32.mrb[2].mxu0  ;;  %v595_v31 = vpop.f32.mrb[2].mxu1  ;;  %v379_v32 = vmul.f32 %v221_v29, %v221_v29  ;;  %v387_v8 = vmul.f32 %v253_v10, %v253_v10 }
  0xf8   :  { %v506_v33 = vpack.c.bf16 %v587_v30, %v586_v27  ;;  %v224_v34 = vpop.f32.mrb[3].mxu0  ;;  %v526_v35 = vpack.c.bf16 %v595_v31, %v594_v28  ;;  %v256_v36 = vpop.f32.mrb[3].mxu1  ;;  %v382_v44 = vmul.f32 %v587_v30, %v587_v30  ;;  %v390_v18 = vmul.f32 %v595_v31, %v595_v31 }
  0xf9   :  { %v501_v37 = vpack.c.bf16 %v224_v34, %v221_v29  ;;  %v364_v38 = vadd.f32 %v224_v34, %v221_v29  ;;  %v380_v39 = vmul.f32 %v224_v34, %v224_v34  ;;  %v521_v40 = vpack.c.bf16 %v256_v36, %v253_v10 }
  0xfa   :  { %545 = vst [vmem:[%s783_s4 + $0x8] sm:$0xff] %v506_v33   ;;  %549 = vst [vmem:[%s783_s4 + $0x28] sm:$0xff] %v526_v35   ;;  %v388_v14 = vmul.f32 %v256_v36, %v256_v36 }
  0xfb   :  { %502 = vst [vmem:[%s783_s4] sm:$0xff] %v501_v37   ;;  %v365_v42 = vadd.f32 %v586_v27, %v364_v38  ;;  %v395_v43 = vadd.f32 %v380_v39, %v379_v32  ;;  %548 = vst [vmem:[%s783_s4 + $0x20] sm:$0xff] %v521_v40  }
  0xfd   :  { %v396_v45 = vadd.f32 %v395_v43, %v381_v41  ;;  %v590_v46 = vpop.f32.mrb[4].mxu0  ;;  %v366_v47 = vadd.f32 %v587_v30, %v365_v42  ;;  %v598_v48 = vpop.f32.mrb[4].mxu1 }
  0xfe   :  { %v237_v49 = vpop.f32.mrb[5].mxu0  ;;  %v269_v50 = vpop.f32.mrb[5].mxu1  ;;  %v385_v1 = vmul.f32 %v590_v46, %v590_v46  ;;  %v393_v26 = vmul.f32 %v598_v48, %v598_v48 }
  0xff   :  { %v367_v51 = vadd.f32 %v366_v47, %v237_v49  ;;  %v383_v52 = vmul.f32 %v237_v49, %v237_v49  ;;  %v397_v53 = vadd.f32 %v396_v45, %v382_v44  ;;  %v591_v54 = vpop.f32.mrb[6].mxu0  ;;  %v599_v55 = vpop.f32.mrb[6].mxu1  ;;  %v391_v20 = vmul.f32 %v269_v50, %v269_v50 }
 0x100   :  { %v516_v56 = vpack.c.bf16 %v591_v54, %v590_v46  ;;  %v240_v57 = vpop.f32.mrb[7].mxu0  ;;  %v536_v58 = vpack.c.bf16 %v599_v55, %v598_v48  ;;  %v272_v59 = vpop.f32.mrb[7].mxu1  ;;  %v386_v4 = vmul.f32 %v591_v54, %v591_v54 }
 0x101   :  { %v398_v60 = vadd.f32 %v397_v53, %v383_v52  ;;  %v511_v61 = vpack.c.bf16 %v240_v57, %v237_v49  ;;  %v368_v62 = vadd.f32 %v367_v51, %v240_v57  ;;  %v384_v63 = vmul.f32 %v240_v57, %v240_v57 }
 0x102   :  { %547 = vst [vmem:[%s783_s4 + $0x18] sm:$0xff] %v516_v56   ;;  %551 = vst [vmem:[%s783_s4 + $0x38] sm:$0xff] %v536_v58   ;;  %v531_v0 = vpack.c.bf16 %v272_v59, %v269_v50  ;;  %v392_v25 = vmul.f32 %v272_v59, %v272_v59 }
 0x103   :  { %546 = vst [vmem:[%s783_s4 + $0x10] sm:$0xff] %v511_v61   ;;  %v369_v2 = vadd.f32 %v590_v46, %v368_v62  ;;  %v399_v3 = vadd.f32 %v398_v60, %v384_v63 }
 0x104   :  { %550 = vst [vmem:[%s783_s4 + $0x30] sm:$0xff] %v531_v0  }
 0x105   :  { %v400_v6 = vadd.f32 %v399_v3, %v385_v1  ;;  %v370_v7 = vadd.f32 %v591_v54, %v369_v2 }
 0x107   :  { %v371_v9 = vadd.f32 %v370_v7, %v253_v10  ;;  %v401_v11 = vadd.f32 %v400_v6, %v386_v4  ;;  %v394_v10 = vmul.f32 %v599_v55, %v599_v55 }
 0x109   :  { %v402_v12 = vadd.f32 %v401_v11, %v387_v8  ;;  %v372_v13 = vadd.f32 %v371_v9, %v256_v36 }
 0x10b   :  { %v373_v16 = vadd.f32 %v594_v28, %v372_v13  ;;  %v403_v17 = vadd.f32 %v402_v12, %v388_v14 }
 0x10d   :  { %v404_v19 = vadd.f32 %v403_v17, %v389_v15  ;;  %v374_v5 = vadd.f32 %v595_v31, %v373_v16 }
 0x10f   :  { %v375_v21 = vadd.f32 %v374_v5, %v269_v50  ;;  %v405_v22 = vadd.f32 %v404_v19, %v390_v18 }
 0x111   :  { %v406_v23 = vadd.f32 %v405_v22, %v391_v20  ;;  %v376_v24 = vadd.f32 %v375_v21, %v272_v59 }
 0x113   :  { %v377_v27 = vadd.f32 %v598_v48, %v376_v24  ;;  %v407_v29 = vadd.f32 %v406_v23, %v392_v25 }
 0x115   :  { %v378_v30 = vadd.f32 %v599_v55, %v377_v27  ;;  %v408_v32 = vadd.f32 %v407_v29, %v393_v26 }
 0x117   :  { %v409_v33 = vadd.f32 %v408_v32, %v394_v10  ;;  %410 = vst [vmem:[%s784_s5] sm:$0xff] %v378_v30 }
 0x119   :  { %411 = vst [vmem:[%s785_s6] sm:$0xff] %v409_v33 }

// kernel: bottleneck_forward.8
= control target key start
LH: loop header
LB: loop body
LE: loop exit
PB: predicated region body
PF: predicated region fallthrough
CT: control target
= control target key end

     0   :  { %s2966_s1 = inlined_call_operand.vmem [shape: bf16[1152,128], index: 1, kind: input, shape index: {}]   ;;  %s2967_s0 = inlined_call_operand.vmem [shape: bf16[128,1152], index: 0, kind: input, shape index: {}]   ;;  %s2968_s2 = inlined_call_operand.vmem [shape: bf16[128,128], index: 2, kind: output, shape index: {0}]   ;;  %s2969_s3 = inlined_call_operand.vmem [shape: f32[8,128], index: 3, kind: output, shape index: {1}]   ;;  %s2970_s4 = inlined_call_operand.vmem [shape: f32[8,128], index: 4, kind: output, shape index: {2}]  }
   0x1   :  { %v2207_v0 = vld [vmem:[%s2966_s1 + $0x40] sm:$0xff]   ;;  %v2211_v4 = vld [vmem:[%s2966_s1 + $0x48] sm:$0xff]   ;;  %v2215_v8 = vld [vmem:[%s2966_s1 + $0x50] sm:$0xff]  }
   0x2   :  { %v2208_v1 = vld [vmem:[%s2966_s1 + $0xc0] sm:$0xff]   ;;  %1887 = vmatprep.subr.bf16.mxu0 %v2207_v0  ;;  %v2212_v5 = vld [vmem:[%s2966_s1 + $0xc8] sm:$0xff]   ;;  %v2216_v9 = vld [vmem:[%s2966_s1 + $0xd0] sm:$0xff]  }
   0x3   :  { %v2209_v2 = vld [vmem:[%s2966_s1] sm:$0xff]   ;;  %1951 = vmatprep.subr.bf16.mxu1 %v2208_v1  ;;  %v2213_v6 = vld [vmem:[%s2966_s1 + $0x8] sm:$0xff]   ;;  %v2217_v10 = vld [vmem:[%s2966_s1 + $0x10] sm:$0xff]  }
   0x4   :  { %v2210_v3 = vld [vmem:[%s2966_s1 + $0x80] sm:$0xff]   ;;  %1888 = vmatpush3.bf16.msra.mxu0 %v2209_v2  ;;  %v2214_v7 = vld [vmem:[%s2966_s1 + $0x88] sm:$0xff]   ;;  %v2218_v11 = vld [vmem:[%s2966_s1 + $0x90] sm:$0xff]  }
   0x5   :  { %1952 = vmatpush3.bf16.msra.mxu1 %v2210_v3  ;;  %1889 = vmatprep.subr.bf16.mxu0 %v2211_v4  ;;  %v2219_v12 = vld [vmem:[%s2966_s1 + $0x58] sm:$0xff]   ;;  %v2223_v16 = vld [vmem:[%s2966_s1 + $0x60] sm:$0xff]   ;;  %v2227_v20 = vld [vmem:[%s2966_s1 + $0x68] sm:$0xff]  }
   0x6   :  { %1953 = vmatprep.subr.bf16.mxu1 %v2212_v5  ;;  %v2220_v13 = vld [vmem:[%s2966_s1 + $0xd8] sm:$0xff]   ;;  %v2224_v17 = vld [vmem:[%s2966_s1 + $0xe0] sm:$0xff]   ;;  %v2228_v21 = vld [vmem:[%s2966_s1 + $0xe8] sm:$0xff]  }
   0x7   :  { %v2221_v14 = vld [vmem:[%s2966_s1 + $0x18] sm:$0xff]   ;;  %v2225_v18 = vld [vmem:[%s2966_s1 + $0x20] sm:$0xff]   ;;  %v2229_v22 = vld [vmem:[%s2966_s1 + $0x28] sm:$0xff]  }
   0x8   :  { %1890 = vmatpush3.bf16.msra.mxu0 %v2213_v6  ;;  %v2222_v15 = vld [vmem:[%s2966_s1 + $0x98] sm:$0xff]   ;;  %v2226_v19 = vld [vmem:[%s2966_s1 + $0xa0] sm:$0xff]   ;;  %v2230_v23 = vld [vmem:[%s2966_s1 + $0xa8] sm:$0xff]  }
   0x9   :  { %1954 = vmatpush3.bf16.msra.mxu1 %v2214_v7  ;;  %1891 = vmatprep.subr.bf16.mxu0 %v2215_v8  ;;  %v2231_v24 = vld [vmem:[%s2966_s1 + $0x70] sm:$0xff]   ;;  %v2235_v28 = vld [vmem:[%s2966_s1 + $0x78] sm:$0xff]   ;;  %v2239_v32 = vld [vmem:[%s2967_s0] ss:$36 sps:$4 sm:$0xff]  }
   0xa   :  { %1955 = vmatprep.subr.bf16.mxu1 %v2216_v9  ;;  %v2232_v25 = vld [vmem:[%s2966_s1 + $0xf0] sm:$0xff]   ;;  %v2236_v29 = vld [vmem:[%s2966_s1 + $0xf8] sm:$0xff]   ;;  %v2241_v33 = vld [vmem:[%s2967_s0 + $0x4] ss:$36 sps:$4 sm:$0xff]  }
   0xb   :  { %v2233_v26 = vld [vmem:[%s2966_s1 + $0x30] sm:$0xff]   ;;  %v2237_v30 = vld [vmem:[%s2966_s1 + $0x38] sm:$0xff]   ;;  %v2242_v34 = vld [vmem:[%s2967_s0 + $0x8] ss:$36 sps:$4 sm:$0xff]   ;;  %1071 = vmatprep.mubr.bf16.mxu0 %v2241_v33 }
   0xc   :  { %1892 = vmatpush3.bf16.msra.mxu0 %v2217_v10  ;;  %v2234_v27 = vld [vmem:[%s2966_s1 + $0xb0] sm:$0xff]   ;;  %v2238_v31 = vld [vmem:[%s2966_s1 + $0xb8] sm:$0xff]   ;;  %v2245_v36 = vld [vmem:[%s2966_s1 + $0x140] sm:$0xff]  }
   0xd   :  { %1956 = vmatpush3.bf16.msra.mxu1 %v2218_v11  ;;  %1893 = vmatprep.subr.bf16.mxu0 %v2219_v12  ;;  %v2244_v35 = vld [vmem:[%s2967_s0 + $0xc] ss:$36 sps:$4 sm:$0xff]   ;;  %v2246_v37 = vld [vmem:[%s2966_s1 + $0x100] sm:$0xff]   ;;  %v2249_v39 = vld [vmem:[%s2967_s0 + $0x54] ss:$36 sps:$4 sm:$0xff]  }
   0xe   :  { %1957 = vmatprep.subr.bf16.mxu1 %v2220_v13  ;;  %1168 = vmatprep.mubr.bf16.mxu1 %v2244_v35  ;;  %v2247_v38 = vld [vmem:[%s2967_s0 + $0x4c] ss:$36 sps:$4 sm:$0xff]   ;;  %v2255_v44 = vld [vmem:[%s2967_s0 + $0x94] ss:$36 sps:$4 sm:$0xff]   ;;  %v2257_v45 = vld [vmem:[%s2967_s0 + $0x9c] ss:$36 sps:$4 sm:$0xff]  }
   0xf   :  { %v2251_v40 = vld [vmem:[%s2967_s0 + $0x48] ss:$36 sps:$4 sm:$0xff]   ;;  %v2252_v41 = vld [vmem:[%s2967_s0 + $0x50] ss:$36 sps:$4 sm:$0xff]   ;;  %v2262_v47 = vld [vmem:[%s2966_s1 + $0x1c0] sm:$0xff]  }
  0x10   :  { %1894 = vmatpush3.bf16.msra.mxu0 %v2221_v14  ;;  %v2253_v42 = vld [vmem:[%s2966_s1 + $0x148] sm:$0xff]   ;;  %v2261_v46 = vld [vmem:[%s2966_s1 + $0x150] sm:$0xff]   ;;  %v2264_v50 = vld [vmem:[%s2966_s1 + $0x180] sm:$0xff]  }
  0x11   :  { %1958 = vmatpush3.bf16.msra.mxu1 %v2222_v15  ;;  %1895 = vmatprep.subr.bf16.mxu0 %v2223_v16  ;;  %v2254_v43 = vld [vmem:[%s2966_s1 + $0x108] sm:$0xff]   ;;  %v2259_v48 = vld [vmem:[%s2967_s0 + $0x90] ss:$36 sps:$4 sm:$0xff]   ;;  %v2260_v51 = vld [vmem:[%s2967_s0 + $0x98] ss:$36 sps:$4 sm:$0xff]  }
  0x12   :  { %1959 = vmatprep.subr.bf16.mxu1 %v2224_v17  ;;  %v2263_v49 = vld [vmem:[%s2966_s1 + $0x110] sm:$0xff]   ;;  %v2265_v52 = vld [vmem:[%s2967_s0 + $0xdc] ss:$36 sps:$4 sm:$0xff]   ;;  %v2267_v53 = vld [vmem:[%s2967_s0 + $0xe4] ss:$36 sps:$4 sm:$0xff]  }
  0x13   :  { %v2271_v54 = vld [vmem:[%s2966_s1 + $0x158] sm:$0xff]   ;;  %v2272_v55 = vld [vmem:[%s2966_s1 + $0x1c8] sm:$0xff]   ;;  %v2270_v59 = vld [vmem:[%s2967_s0 + $0xe0] ss:$36 sps:$4 sm:$0xff]  }
  0x14   :  { %1896 = vmatpush3.bf16.msra.mxu0 %v2225_v18  ;;  %v2273_v56 = vld [vmem:[%s2966_s1 + $0x118] sm:$0xff]   ;;  %v2274_v57 = vld [vmem:[%s2966_s1 + $0x188] sm:$0xff]   ;;  %v2281_v62 = vld [vmem:[%s2966_s1 + $0x160] sm:$0xff]  }
  0x15   :  { %1960 = vmatpush3.bf16.msra.mxu1 %v2226_v19  ;;  %1897 = vmatprep.subr.bf16.mxu0 %v2227_v20  ;;  %v2269_v58 = vld [vmem:[%s2967_s0 + $0xd8] ss:$36 sps:$4 sm:$0xff]   ;;  %v2275_v60 = vld [vmem:[%s2967_s0 + $0x124] ss:$36 sps:$4 sm:$0xff]   ;;  %v2277_v61 = vld [vmem:[%s2967_s0 + $0x12c] ss:$36 sps:$4 sm:$0xff]  }
  0x16   :  { %1961 = vmatprep.subr.bf16.mxu1 %v2228_v21  ;;  %v2282_v63 = vld [vmem:[%s2966_s1 + $0x1d0] sm:$0xff]   ;;  %v2283_v0 = vld [vmem:[%s2966_s1 + $0x120] sm:$0xff]   ;;  %v2280_v3 = vld [vmem:[%s2967_s0 + $0x128] ss:$36 sps:$4 sm:$0xff]  }
  0x17   :  { %v2284_v1 = vld [vmem:[%s2966_s1 + $0x190] sm:$0xff]   ;;  %v2279_v2 = vld [vmem:[%s2967_s0 + $0x120] ss:$36 sps:$4 sm:$0xff]   ;;  %v2291_v6 = vld [vmem:[%s2966_s1 + $0x168] sm:$0xff]  }
  0x18   :  { %1898 = vmatpush3.bf16.msra.mxu0 %v2229_v22  ;;  %v2285_v4 = vld [vmem:[%s2967_s0 + $0x16c] ss:$36 sps:$4 sm:$0xff]   ;;  %v2287_v5 = vld [vmem:[%s2967_s0 + $0x174] ss:$36 sps:$4 sm:$0xff]   ;;  %v2297_v14 = vld [vmem:[%s2967_s0 + $0x1bc] ss:$36 sps:$4 sm:$0xff]  }
  0x19   :  { %1962 = vmatpush3.bf16.msra.mxu1 %v2230_v23  ;;  %1899 = vmatprep.subr.bf16.mxu0 %v2231_v24  ;;  %v2292_v7 = vld [vmem:[%s2966_s1 + $0x1d8] sm:$0xff]   ;;  %v2293_v8 = vld [vmem:[%s2966_s1 + $0x128] sm:$0xff]   ;;  %v2290_v11 = vld [vmem:[%s2967_s0 + $0x170] ss:$36 sps:$4 sm:$0xff]  }
  0x1a   :  { %1963 = vmatprep.subr.bf16.mxu1 %v2232_v25  ;;  %v2294_v9 = vld [vmem:[%s2966_s1 + $0x198] sm:$0xff]   ;;  %v2289_v10 = vld [vmem:[%s2967_s0 + $0x168] ss:$36 sps:$4 sm:$0xff]   ;;  %v2301_v13 = vld [vmem:[%s2966_s1 + $0x170] sm:$0xff]  }
  0x1b   :  { %v2295_v12 = vld [vmem:[%s2967_s0 + $0x1b4] ss:$36 sps:$4 sm:$0xff]   ;;  %v2302_v15 = vld [vmem:[%s2966_s1 + $0x1e0] sm:$0xff]   ;;  %v2305_v18 = vld [vmem:[%s2966_s1 + $0x1e8] sm:$0xff]  }
  0x1c   :  { %1900 = vmatpush3.bf16.msra.mxu0 %v2233_v26  ;;  %v2303_v16 = vld [vmem:[%s2966_s1 + $0x130] sm:$0xff]   ;;  %v2304_v17 = vld [vmem:[%s2966_s1 + $0x1a0] sm:$0xff]   ;;  %v2306_v19 = vld [vmem:[%s2966_s1 + $0x1a8] sm:$0xff]  }
  0x1d   :  { %1964 = vmatpush3.bf16.msra.mxu1 %v2234_v27  ;;  %1901 = vmatprep.subr.bf16.mxu0 %v2235_v28  ;;  %v2299_v20 = vld [vmem:[%s2967_s0 + $0x1b0] ss:$36 sps:$4 sm:$0xff]   ;;  %v2300_v21 = vld [vmem:[%s2967_s0 + $0x1b8] ss:$36 sps:$4 sm:$0xff]   ;;  %v2309_v23 = vld [vmem:[%s2967_s0 + $0x204] ss:$36 sps:$4 sm:$0xff]  }
  0x1e   :  { %1965 = vmatprep.subr.bf16.mxu1 %v2236_v29  ;;  %v2307_v22 = vld [vmem:[%s2967_s0 + $0x1fc] ss:$36 sps:$4 sm:$0xff]   ;;  %v2314_v25 = vld [vmem:[%s2966_s1 + $0x1f0] sm:$0xff]  }
  0x1f   :  { %v2313_v24 = vld [vmem:[%s2966_s1 + $0x178] sm:$0xff]   ;;  %v2316_v27 = vld [vmem:[%s2966_s1 + $0x1b0] sm:$0xff]  }
  0x20   :  { %1902 = vmatpush3.bf16.msra.mxu0 %v2237_v30  ;;  %v2315_v26 = vld [vmem:[%s2966_s1 + $0x138] sm:$0xff]   ;;  %v2312_v30 = vld [vmem:[%s2967_s0 + $0x200] ss:$36 sps:$4 sm:$0xff]   ;;  %v2319_v35 = vld [vmem:[%s2967_s0 + $0x10] ss:$36 sps:$4 sm:$0xff]  }
  0x21   :  { %1966 = vmatpush3.bf16.msra.mxu1 %v2238_v31  ;;  %2015 = vmatprep.subr.bf16.mxu0 %v2245_v36  ;;  %v2317_v28 = vld [vmem:[%s2966_s1 + $0x1f8] sm:$0xff]  }
  0x22   :  { %2079 = vmatprep.subr.bf16.mxu1 %v2262_v47  ;;  %v2311_v29 = vld [vmem:[%s2967_s0 + $0x1f8] ss:$36 sps:$4 sm:$0xff]   ;;  %v2337_v47 = vld [vmem:[%s2967_s0 + $0xa0] ss:$36 sps:$4 sm:$0xff]  }
  0x23   :  { %1072 = vmatmul.mubr.bf16.vlgmr.msra.gmra.mrb[0].mxu0 %v2239_v32  ;;  %v2318_v31 = vld [vmem:[%s2966_s1 + $0x1b8] sm:$0xff]   ;;  %v2325_v32 = vld [vmem:[%s2966_s1 + $0x200] sm:$0xff]  }
  0x24   :  { %1169 = vmatmul.mubr.bf16.vlgmr.msra.gmra.mrb[0].mxu1 %v2242_v34  ;;  %2016 = vmatpush3.bf16.msra.mxu0 %v2246_v37  ;;  %v2321_v33 = vld [vmem:[%s2967_s0 + $0x14] ss:$36 sps:$4 sm:$0xff]   ;;  %v2324_v34 = vld [vmem:[%s2967_s0 + $0x1c] ss:$36 sps:$4 sm:$0xff]  }
  0x25   :  { %1079 = vmatprep.mubr.bf16.mxu0 %v2247_v38  ;;  %1176 = vmatprep.mubr.bf16.mxu1 %v2249_v39  ;;  %v2322_v36 = vld [vmem:[%s2967_s0 + $0x18] ss:$36 sps:$4 sm:$0xff]   ;;  %v2328_v38 = vld [vmem:[%s2967_s0 + $0x64] ss:$36 sps:$4 sm:$0xff]  }
  0x26   :  { %2017 = vmatprep.subr.bf16.mxu0 %v2253_v42  ;;  %2080 = vmatpush3.bf16.msra.mxu1 %v2264_v50  ;;  %v2326_v37 = vld [vmem:[%s2967_s0 + $0x5c] ss:$36 sps:$4 sm:$0xff]   ;;  %v2332_v39 = vld [vmem:[%s2966_s1 + $0x208] sm:$0xff]   ;;  %v2342_v50 = vld [vmem:[%s2967_s0 + $0xf4] ss:$36 sps:$4 sm:$0xff]  }
  0x27   :  { %2081 = vmatprep.subr.bf16.mxu1 %v2272_v55  ;;  %v2331_v42 = vld [vmem:[%s2967_s0 + $0x60] ss:$36 sps:$4 sm:$0xff]   ;;  %v2347_v55 = vld [vmem:[%s2967_s0 + $0x134] ss:$36 sps:$4 sm:$0xff]  }
  0x28   :  { %2018 = vmatpush3.bf16.msra.mxu0 %v2254_v43  ;;  %v2333_v43 = vld [vmem:[%s2967_s0 + $0xa4] ss:$36 sps:$4 sm:$0xff]  }
  0x29   :  { %2019 = vmatprep.subr.bf16.mxu0 %v2261_v46  ;;  %v2353_v46 = vld [vmem:[%s2966_s1 + $0x220] sm:$0xff]  }
  0x2a   :  { %2082 = vmatpush3.bf16.msra.mxu1 %v2274_v57  ;;  %v2374_v57 = vld [vmem:[%s2966_s1 + $0x238] sm:$0xff]  }
  0x2b   :  { %1080 = vmatmul.mubr.bf16.gmra.mrb[4].mxu0 %v2251_v40  ;;  %2083 = vmatprep.subr.bf16.mxu1 %v2282_v63  ;;  %v2339_v40 = vld [vmem:[%s2966_s1 + $0x210] sm:$0xff]   ;;  %v2359_v63 = vld [vmem:[%s2967_s0 + $0x180] ss:$36 sps:$4 sm:$0xff]  }
  0x2c   :  { %1177 = vmatmul.mubr.bf16.gmra.mrb[4].mxu1 %v2252_v41  ;;  %1087 = vmatprep.mubr.bf16.mxu0 %v2255_v44  ;;  %v2330_v41 = vld [vmem:[%s2967_s0 + $0x58] ss:$36 sps:$4 sm:$0xff]   ;;  %v2335_v44 = vld [vmem:[%s2967_s0 + $0xac] ss:$36 sps:$4 sm:$0xff]  }
  0x2d   :  { %1184 = vmatprep.mubr.bf16.mxu1 %v2257_v45  ;;  %2020 = vmatpush3.bf16.msra.mxu0 %v2263_v49  ;;  %v2346_v45 = vld [vmem:[%s2966_s1 + $0x218] sm:$0xff]   ;;  %v2340_v49 = vld [vmem:[%s2967_s0 + $0xec] ss:$36 sps:$4 sm:$0xff]  }
  0x2e   :  { %2021 = vmatprep.subr.bf16.mxu0 %v2271_v54  ;;  %2084 = vmatpush3.bf16.msra.mxu1 %v2284_v1  ;;  %v2345_v54 = vld [vmem:[%s2967_s0 + $0xf0] ss:$36 sps:$4 sm:$0xff]  }
  0x2f   :  { %2085 = vmatprep.subr.bf16.mxu1 %v2292_v7  ;;  %v2363_v1 = vld [vmem:[%s2967_s0 + $0x1cc] ss:$36 sps:$4 sm:$0xff]  }
  0x30   :  { %v2373_v7 = vld [vmem:[%s2967_s0 + $0x210] ss:$36 sps:$4 sm:$0xff]  }
  0x31   :  { %2022 = vmatpush3.bf16.msra.mxu0 %v2273_v56  ;;  %v2349_v56 = vld [vmem:[%s2967_s0 + $0x13c] ss:$36 sps:$4 sm:$0xff]  }
  0x32   :  { %2023 = vmatprep.subr.bf16.mxu0 %v2281_v62  ;;  %2086 = vmatpush3.bf16.msra.mxu1 %v2294_v9  ;;  %v2358_v62 = vld [vmem:[%s2967_s0 + $0x178] ss:$36 sps:$4 sm:$0xff]   ;;  %v2376_v9 = vld [vmem:[%s2967_s0 + $0x140] ss:$36 sps:$4 sm:$0xff]  }
  0x33   :  { %1088 = vmatmul.mubr.bf16.gmra.mrb[8].mxu0 %v2259_v48  ;;  %2087 = vmatprep.subr.bf16.mxu1 %v2302_v15  ;;  %v2338_v48 = vld [vmem:[%s2967_s0 + $0xa8] ss:$36 sps:$4 sm:$0xff]   ;;  %v2382_v15 = vld [vmem:[%s2967_s0 + $0x218] ss:$36 sps:$4 sm:$0xff]  }
  0x34   :  { %1185 = vmatmul.mubr.bf16.gmra.mrb[8].mxu1 %v2260_v51  ;;  %1095 = vmatprep.mubr.bf16.mxu0 %v2265_v52  ;;  %v2360_v51 = vld [vmem:[%s2966_s1 + $0x228] sm:$0xff]  }
  0x35   :  { %1192 = vmatprep.mubr.bf16.mxu1 %v2267_v53  ;;  %2024 = vmatpush3.bf16.msra.mxu0 %v2283_v0  ;;  %v2344_v52 = vld [vmem:[%s2967_s0 + $0xe8] ss:$36 sps:$4 sm:$0xff]   ;;  %v2367_v53 = vld [vmem:[%s2966_s1 + $0x230] sm:$0xff]  }
  0x36   :  { %2025 = vmatprep.subr.bf16.mxu0 %v2291_v6  ;;  %2088 = vmatpush3.bf16.msra.mxu1 %v2304_v17  ;;  %v2361_v0 = vld [vmem:[%s2967_s0 + $0x1c4] ss:$36 sps:$4 sm:$0xff]  }
  0x37   :  { %2089 = vmatprep.subr.bf16.mxu1 %v2305_v18  ;;  %v2372_v6 = vld [vmem:[%s2967_s0 + $0x208] ss:$36 sps:$4 sm:$0xff]  }
  0x39   :  { %2026 = vmatpush3.bf16.msra.mxu0 %v2293_v8  ;;  %v2375_v8 = vld [vmem:[%s2967_s0 + $0x20] ss:$36 sps:$4 sm:$0xff]  }
  0x3a   :  { %2027 = vmatprep.subr.bf16.mxu0 %v2301_v13  ;;  %2090 = vmatpush3.bf16.msra.mxu1 %v2306_v19  ;;  %v2380_v13 = vld [vmem:[%s2967_s0 + $0x1d0] ss:$36 sps:$4 sm:$0xff]  }
  0x3b   :  { %1096 = vmatmul.mubr.bf16.gmra.mrb[12].mxu0 %v2269_v58  ;;  %2091 = vmatprep.subr.bf16.mxu1 %v2314_v25  ;;  %v2351_v58 = vld [vmem:[%s2967_s0 + $0x130] ss:$36 sps:$4 sm:$0xff]  }
  0x3c   :  { %1193 = vmatmul.mubr.bf16.gmra.mrb[12].mxu1 %v2270_v59  ;;  %1103 = vmatprep.mubr.bf16.mxu0 %v2275_v60  ;;  %v2352_v59 = vld [vmem:[%s2967_s0 + $0x138] ss:$36 sps:$4 sm:$0xff]  }
  0x3d   :  { %1200 = vmatprep.mubr.bf16.mxu1 %v2277_v61  ;;  %2028 = vmatpush3.bf16.msra.mxu0 %v2303_v16  ;;  %v2354_v60 = vld [vmem:[%s2967_s0 + $0x17c] ss:$36 sps:$4 sm:$0xff]   ;;  %v2356_v61 = vld [vmem:[%s2967_s0 + $0x184] ss:$36 sps:$4 sm:$0xff]  }
  0x3e   :  { %2029 = vmatprep.subr.bf16.mxu0 %v2313_v24  ;;  %2092 = vmatpush3.bf16.msra.mxu1 %v2316_v27 }
  0x3f   :  { %2093 = vmatprep.subr.bf16.mxu1 %v2317_v28 }
  0x41   :  { %2030 = vmatpush3.bf16.msra.mxu0 %v2315_v26 }
  0x42   :  { %2159 = vmatprep.subr.bf16.mxu0 %v2325_v32  ;;  %2094 = vmatpush3.bf16.msra.mxu1 %v2318_v31 }
  0x43   :  { %1104 = vmatmul.mubr.bf16.gmra.mrb[16].mxu0 %v2279_v2  ;;  %2191 = vmatprep.subr.bf16.mxu1 %v2325_v32  ;;  %v2365_v2 = vld [vmem:[%s2967_s0 + $0x1c0] ss:$36 sps:$4 sm:$0xff]  }
  0x44   :  { %1201 = vmatmul.mubr.bf16.gmra.mrb[16].mxu1 %v2280_v3  ;;  %1111 = vmatprep.mubr.bf16.mxu0 %v2285_v4  ;;  %v2366_v3 = vld [vmem:[%s2967_s0 + $0x1c8] ss:$36 sps:$4 sm:$0xff]  }
  0x45   :  { %1208 = vmatprep.mubr.bf16.mxu1 %v2287_v5  ;;  %v2368_v4 = vld [vmem:[%s2967_s0 + $0x20c] ss:$36 sps:$4 sm:$0xff]   ;;  %v2370_v5 = vld [vmem:[%s2967_s0 + $0x214] ss:$36 sps:$4 sm:$0xff]  }
  0x4b   :  { %1112 = vmatmul.mubr.bf16.gmra.mrb[20].mxu0 %v2289_v10  ;;  %v2377_v10 = vld [vmem:[%s2967_s0 + $0x68] ss:$36 sps:$4 sm:$0xff]  }
  0x4c   :  { %1209 = vmatmul.mubr.bf16.gmra.mrb[20].mxu1 %v2290_v11  ;;  %1119 = vmatprep.mubr.bf16.mxu0 %v2295_v12  ;;  %v2378_v11 = vld [vmem:[%s2967_s0 + $0x188] ss:$36 sps:$4 sm:$0xff]   ;;  %v2379_v12 = vld [vmem:[%s2967_s0 + $0xb0] ss:$36 sps:$4 sm:$0xff]  }
  0x4d   :  { %1216 = vmatprep.mubr.bf16.mxu1 %v2297_v14  ;;  %v2381_v14 = vld [vmem:[%s2967_s0 + $0xf8] ss:$36 sps:$4 sm:$0xff]  }
  0x53   :  { %1120 = vmatmul.mubr.bf16.gmra.mrb[24].mxu0 %v2299_v20 }
  0x54   :  { %1217 = vmatmul.mubr.bf16.gmra.mrb[24].mxu1 %v2300_v21  ;;  %1127 = vmatprep.mubr.bf16.mxu0 %v2307_v22 }
  0x55   :  { %1224 = vmatprep.mubr.bf16.mxu1 %v2309_v23 }
  0x5b   :  { %1128 = vmatmul.mubr.bf16.gmra.mrb[28].mxu0 %v2311_v29 }
  0x5c   :  { %1225 = vmatmul.mubr.bf16.gmra.mrb[28].mxu1 %v2312_v30  ;;  %1265 = vmatprep.mubr.bf16.mxu0 %v2321_v33 }
  0x5d   :  { %1362 = vmatprep.mubr.bf16.mxu1 %v2324_v34 }
  0x63   :  { %1266 = vmatmul.mubr.bf16.vlgmr.msra.gmra.mrb[32].mxu0 %v2319_v35 }
  0x64   :  { %1363 = vmatmul.mubr.bf16.vlgmr.msra.gmra.mrb[32].mxu1 %v2322_v36  ;;  %2160 = vmatpush3.bf16.msra.mxu0 %v2325_v32 }
  0x65   :  { %1273 = vmatprep.mubr.bf16.mxu0 %v2326_v37  ;;  %1370 = vmatprep.mubr.bf16.mxu1 %v2328_v38 }
  0x66   :  { %2161 = vmatprep.subr.bf16.mxu0 %v2332_v39  ;;  %2199 = vmatpush3.bf16.msra.mxu1 %v2325_v32 }
  0x67   :  { %2192 = vmatprep.subr.bf16.mxu1 %v2332_v39 }
  0x68   :  { %2162 = vmatpush3.bf16.msra.mxu0 %v2332_v39 }
  0x69   :  { %2163 = vmatprep.subr.bf16.mxu0 %v2339_v40 }
  0x6a   :  { %2200 = vmatpush3.bf16.msra.mxu1 %v2332_v39 }
  0x6b   :  { %1274 = vmatmul.mubr.bf16.gmra.mrb[36].mxu0 %v2330_v41  ;;  %2193 = vmatprep.subr.bf16.mxu1 %v2339_v40 }
  0x6c   :  { %1371 = vmatmul.mubr.bf16.gmra.mrb[36].mxu1 %v2331_v42  ;;  %1281 = vmatprep.mubr.bf16.mxu0 %v2333_v43 }
  0x6d   :  { %1378 = vmatprep.mubr.bf16.mxu1 %v2335_v44  ;;  %2164 = vmatpush3.bf16.msra.mxu0 %v2339_v40 }
  0x6e   :  { %2165 = vmatprep.subr.bf16.mxu0 %v2346_v45  ;;  %2201 = vmatpush3.bf16.msra.mxu1 %v2339_v40 }
  0x6f   :  { %2194 = vmatprep.subr.bf16.mxu1 %v2346_v45 }
  0x71   :  { %2166 = vmatpush3.bf16.msra.mxu0 %v2346_v45 }
  0x72   :  { %2167 = vmatprep.subr.bf16.mxu0 %v2353_v46  ;;  %2202 = vmatpush3.bf16.msra.mxu1 %v2346_v45 }
  0x73   :  { %1282 = vmatmul.mubr.bf16.gmra.mrb[40].mxu0 %v2337_v47  ;;  %2195 = vmatprep.subr.bf16.mxu1 %v2353_v46 }
  0x74   :  { %1379 = vmatmul.mubr.bf16.gmra.mrb[40].mxu1 %v2338_v48  ;;  %1289 = vmatprep.mubr.bf16.mxu0 %v2340_v49 }
  0x75   :  { %1386 = vmatprep.mubr.bf16.mxu1 %v2342_v50  ;;  %2168 = vmatpush3.bf16.msra.mxu0 %v2353_v46 }
  0x76   :  { %2169 = vmatprep.subr.bf16.mxu0 %v2360_v51  ;;  %2203 = vmatpush3.bf16.msra.mxu1 %v2353_v46 }
  0x77   :  { %2196 = vmatprep.subr.bf16.mxu1 %v2360_v51 }
  0x79   :  { %2170 = vmatpush3.bf16.msra.mxu0 %v2360_v51 }
  0x7a   :  { %2171 = vmatprep.subr.bf16.mxu0 %v2367_v53  ;;  %2204 = vmatpush3.bf16.msra.mxu1 %v2360_v51 }
  0x7b   :  { %1290 = vmatmul.mubr.bf16.gmra.mrb[44].mxu0 %v2344_v52  ;;  %2197 = vmatprep.subr.bf16.mxu1 %v2367_v53 }
  0x7c   :  { %1387 = vmatmul.mubr.bf16.gmra.mrb[44].mxu1 %v2345_v54  ;;  %1297 = vmatprep.mubr.bf16.mxu0 %v2347_v55 }
  0x7d   :  { %1394 = vmatprep.mubr.bf16.mxu1 %v2349_v56  ;;  %2172 = vmatpush3.bf16.msra.mxu0 %v2367_v53 }
  0x7e   :  { %2173 = vmatprep.subr.bf16.mxu0 %v2374_v57  ;;  %2205 = vmatpush3.bf16.msra.mxu1 %v2367_v53 }
  0x7f   :  { %2198 = vmatprep.subr.bf16.mxu1 %v2374_v57 }
  0x81   :  { %2174 = vmatpush3.bf16.msra.mxu0 %v2374_v57 }
  0x82   :  { %2206 = vmatpush3.bf16.msra.mxu1 %v2374_v57 }
  0x83   :  { %1298 = vmatmul.mubr.bf16.gmra.mrb[48].mxu0 %v2351_v58 }
  0x84   :  { %1395 = vmatmul.mubr.bf16.gmra.mrb[48].mxu1 %v2352_v59  ;;  %1305 = vmatprep.mubr.bf16.mxu0 %v2354_v60 }
  0x85   :  { %1402 = vmatprep.mubr.bf16.mxu1 %v2356_v61 }
  0x8b   :  { %1306 = vmatmul.mubr.bf16.gmra.mrb[52].mxu0 %v2358_v62 }
  0x8c   :  { %1403 = vmatmul.mubr.bf16.gmra.mrb[52].mxu1 %v2359_v63  ;;  %1313 = vmatprep.mubr.bf16.mxu0 %v2361_v0 }
  0x8d   :  { %1410 = vmatprep.mubr.bf16.mxu1 %v2363_v1 }
  0x93   :  { %1314 = vmatmul.mubr.bf16.gmra.mrb[56].mxu0 %v2365_v2 }
  0x94   :  { %1411 = vmatmul.mubr.bf16.gmra.mrb[56].mxu1 %v2366_v3  ;;  %1321 = vmatprep.mubr.bf16.mxu0 %v2368_v4 }
  0x95   :  { %1418 = vmatprep.mubr.bf16.mxu1 %v2370_v5 }
  0x9b   :  { %1322 = vmatmul.mubr.bf16.gmra.mrb[60].mxu0 %v2372_v6 }
  0x9c   :  { %1419 = vmatmul.mubr.bf16.gmra.mrb[60].mxu1 %v2373_v7  ;;  %2175 = vmatprep.mubr.bf16.mxu0 %v2375_v8 }
  0x9d   :  { %2183 = vmatprep.mubr.bf16.mxu1 %v2376_v9 }
  0xa3   :  { %2176 = vmatmul.mubr.bf16.vlgmr.msra.gmra.mrb[64].mxu0 %v2377_v10 }
  0xa4   :  { %2184 = vmatmul.mubr.bf16.vlgmr.msra.gmra.mrb[64].mxu1 %v2378_v11  ;;  %2179 = vmatprep.mubr.bf16.mxu0 %v2379_v12 }
  0xa5   :  { %2187 = vmatprep.mubr.bf16.mxu1 %v2380_v13 }
  0xab   :  { %2180 = vmatmul.mubr.bf16.gmra.mrb[68].mxu0 %v2381_v14 }
  0xac   :  { %2188 = vmatmul.mubr.bf16.gmra.mrb[68].mxu1 %v2382_v15 }
  0xf6   :  { %v1903_v16 = vpop.f32.mrb[0].mxu0 }
  0xf7   :  { %v1967_v17 = vpop.f32.mrb[0].mxu1  ;;  %v1904_v18 = vpop.f32.mrb[1].mxu0 }
  0xf8   :  { %v1905_v19 = vadd.f32 %v1904_v18, %v1903_v16  ;;  %v1968_v20 = vpop.f32.mrb[1].mxu1  ;;  %v1906_v21 = vpop.f32.mrb[2].mxu0 }
  0xf9   :  { %v1969_v22 = vadd.f32 %v1968_v20, %v1967_v17  ;;  %v1970_v23 = vpop.f32.mrb[2].mxu1  ;;  %v1907_v24 = vpop.f32.mrb[3].mxu0 }
  0xfa   :  { %v1908_v25 = vadd.f32 %v1907_v24, %v1906_v21  ;;  %v1971_v26 = vpop.f32.mrb[3].mxu1 }
  0xfb   :  { %v2840_v27 = vadd.f32 %v1969_v22, %v1905_v19  ;;  %v1972_v28 = vadd.f32 %v1971_v26, %v1970_v23 }
  0xfd   :  { %v2842_v29 = vadd.f32 %v1972_v28, %v1908_v25 }
  0xfe   :  { %v1909_v30 = vpop.f32.mrb[4].mxu0 }
  0xff   :  { %v1973_v31 = vpop.f32.mrb[4].mxu1  ;;  %v1910_v32 = vpop.f32.mrb[5].mxu0 }
 0x100   :  { %v1911_v33 = vadd.f32 %v1910_v32, %v1909_v30  ;;  %v1974_v34 = vpop.f32.mrb[5].mxu1  ;;  %v1912_v35 = vpop.f32.mrb[6].mxu0 }
 0x101   :  { %v1975_v36 = vadd.f32 %v1974_v34, %v1973_v31  ;;  %v1976_v37 = vpop.f32.mrb[6].mxu1  ;;  %v1913_v38 = vpop.f32.mrb[7].mxu0 }
 0x102   :  { %v1914_v39 = vadd.f32 %v1913_v38, %v1912_v35  ;;  %v1977_v40 = vpop.f32.mrb[7].mxu1 }
 0x103   :  { %v2844_v41 = vadd.f32 %v1975_v36, %v1911_v33  ;;  %v1978_v42 = vadd.f32 %v1977_v40, %v1976_v37 }
 0x105   :  { %v2846_v43 = vadd.f32 %v1978_v42, %v1914_v39 }
 0x106   :  { %v1915_v44 = vpop.f32.mrb[8].mxu0 }
 0x107   :  { %v1979_v45 = vpop.f32.mrb[8].mxu1  ;;  %v1916_v46 = vpop.f32.mrb[9].mxu0 }
 0x108   :  { %v1917_v47 = vadd.f32 %v1916_v46, %v1915_v44  ;;  %v1980_v48 = vpop.f32.mrb[9].mxu1  ;;  %v1918_v49 = vpop.f32.mrb[10].mxu0 }
 0x109   :  { %v1981_v50 = vadd.f32 %v1980_v48, %v1979_v45  ;;  %v1982_v51 = vpop.f32.mrb[10].mxu1  ;;  %v1919_v52 = vpop.f32.mrb[11].mxu0 }
 0x10a   :  { %v1920_v53 = vadd.f32 %v1919_v52, %v1918_v49  ;;  %v1983_v54 = vpop.f32.mrb[11].mxu1 }
 0x10b   :  { %v2848_v55 = vadd.f32 %v1981_v50, %v1917_v47  ;;  %v1984_v56 = vadd.f32 %v1983_v54, %v1982_v51 }
 0x10d   :  { %v2850_v57 = vadd.f32 %v1984_v56, %v1920_v53 }
 0x10e   :  { %v1921_v58 = vpop.f32.mrb[12].mxu0 }
 0x10f   :  { %v1985_v59 = vpop.f32.mrb[12].mxu1  ;;  %v1922_v60 = vpop.f32.mrb[13].mxu0 }
 0x110   :  { %v1923_v61 = vadd.f32 %v1922_v60, %v1921_v58  ;;  %v1986_v62 = vpop.f32.mrb[13].mxu1  ;;  %v1924_v63 = vpop.f32.mrb[14].mxu0 }
 0x111   :  { %v1987_v0 = vadd.f32 %v1986_v62, %v1985_v59  ;;  %v1988_v1 = vpop.f32.mrb[14].mxu1  ;;  %v1925_v2 = vpop.f32.mrb[15].mxu0 }
 0x112   :  { %v1926_v3 = vadd.f32 %v1925_v2, %v1924_v63  ;;  %v1989_v4 = vpop.f32.mrb[15].mxu1 }
 0x113   :  { %v2852_v5 = vadd.f32 %v1987_v0, %v1923_v61  ;;  %v1990_v6 = vadd.f32 %v1989_v4, %v1988_v1 }
 0x115   :  { %v2854_v7 = vadd.f32 %v1990_v6, %v1926_v3 }
 0x116   :  { %v1927_v8 = vpop.f32.mrb[16].mxu0 }
 0x117   :  { %v1991_v9 = vpop.f32.mrb[16].mxu1  ;;  %v1928_v10 = vpop.f32.mrb[17].mxu0 }
 0x118   :  { %v1929_v11 = vadd.f32 %v1928_v10, %v1927_v8  ;;  %v1992_v12 = vpop.f32.mrb[17].mxu1  ;;  %v1930_v13 = vpop.f32.mrb[18].mxu0 }
 0x119   :  { %v1993_v14 = vadd.f32 %v1992_v12, %v1991_v9  ;;  %v1994_v15 = vpop.f32.mrb[18].mxu1  ;;  %v1931_v16 = vpop.f32.mrb[19].mxu0 }
 0x11a   :  { %v1932_v17 = vadd.f32 %v1931_v16, %v1930_v13  ;;  %v1995_v18 = vpop.f32.mrb[19].mxu1 }
 0x11b   :  { %v2856_v19 = vadd.f32 %v1993_v14, %v1929_v11  ;;  %v1996_v20 = vadd.f32 %v1995_v18, %v1994_v15 }
 0x11d   :  { %v2858_v21 = vadd.f32 %v1996_v20, %v1932_v17 }
 0x11e   :  { %v1933_v22 = vpop.f32.mrb[20].mxu0 }
 0x11f   :  { %v1997_v23 = vpop.f32.mrb[20].mxu1  ;;  %v1934_v24 = vpop.f32.mrb[21].mxu0 }
 0x120   :  { %v1935_v25 = vadd.f32 %v1934_v24, %v1933_v22  ;;  %v1998_v26 = vpop.f32.mrb[21].mxu1  ;;  %v1936_v28 = vpop.f32.mrb[22].mxu0 }
 0x121   :  { %v1999_v30 = vadd.f32 %v1998_v26, %v1997_v23  ;;  %v2000_v31 = vpop.f32.mrb[22].mxu1  ;;  %v1937_v32 = vpop.f32.mrb[23].mxu0 }
 0x122   :  { %v1938_v33 = vadd.f32 %v1937_v32, %v1936_v28  ;;  %v2001_v34 = vpop.f32.mrb[23].mxu1 }
 0x123   :  { %v2860_v35 = vadd.f32 %v1999_v30, %v1935_v25  ;;  %v2002_v36 = vadd.f32 %v2001_v34, %v2000_v31 }
 0x125   :  { %v2862_v37 = vadd.f32 %v2002_v36, %v1938_v33 }
 0x126   :  { %v1939_v38 = vpop.f32.mrb[24].mxu0 }
 0x127   :  { %v2003_v39 = vpop.f32.mrb[24].mxu1  ;;  %v1940_v40 = vpop.f32.mrb[25].mxu0 }
 0x128   :  { %v1941_v42 = vadd.f32 %v1940_v40, %v1939_v38  ;;  %v2004_v44 = vpop.f32.mrb[25].mxu1  ;;  %v1942_v45 = vpop.f32.mrb[26].mxu0 }
 0x129   :  { %v2005_v46 = vadd.f32 %v2004_v44, %v2003_v39  ;;  %v2006_v47 = vpop.f32.mrb[26].mxu1  ;;  %v1943_v48 = vpop.f32.mrb[27].mxu0 }
 0x12a   :  { %v1944_v49 = vadd.f32 %v1943_v48, %v1942_v45  ;;  %v2007_v50 = vpop.f32.mrb[27].mxu1 }
 0x12b   :  { %v2864_v51 = vadd.f32 %v2005_v46, %v1941_v42  ;;  %v2008_v52 = vadd.f32 %v2007_v50, %v2006_v47 }
 0x12d   :  { %v2866_v53 = vadd.f32 %v2008_v52, %v1944_v49 }
 0x12e   :  { %v1945_v54 = vpop.f32.mrb[28].mxu0 }
 0x12f   :  { %v2009_v56 = vpop.f32.mrb[28].mxu1  ;;  %v1946_v58 = vpop.f32.mrb[29].mxu0 }
 0x130   :  { %v1947_v59 = vadd.f32 %v1946_v58, %v1945_v54  ;;  %v2010_v60 = vpop.f32.mrb[29].mxu1  ;;  %v1948_v61 = vpop.f32.mrb[30].mxu0 }
 0x131   :  { %v2011_v62 = vadd.f32 %v2010_v60, %v2009_v56  ;;  %v2012_v63 = vpop.f32.mrb[30].mxu1  ;;  %v1949_v0 = vpop.f32.mrb[31].mxu0 }
 0x132   :  { %v1950_v1 = vadd.f32 %v1949_v0, %v1948_v61  ;;  %v2013_v2 = vpop.f32.mrb[31].mxu1 }
 0x133   :  { %v2868_v3 = vadd.f32 %v2011_v62, %v1947_v59  ;;  %v2014_v4 = vadd.f32 %v2013_v2, %v2012_v63 }
 0x135   :  { %v2870_v6 = vadd.f32 %v2014_v4, %v1950_v1 }
 0x136   :  { %v2031_v8 = vpop.f32.mrb[32].mxu0 }
 0x137   :  { %v2032_v9 = vpop.f32.mrb[33].mxu0  ;;  %v2095_v10 = vpop.f32.mrb[32].mxu1 }
 0x138   :  { %v2033_v11 = vadd.f32 %v2032_v9, %v2031_v8  ;;  %v2034_v12 = vpop.f32.mrb[34].mxu0  ;;  %v2096_v13 = vpop.f32.mrb[33].mxu1 }
 0x139   :  { %v2035_v14 = vpop.f32.mrb[35].mxu0  ;;  %v2097_v15 = vadd.f32 %v2096_v13, %v2095_v10  ;;  %v2098_v16 = vpop.f32.mrb[34].mxu1 }
 0x13a   :  { %v1268_v17 = vadd.f32 %v2033_v11, %v2840_v27  ;;  %v2036_v18 = vadd.f32 %v2035_v14, %v2034_v12  ;;  %v2099_v20 = vpop.f32.mrb[35].mxu1 }
 0x13b   :  { %v2100_v22 = vadd.f32 %v2099_v20, %v2098_v16 }
 0x13c   :  { %v1271_v23 = vadd.f32 %v2036_v18, %v2842_v29  ;;  %v2874_v24 = vadd.f32 %v2097_v15, %v1268_v17 }
 0x13e   :  { %v2037_v25 = vpop.f32.mrb[36].mxu0  ;;  %v2876_v26 = vadd.f32 %v2100_v22, %v1271_v23 }
 0x13f   :  { %v2038_v28 = vpop.f32.mrb[37].mxu0  ;;  %v2101_v30 = vpop.f32.mrb[36].mxu1 }
 0x140   :  { %v2039_v31 = vadd.f32 %v2038_v28, %v2037_v25  ;;  %v2040_v32 = vpop.f32.mrb[38].mxu0  ;;  %v2102_v33 = vpop.f32.mrb[37].mxu1 }
 0x141   :  { %v2041_v34 = vpop.f32.mrb[39].mxu0  ;;  %v2103_v36 = vadd.f32 %v2102_v33, %v2101_v30  ;;  %v2104_v38 = vpop.f32.mrb[38].mxu1 }
 0x142   :  { %v1276_v27 = vadd.f32 %v2039_v31, %v2844_v41  ;;  %v2042_v39 = vadd.f32 %v2041_v34, %v2040_v32  ;;  %v2105_v40 = vpop.f32.mrb[39].mxu1 }
 0x143   :  { %v2106_v42 = vadd.f32 %v2105_v40, %v2104_v38 }
 0x144   :  { %v1279_v29 = vadd.f32 %v2042_v39, %v2846_v43  ;;  %v2880_v44 = vadd.f32 %v2103_v36, %v1276_v27 }
 0x146   :  { %v2043_v45 = vpop.f32.mrb[40].mxu0  ;;  %v2882_v46 = vadd.f32 %v2106_v42, %v1279_v29 }
 0x147   :  { %v2044_v47 = vpop.f32.mrb[41].mxu0  ;;  %v2107_v48 = vpop.f32.mrb[40].mxu1 }
 0x148   :  { %v2045_v49 = vadd.f32 %v2044_v47, %v2043_v45  ;;  %v2046_v50 = vpop.f32.mrb[42].mxu0  ;;  %v2108_v52 = vpop.f32.mrb[41].mxu1 }
 0x149   :  { %v2047_v54 = vpop.f32.mrb[43].mxu0  ;;  %v2109_v56 = vadd.f32 %v2108_v52, %v2107_v48  ;;  %v2110_v58 = vpop.f32.mrb[42].mxu1 }
 0x14a   :  { %v1284_v41 = vadd.f32 %v2045_v49, %v2848_v55  ;;  %v2048_v59 = vadd.f32 %v2047_v54, %v2046_v50  ;;  %v2111_v60 = vpop.f32.mrb[43].mxu1 }
 0x14b   :  { %v2112_v61 = vadd.f32 %v2111_v60, %v2110_v58 }
 0x14c   :  { %v1287_v43 = vadd.f32 %v2048_v59, %v2850_v57  ;;  %v2886_v62 = vadd.f32 %v2109_v56, %v1284_v41 }
 0x14e   :  { %v2049_v63 = vpop.f32.mrb[44].mxu0  ;;  %v2888_v0 = vadd.f32 %v2112_v61, %v1287_v43 }
 0x14f   :  { %v2050_v1 = vpop.f32.mrb[45].mxu0  ;;  %v2113_v2 = vpop.f32.mrb[44].mxu1 }
 0x150   :  { %v2051_v4 = vadd.f32 %v2050_v1, %v2049_v63  ;;  %v2052_v8 = vpop.f32.mrb[46].mxu0  ;;  %v2114_v9 = vpop.f32.mrb[45].mxu1 }
 0x151   :  { %v2053_v10 = vpop.f32.mrb[47].mxu0  ;;  %v2115_v11 = vadd.f32 %v2114_v9, %v2113_v2  ;;  %v2116_v12 = vpop.f32.mrb[46].mxu1 }
 0x152   :  { %v1292_v55 = vadd.f32 %v2051_v4, %v2852_v5  ;;  %v2054_v13 = vadd.f32 %v2053_v10, %v2052_v8  ;;  %v2117_v14 = vpop.f32.mrb[47].mxu1 }
 0x153   :  { %v2118_v15 = vadd.f32 %v2117_v14, %v2116_v12 }
 0x154   :  { %v1295_v57 = vadd.f32 %v2054_v13, %v2854_v7  ;;  %v2892_v16 = vadd.f32 %v2115_v11, %v1292_v55 }
 0x156   :  { %v2055_v17 = vpop.f32.mrb[48].mxu0  ;;  %v2894_v18 = vadd.f32 %v2118_v15, %v1295_v57 }
 0x157   :  { %v2056_v20 = vpop.f32.mrb[49].mxu0  ;;  %v2119_v22 = vpop.f32.mrb[48].mxu1 }
 0x158   :  { %v2057_v23 = vadd.f32 %v2056_v20, %v2055_v17  ;;  %v2058_v25 = vpop.f32.mrb[50].mxu0  ;;  %v2120_v28 = vpop.f32.mrb[49].mxu1 }
 0x159   :  { %v2059_v30 = vpop.f32.mrb[51].mxu0  ;;  %v2121_v31 = vadd.f32 %v2120_v28, %v2119_v22  ;;  %v2122_v32 = vpop.f32.mrb[50].mxu1 }
 0x15a   :  { %v1300_v5 = vadd.f32 %v2057_v23, %v2856_v19  ;;  %v2060_v33 = vadd.f32 %v2059_v30, %v2058_v25  ;;  %v2123_v34 = vpop.f32.mrb[51].mxu1 }
 0x15b   :  { %v2124_v36 = vadd.f32 %v2123_v34, %v2122_v32 }
 0x15c   :  { %v1303_v7 = vadd.f32 %v2060_v33, %v2858_v21  ;;  %v1397_v38 = vadd.f32 %v2121_v31, %v1300_v5 }
 0x15e   :  { %v2061_v27 = vpop.f32.mrb[52].mxu0  ;;  %v2898_v39 = vadd.f32 %v2124_v36, %v1303_v7 }
 0x15f   :  { %v2062_v40 = vpop.f32.mrb[53].mxu0  ;;  %v2125_v42 = vpop.f32.mrb[52].mxu1 }
 0x160   :  { %v2063_v29 = vadd.f32 %v2062_v40, %v2061_v27  ;;  %v2064_v45 = vpop.f32.mrb[54].mxu0  ;;  %v2126_v47 = vpop.f32.mrb[53].mxu1 }
 0x161   :  { %v2065_v48 = vpop.f32.mrb[55].mxu0  ;;  %v2127_v49 = vadd.f32 %v2126_v47, %v2125_v42  ;;  %v2128_v50 = vpop.f32.mrb[54].mxu1 }
 0x162   :  { %v1308_v52 = vadd.f32 %v2063_v29, %v2860_v35  ;;  %v2066_v19 = vadd.f32 %v2065_v48, %v2064_v45  ;;  %v2129_v54 = vpop.f32.mrb[55].mxu1 }
 0x163   :  { %v2130_v56 = vadd.f32 %v2129_v54, %v2128_v50 }
 0x164   :  { %v1311_v58 = vadd.f32 %v2066_v19, %v2862_v37  ;;  %v1405_v21 = vadd.f32 %v2127_v49, %v1308_v52 }
 0x166   :  { %v2067_v41 = vpop.f32.mrb[56].mxu0  ;;  %v1408_v59 = vadd.f32 %v2130_v56, %v1311_v58 }
 0x167   :  { %v2068_v60 = vpop.f32.mrb[57].mxu0  ;;  %v2131_v61 = vpop.f32.mrb[56].mxu1 }
 0x168   :  { %v2069_v43 = vadd.f32 %v2068_v60, %v2067_v41  ;;  %v2070_v63 = vpop.f32.mrb[58].mxu0  ;;  %v2132_v1 = vpop.f32.mrb[57].mxu1 }
 0x169   :  { %v2071_v2 = vpop.f32.mrb[59].mxu0  ;;  %v2133_v4 = vadd.f32 %v2132_v1, %v2131_v61  ;;  %v2134_v8 = vpop.f32.mrb[58].mxu1 }
 0x16a   :  { %v1316_v9 = vadd.f32 %v2069_v43, %v2864_v51  ;;  %v2072_v10 = vadd.f32 %v2071_v2, %v2070_v63  ;;  %v2135_v35 = vpop.f32.mrb[59].mxu1 }
 0x16b   :  { %v2136_v11 = vadd.f32 %v2135_v35, %v2134_v8 }
 0x16c   :  { %v1319_v12 = vadd.f32 %v2072_v10, %v2866_v53  ;;  %v1413_v55 = vadd.f32 %v2133_v4, %v1316_v9 }
 0x16e   :  { %v2073_v37 = vpop.f32.mrb[60].mxu0  ;;  %v2904_v13 = vadd.f32 %v2136_v11, %v1319_v12 }
 0x16f   :  { %v2074_v14 = vpop.f32.mrb[61].mxu0  ;;  %v2137_v15 = vpop.f32.mrb[60].mxu1 }
 0x170   :  { %v2075_v57 = vadd.f32 %v2074_v14, %v2073_v37  ;;  %v2076_v17 = vpop.f32.mrb[62].mxu0  ;;  %v2138_v20 = vpop.f32.mrb[61].mxu1 }
 0x171   :  { %v2077_v22 = vpop.f32.mrb[63].mxu0  ;;  %v2139_v23 = vadd.f32 %v2138_v20, %v2137_v15  ;;  %v2140_v25 = vpop.f32.mrb[62].mxu1 }
 0x172   :  { %v1324_v28 = vadd.f32 %v2075_v57, %v2868_v3  ;;  %v2078_v51 = vadd.f32 %v2077_v22, %v2076_v17  ;;  %v2141_v30 = vpop.f32.mrb[63].mxu1 }
 0x173   :  { %v2142_v31 = vadd.f32 %v2141_v30, %v2140_v25 }
 0x174   :  { %v1327_v32 = vadd.f32 %v2078_v51, %v2870_v6  ;;  %v1421_v53 = vadd.f32 %v2139_v23, %v1324_v28 }
 0x176   :  { %v2177_v5 = vpop.f32.mrb[64].mxu0  ;;  %v1424_v33 = vadd.f32 %v2142_v31, %v1327_v32 }
 0x177   :  { %v1470_v34 = vadd.f32 %v2177_v5, %v2880_v44  ;;  %v2185_v36 = vpop.f32.mrb[64].mxu1  ;;  %v1461_v7 = vpop.f32.mrb[65].mxu0 }
 0x178   :  { %v2909_v27 = vadd.f32 %v2185_v36, %v1405_v21  ;;  %v1462_v40 = vadd.f32 %v1461_v7, %v2874_v24  ;;  %v1493_v42 = vpop.f32.mrb[65].mxu1  ;;  %v2178_v29 = vpop.f32.mrb[66].mxu0 }
 0x179   :  { %v2912_v45 = vadd.f32 %v1493_v42, %v1397_v38  ;;  %v1473_v3 = vadd.f32 %v2178_v29, %v2882_v46  ;;  %v2186_v47 = vpop.f32.mrb[66].mxu1  ;;  %v1464_v48 = vpop.f32.mrb[67].mxu0  ;;  %v1621_v58 = vmul.f32 %v1470_v34, %v1470_v34 }
 0x17a   :  { %v2915_v6 = vadd.f32 %v2186_v47, %v1408_v59  ;;  %v1465_v49 = vadd.f32 %v1464_v48, %v2876_v26  ;;  %v1496_v50 = vpop.f32.mrb[67].mxu1  ;;  %v1619_v56 = vmul.f32 %v1462_v40, %v1462_v40  ;;  %v1629_v7 = vmul.f32 %v2909_v27, %v2909_v27 }
 0x17b   :  { %v1848_v44 = vpack.c.bf16 %v1473_v3, %v1470_v34  ;;  %v1497_v52 = vadd.f32 %v1496_v50, %v2898_v39  ;;  %v1622_v4 = vmul.f32 %v1473_v3, %v1473_v3  ;;  %v1627_v32 = vmul.f32 %v2912_v45, %v2912_v45 }
 0x17c   :  { %v1868_v19 = vpack.c.bf16 %v2915_v6, %v2909_v27  ;;  %v1843_v24 = vpack.c.bf16 %v1465_v49, %v1462_v40  ;;  %v1604_v54 = vadd.f32 %v1465_v49, %v1462_v40  ;;  %v1620_v46 = vmul.f32 %v1465_v49, %v1465_v49 }
 0x17d   :  { %1880 = vst [vmem:[%s2968_s2 + $0x8] sm:$0xff] %v1848_v44   ;;  %v1863_v38 = vpack.c.bf16 %v1497_v52, %v2912_v45  ;;  %v1630_v29 = vmul.f32 %v2915_v6, %v2915_v6 }
 0x17e   :  { %1884 = vst [vmem:[%s2968_s2 + $0x28] sm:$0xff] %v1868_v19   ;;  %1844 = vst [vmem:[%s2968_s2] sm:$0xff] %v1843_v24   ;;  %v1605_v26 = vadd.f32 %v1604_v54, %v1470_v34  ;;  %v2181_v39 = vpop.f32.mrb[68].mxu0  ;;  %v1635_v21 = vadd.f32 %v1620_v46, %v1619_v56 }
 0x17f   :  { %1883 = vst [vmem:[%s2968_s2 + $0x20] sm:$0xff] %v1863_v38   ;;  %v1486_v41 = vadd.f32 %v2181_v39, %v2892_v16  ;;  %v2189_v59 = vpop.f32.mrb[68].mxu1  ;;  %v1477_v60 = vpop.f32.mrb[69].mxu0 }
 0x180   :  { %v1518_v61 = vadd.f32 %v2189_v59, %v1421_v53  ;;  %v1478_v43 = vadd.f32 %v1477_v60, %v2886_v62  ;;  %v1606_v63 = vadd.f32 %v1605_v26, %v1473_v3  ;;  %v1509_v1 = vpop.f32.mrb[69].mxu1  ;;  %v2182_v2 = vpop.f32.mrb[70].mxu0  ;;  %v1636_v8 = vadd.f32 %v1635_v21, %v1621_v58 }
 0x181   :  { %v1510_v9 = vadd.f32 %v1509_v1, %v1413_v55  ;;  %v1489_v10 = vadd.f32 %v2182_v2, %v2894_v18  ;;  %v2190_v35 = vpop.f32.mrb[70].mxu1  ;;  %v1480_v11 = vpop.f32.mrb[71].mxu0  ;;  %v1625_v28 = vmul.f32 %v1486_v41, %v1486_v41 }
 0x182   :  { %v1607_v12 = vadd.f32 %v1606_v63, %v1478_v43  ;;  %v1623_v37 = vmul.f32 %v1478_v43, %v1478_v43  ;;  %v1521_v14 = vadd.f32 %v2190_v35, %v1424_v33  ;;  %v1512_v15 = vpop.f32.mrb[71].mxu1  ;;  %v1637_v16 = vadd.f32 %v1636_v8, %v1622_v4 }
 0x183   :  { %v1858_v57 = vpack.c.bf16 %v1489_v10, %v1486_v41  ;;  %v1481_v20 = vadd.f32 %v1480_v11, %v2888_v0  ;;  %v1513_v62 = vadd.f32 %v1512_v15, %v2904_v13  ;;  %v1626_v51 = vmul.f32 %v1489_v10, %v1489_v10 }
 0x184   :  { %v1878_v17 = vpack.c.bf16 %v1521_v14, %v1518_v61  ;;  %v1638_v22 = vadd.f32 %v1637_v16, %v1623_v37  ;;  %v1628_v33 = vmul.f32 %v1497_v52, %v1497_v52  ;;  %v1631_v48 = vmul.f32 %v1510_v9, %v1510_v9 }
 0x185   :  { %1882 = vst [vmem:[%s2968_s2 + $0x18] sm:$0xff] %v1858_v57   ;;  %v1853_v18 = vpack.c.bf16 %v1481_v20, %v1478_v43  ;;  %v1608_v55 = vadd.f32 %v1607_v12, %v1481_v20  ;;  %v1624_v23 = vmul.f32 %v1481_v20, %v1481_v20  ;;  %v1873_v25 = vpack.c.bf16 %v1513_v62, %v1510_v9 }
 0x186   :  { %1886 = vst [vmem:[%s2968_s2 + $0x38] sm:$0xff] %v1878_v17   ;;  %v1632_v44 = vmul.f32 %v1513_v62, %v1513_v62  ;;  %v1633_v24 = vmul.f32 %v1518_v61, %v1518_v61  ;;  %v1634_v56 = vmul.f32 %v1521_v14, %v1521_v14 }
 0x187   :  { %1881 = vst [vmem:[%s2968_s2 + $0x10] sm:$0xff] %v1853_v18   ;;  %v1609_v0 = vadd.f32 %v1608_v55, %v1486_v41  ;;  %v1639_v13 = vadd.f32 %v1638_v22, %v1624_v23  ;;  %1885 = vst [vmem:[%s2968_s2 + $0x30] sm:$0xff] %v1873_v25  }
 0x189   :  { %v1610_v30 = vadd.f32 %v1609_v0, %v1489_v10  ;;  %v1640_v31 = vadd.f32 %v1639_v13, %v1625_v28 }
 0x18b   :  { %v1611_v53 = vadd.f32 %v1610_v30, %v2912_v45  ;;  %v1641_v5 = vadd.f32 %v1640_v31, %v1626_v51 }
 0x18d   :  { %v1642_v34 = vadd.f32 %v1641_v5, %v1627_v32  ;;  %v1612_v36 = vadd.f32 %v1611_v53, %v1497_v52 }
 0x18f   :  { %v1613_v40 = vadd.f32 %v1612_v36, %v2909_v27  ;;  %v1643_v42 = vadd.f32 %v1642_v34, %v1628_v33 }
 0x191   :  { %v1614_v3 = vadd.f32 %v1613_v40, %v2915_v6  ;;  %v1644_v47 = vadd.f32 %v1643_v42, %v1629_v7 }
 0x193   :  { %v1615_v49 = vadd.f32 %v1614_v3, %v1510_v9  ;;  %v1645_v50 = vadd.f32 %v1644_v47, %v1630_v29 }
 0x195   :  { %v1616_v45 = vadd.f32 %v1615_v49, %v1513_v62  ;;  %v1646_v19 = vadd.f32 %v1645_v50, %v1631_v48 }
 0x197   :  { %v1617_v52 = vadd.f32 %v1616_v45, %v1518_v61  ;;  %v1647_v54 = vadd.f32 %v1646_v19, %v1632_v44 }
 0x199   :  { %v1618_v46 = vadd.f32 %v1617_v52, %v1521_v14  ;;  %v1648_v38 = vadd.f32 %v1647_v54, %v1633_v24 }
 0x19b   :  { %v1649_v27 = vadd.f32 %v1648_v38, %v1634_v56  ;;  %1650 = vst [vmem:[%s2969_s3] sm:$0xff] %v1618_v46 }
 0x19d   :  { %1651 = vst [vmem:[%s2970_s4] sm:$0xff] %v1649_v27 }

</bundles_post_ra>
